<compile_context>
chip_gen: v5e
topology: v5e:2x2
jax: 0.10.0
libtpu: 0.0.40
codegen_flags: <defaults>
</compile_context>

<pallas_src>
import functools

import jax
import jax.numpy as jnp
from jax.experimental import pallas as pl
from jax.experimental.pallas import tpu as pltpu

_VMEM_LIMIT = 32 * 1024 * 1024   # safe on v5e/v6e/v7x
_BN_EPS = 1e-5
_TR = 1024                       # row tile for the lane-dense BN+ReLU kernel


def _round_up(x, m):
    return (x + m - 1) // m * m


# ---------------------------------------------------------------------------
# Pallas kernels
# ---------------------------------------------------------------------------
def _conv_stats_kernel(x_ref, w_ref, sc_ref, sh_ref, o_ref, s_ref, q_ref, a_ref,
                       *, stride, apply_input_bn):
    """Fused-im2col 3x3 conv (pad=1) + per-grid-step BN partial statistics.

    x_ref : (1, Hp*stride, Wq, Cin) f32  padded (column-phase-split) input
    w_ref : (3, 3, Cin, Cout)       bf16 conv weights
    sc_ref, sh_ref : (1, Cin)       f32  fused producer BN scale/shift (ignored
                                         for the first layer)
    o_ref : (1, Ho, Wo, Cout)       f32  raw conv output (its own BN+ReLU is
                                         applied by the consumer)
    s_ref, q_ref : (1, 1, Cout)     f32  per-grid-step sum / sum-of-squares
    a_ref : (Hp*stride, Wq, Cin)    bf16 VMEM staging scratch
    """
    _, Ho, Wo, Cout = o_ref.shape

    # Stage the input tile once: fused producer BN+ReLU (if any) + bf16 cast.
    x = x_ref[0]
    if apply_input_bn:
        x = jnp.maximum(x * sc_ref[...] + sh_ref[...], 0.0)
    a_ref[...] = x.astype(jnp.bfloat16)

    # Pre-load the 9 tap matrices (Cin, Cout) once.
    w_taps = [[w_ref[kh, kw] for kw in range(3)] for kh in range(3)]

    s_tot = jnp.zeros((1, Cout), jnp.float32)
    q_tot = jnp.zeros((1, Cout), jnp.float32)
    for oh in range(Ho):
        acc = jnp.zeros((Wo, Cout), jnp.float32)
        for kh in range(3):
            for kw in range(3):
                row = (stride * oh + kh) * stride + (kw % stride)
                off = kw // stride
                lhs = a_ref[row, off:off + Wo, :]              # (Wo, Cin) bf16
                acc = acc + jnp.dot(lhs, w_taps[kh][kw],
                                    preferred_element_type=jnp.float32)
        o_ref[0, oh] = acc
        s_tot = s_tot + jnp.sum(acc, axis=0, keepdims=True)
        q_tot = q_tot + jnp.sum(acc * acc, axis=0, keepdims=True)
    s_ref[0] = s_tot
    q_ref[0] = q_tot


def _bn_relu_kernel(x_ref, scale_ref, shift_ref, o_ref):
    """Fused BatchNorm scale/shift + ReLU on a lane-dense (rows, 128) slab."""
    o_ref[...] = jnp.maximum(x_ref[...] * scale_ref[...] + shift_ref[...], 0.0)


# ---------------------------------------------------------------------------
# pallas_call wrappers
# ---------------------------------------------------------------------------
def _phase_split(xp, stride):
    """(N, Hp, Wp, C) -> (N, Hp*stride, ceil(Wp/stride), C).  Column-phase split
    so the strided conv needs only contiguous slices inside the kernel."""
    if stride == 1:
        return xp
    N, Hp, Wp, C = xp.shape
    Wq = -(-Wp // stride)
    if Wq * stride != Wp:
        xp = jnp.pad(xp, ((0, 0), (0, 0), (0, Wq * stride - Wp), (0, 0)))
    x = xp.reshape(N, Hp, Wq, stride, C)
    x = jnp.transpose(x, (0, 1, 3, 2, 4))
    return x.reshape(N, Hp * stride, Wq, C)


def _conv_with_stats(xps, w4, in_scale, in_shift, *, stride, apply_input_bn, out_hw):
    N, HpS, Wq, Cin = xps.shape
    Cout = w4.shape[-1]
    Ho, Wo = out_hw
    kernel = functools.partial(_conv_stats_kernel, stride=stride,
                               apply_input_bn=apply_input_bn)
    y, s, q = pl.pallas_call(
        kernel,
        out_shape=(
            jax.ShapeDtypeStruct((N, Ho, Wo, Cout), jnp.float32),
            jax.ShapeDtypeStruct((N, 1, Cout), jnp.float32),
            jax.ShapeDtypeStruct((N, 1, Cout), jnp.float32),
        ),
        grid=(N,),
        in_specs=[
            pl.BlockSpec((1, HpS, Wq, Cin), lambda n: (n, 0, 0, 0)),
            pl.BlockSpec((3, 3, Cin, Cout), lambda n: (0, 0, 0, 0)),
            pl.BlockSpec((1, Cin), lambda n: (0, 0)),
            pl.BlockSpec((1, Cin), lambda n: (0, 0)),
        ],
        out_specs=(
            pl.BlockSpec((1, Ho, Wo, Cout), lambda n: (n, 0, 0, 0)),
            pl.BlockSpec((1, 1, Cout), lambda n: (n, 0, 0)),
            pl.BlockSpec((1, 1, Cout), lambda n: (n, 0, 0)),
        ),
        scratch_shapes=[pltpu.VMEM((HpS, Wq, Cin), jnp.bfloat16)],
        compiler_params=pltpu.CompilerParams(
            dimension_semantics=("parallel",),
            vmem_limit_bytes=_VMEM_LIMIT),
    )(xps, w4, in_scale.reshape(1, Cin), in_shift.reshape(1, Cin))
    # Per-grid-step partials -> global (C,) stats; reduced in the wrapper so the
    # Pallas grid stays fully parallel.
    return y, jnp.sum(s, axis=(0, 1)), jnp.sum(q, axis=(0, 1))


def _bn_relu(y, scale, shift):
    """relu(y*scale + shift) over NHWC, executed lane-dense: the slab is viewed
    as (rows, C*t) with C*t == 128 when possible, with large row tiles."""
    N, H, W, C = y.shape
    M = N * H * W
    t = 128 // C if (C <= 128 and 128 % C == 0 and M % (128 // C) == 0) else 1
    L = C * t
    R = M // t
    y2 = y.reshape(R, L)
    sc = jnp.tile(scale.astype(jnp.float32), t).reshape(1, L)
    sh = jnp.tile(shift.astype(jnp.float32), t).reshape(1, L)
    tr = _TR if R >= _TR else _round_up(R, 8)
    Rp = _round_up(R, tr)
    if Rp != R:
        y2 = jnp.pad(y2, ((0, Rp - R), (0, 0)))
    out = pl.pallas_call(
        _bn_relu_kernel,
        out_shape=jax.ShapeDtypeStruct((Rp, L), jnp.float32),
        grid=(Rp // tr,),
        in_specs=[
            pl.BlockSpec((tr, L), lambda i: (i, 0)),
            pl.BlockSpec((1, L), lambda i: (0, 0)),
            pl.BlockSpec((1, L), lambda i: (0, 0)),
        ],
        out_specs=pl.BlockSpec((tr, L), lambda i: (i, 0)),
        compiler_params=pltpu.CompilerParams(
            dimension_semantics=("parallel",),
            vmem_limit_bytes=_VMEM_LIMIT),
    )(y2, sc, sh)
    return out[:R].reshape(N, H, W, C)


# ---------------------------------------------------------------------------
# Block composition, parameter init, pure-JAX reference
# ---------------------------------------------------------------------------
def down_sample_block(x_nchw, layers):
    """Forward pass of the PyTorch down_sample_block (training-mode BN).
    Input / output are NCHW."""
    x = jnp.transpose(x_nchw, (0, 2, 3, 1)).astype(jnp.float32)   # NCHW -> NHWC
    N = x.shape[0]
    in_scale = jnp.ones((x.shape[-1],), jnp.float32)
    in_shift = jnp.zeros((x.shape[-1],), jnp.float32)
    apply_bn = False
    for lyr in layers:
        stride = lyr["stride"]
        Cin = x.shape[-1]
        H, W = x.shape[1], x.shape[2]
        Ho = (H + 2 - 3) // stride + 1
        Wo = (W + 2 - 3) // stride + 1
        # Spatial pad=1.  For fused-BN layers, pad with the value that maps to
        # exactly 0 after relu(x*scale+shift), i.e. the zero padding of the
        # post-activation tensor.  (~1e-7 f32 rounding, clamped by ReLU.)
        if apply_bn:
            safe = jnp.where(jnp.abs(in_scale) < 1e-12, 1e-12, in_scale)
            pad_val = -in_shift / safe
        else:
            pad_val = jnp.zeros((Cin,), jnp.float32)
        xp = jnp.broadcast_to(pad_val.reshape(1, 1, 1, Cin), (N, H + 2, W + 2, Cin))
        xp = xp.at[:, 1:-1, 1:-1, :].set(x)
        xps = _phase_split(xp, stride)
        # PyTorch (Cout, Cin, 3, 3) -> (3, 3, Cin, Cout); bf16 for the MXU.
        w4 = jnp.transpose(lyr["w"], (2, 3, 1, 0)).astype(jnp.bfloat16)
        y, s, q = _conv_with_stats(xps, w4, in_scale, in_shift,
                                   stride=stride, apply_input_bn=apply_bn,
                                   out_hw=(Ho, Wo))
        # Training-mode BatchNorm batch statistics (biased variance).
        m = N * Ho * Wo
        mean = s / m
        var = jnp.maximum(q / m - mean * mean, 0.0)
        inv_std = jax.lax.rsqrt(var + _BN_EPS)
        in_scale = lyr["gamma"] * inv_std
        in_shift = lyr["beta"] - mean * in_scale
        apply_bn = True
        x = y    # raw conv output; its BN+ReLU is fused into the next conv's input
    x = _bn_relu(x, in_scale, in_shift)           # final layer's BN+ReLU (lane-dense)
    return jnp.transpose(x, (0, 3, 1, 2))         # NHWC -> NCHW


def init_params(key, in_channels, out_channels, add_additional_layer=True):
    strides = [2] + ([1, 1] if add_additional_layer else [])
    layers = []
    cin = in_channels
    for s in strides:
        key, k1, k2, k3 = jax.random.split(key, 4)
        fan_in = cin * 9
        w = jax.random.normal(k1, (out_channels, cin, 3, 3), jnp.float32) / jnp.sqrt(fan_in)
        # NOTE: the Conv2d bias is omitted on purpose — with training-mode
        # BatchNorm right after each conv it cancels exactly in (x - mean).
        gamma = 1.0 + 0.1 * jax.random.normal(k2, (out_channels,), jnp.float32)
        beta = 0.1 * jax.random.normal(k3, (out_channels,), jnp.float32)
        layers.append(dict(w=w, gamma=gamma, beta=beta, stride=s))
        cin = out_channels
    return layers


def _reference_block(x_nchw, layers):
    """Pure-JAX f32 reference of the same forward pass (for validation)."""
    x = jnp.transpose(x_nchw, (0, 2, 3, 1)).astype(jnp.float32)
    for lyr in layers:
        w = jnp.transpose(lyr["w"], (2, 3, 1, 0))
        y = jax.lax.conv_general_dilated(
            x, w, window_strides=(lyr["stride"], lyr["stride"]),
            padding=((1, 1), (1, 1)),
            dimension_numbers=("NHWC", "HWIO", "NHWC"))
        mean = jnp.mean(y, axis=(0, 1, 2))
        var = jnp.var(y, axis=(0, 1, 2))
        y = (y - mean) * jax.lax.rsqrt(var + _BN_EPS) * lyr["gamma"] + lyr["beta"]
        x = jnp.maximum(y, 0.0)
    return jnp.transpose(x, (0, 3, 1, 2))


# ---------------------------------------------------------------------------
if __name__ == "__main__":
    key = jax.random.PRNGKey(0)
    k_x, k_p = jax.random.split(key)

    batch, in_channels, out_channels, spatial = 2, 4, 8, 16
    x = jax.random.normal(k_x, (batch, in_channels, spatial, spatial), jnp.float32)
    layers = init_params(k_p, in_channels, out_channels, add_additional_layer=True)

    out = jax.block_until_ready(down_sample_block(x, layers))

    expected_shape = (batch, out_channels, spatial // 2, spatial // 2)
    assert out.shape == expected_shape, (out.shape, expected_shape)
    assert bool(jnp.all(jnp.isfinite(out)))
    assert bool(jnp.all(out >= 0.0))        # ReLU output

    # Validate against the pure-JAX f32 reference; kernel uses bf16 MXU inputs,
    # so allow a generous elementwise tolerance.
    ref = jax.block_until_ready(_reference_block(x, layers))
    max_err = float(jnp.max(jnp.abs(out - ref)))
    assert max_err < 0.25, max_err

    print("KERNEL_OK")
</pallas_src>

<mosaic_0001>
module attributes {stable_mosaic.version = 11 : i64} {
  func.func @_conv_stats_kernel(%arg0: i32, %arg1: memref<1x36x9x4xf32, #tpu.memory_space<vmem>>, %arg2: memref<3x3x4x8xbf16, #tpu.memory_space<vmem>>, %arg3: memref<1x4xf32, #tpu.memory_space<vmem>>, %arg4: memref<1x4xf32, #tpu.memory_space<vmem>>, %arg5: memref<1x8x8x8xf32, #tpu.memory_space<vmem>>, %arg6: memref<1x1x8xf32, #tpu.memory_space<vmem>>, %arg7: memref<1x1x8xf32, #tpu.memory_space<vmem>>, %arg8: memref<36x9x4xbf16, #tpu.memory_space<vmem>>) attributes {dimension_semantics = [#tpu.dimension_semantics<parallel>], iteration_bounds = array<i64: 2>, scalar_prefetch = 0 : i64, scratch_operands = 1 : i64, tpu.core_type = #tpu.core_type<tc>, window_params = [{transform_indices = @transform_0, window_bounds = array<i64: 1, 36, 9, 4>}, {pipeline_mode = #tpu.pipeline_mode<synchronous>, transform_indices = @transform_1, window_bounds = array<i64: 3, 3, 4, 8>}, {pipeline_mode = #tpu.pipeline_mode<synchronous>, transform_indices = @transform_2, window_bounds = array<i64: 1, 4>}, {pipeline_mode = #tpu.pipeline_mode<synchronous>, transform_indices = @transform_3, window_bounds = array<i64: 1, 4>}, {transform_indices = @transform_4, window_bounds = array<i64: 1, 8, 8, 8>}, {transform_indices = @transform_5, window_bounds = array<i64: 1, 1, 8>}, {transform_indices = @transform_6, window_bounds = array<i64: 1, 1, 8>}]} {
    %c0 = arith.constant 0 : index
    %c0_0 = arith.constant 0 : index
    %c0_1 = arith.constant 0 : index
    %c0_2 = arith.constant 0 : index
    %0 = vector.load %arg1[%c0, %c0_0, %c0_1, %c0_2] : memref<1x36x9x4xf32, #tpu.memory_space<vmem>>, vector<1x36x9x4xf32>
    %1 = vector.shape_cast %0 : vector<1x36x9x4xf32> to vector<36x9x4xf32>
    %2 = arith.truncf %1 : vector<36x9x4xf32> to vector<36x9x4xbf16>
    %c0_3 = arith.constant 0 : index
    %c0_4 = arith.constant 0 : index
    %c0_5 = arith.constant 0 : index
    %3 = vector.load %arg8[%c0_3, %c0_4, %c0_5] : memref<36x9x4xbf16, #tpu.memory_space<vmem>>, vector<36x9x4xbf16>
    tpu.vector_store %arg8[%c0_3, %c0_4, %c0_5], %2 {strides = array<i32>} : memref<36x9x4xbf16, #tpu.memory_space<vmem>>, vector<36x9x4xbf16>,
    %c0_6 = arith.constant 0 : index
    %c0_7 = arith.constant 0 : index
    %c0_8 = arith.constant 0 : index
    %c0_9 = arith.constant 0 : index
    %4 = vector.load %arg2[%c0_6, %c0_7, %c0_8, %c0_9] : memref<3x3x4x8xbf16, #tpu.memory_space<vmem>>, vector<1x1x4x8xbf16>
    %5 = vector.shape_cast %4 : vector<1x1x4x8xbf16> to vector<4x8xbf16>
    %c0_10 = arith.constant 0 : index
    %c1 = arith.constant 1 : index
    %c0_11 = arith.constant 0 : index
    %c0_12 = arith.constant 0 : index
    %6 = vector.load %arg2[%c0_10, %c1, %c0_11, %c0_12] : memref<3x3x4x8xbf16, #tpu.memory_space<vmem>>, vector<1x1x4x8xbf16>
    %7 = vector.shape_cast %6 : vector<1x1x4x8xbf16> to vector<4x8xbf16>
    %c0_13 = arith.constant 0 : index
    %c2 = arith.constant 2 : index
    %c0_14 = arith.constant 0 : index
    %c0_15 = arith.constant 0 : index
    %8 = vector.load %arg2[%c0_13, %c2, %c0_14, %c0_15] : memref<3x3x4x8xbf16, #tpu.memory_space<vmem>>, vector<1x1x4x8xbf16>
    %9 = vector.shape_cast %8 : vector<1x1x4x8xbf16> to vector<4x8xbf16>
    %c1_16 = arith.constant 1 : index
    %c0_17 = arith.constant 0 : index
    %c0_18 = arith.constant 0 : index
    %c0_19 = arith.constant 0 : index
    %10 = vector.load %arg2[%c1_16, %c0_17, %c0_18, %c0_19] : memref<3x3x4x8xbf16, #tpu.memory_space<vmem>>, vector<1x1x4x8xbf16>
    %11 = vector.shape_cast %10 : vector<1x1x4x8xbf16> to vector<4x8xbf16>
    %c1_20 = arith.constant 1 : index
    %c1_21 = arith.constant 1 : index
    %c0_22 = arith.constant 0 : index
    %c0_23 = arith.constant 0 : index
    %12 = vector.load %arg2[%c1_20, %c1_21, %c0_22, %c0_23] : memref<3x3x4x8xbf16, #tpu.memory_space<vmem>>, vector<1x1x4x8xbf16>
    %13 = vector.shape_cast %12 : vector<1x1x4x8xbf16> to vector<4x8xbf16>
    %c1_24 = arith.constant 1 : index
    %c2_25 = arith.constant 2 : index
    %c0_26 = arith.constant 0 : index
    %c0_27 = arith.constant 0 : index
    %14 = vector.load %arg2[%c1_24, %c2_25, %c0_26, %c0_27] : memref<3x3x4x8xbf16, #tpu.memory_space<vmem>>, vector<1x1x4x8xbf16>
    %15 = vector.shape_cast %14 : vector<1x1x4x8xbf16> to vector<4x8xbf16>
    %c2_28 = arith.constant 2 : index
    %c0_29 = arith.constant 0 : index
    %c0_30 = arith.constant 0 : index
    %c0_31 = arith.constant 0 : index
    %16 = vector.load %arg2[%c2_28, %c0_29, %c0_30, %c0_31] : memref<3x3x4x8xbf16, #tpu.memory_space<vmem>>, vector<1x1x4x8xbf16>
    %17 = vector.shape_cast %16 : vector<1x1x4x8xbf16> to vector<4x8xbf16>
    %c2_32 = arith.constant 2 : index
    %c1_33 = arith.constant 1 : index
    %c0_34 = arith.constant 0 : index
    %c0_35 = arith.constant 0 : index
    %18 = vector.load %arg2[%c2_32, %c1_33, %c0_34, %c0_35] : memref<3x3x4x8xbf16, #tpu.memory_space<vmem>>, vector<1x1x4x8xbf16>
    %19 = vector.shape_cast %18 : vector<1x1x4x8xbf16> to vector<4x8xbf16>
    %c2_36 = arith.constant 2 : index
    %c2_37 = arith.constant 2 : index
    %c0_38 = arith.constant 0 : index
    %c0_39 = arith.constant 0 : index
    %20 = vector.load %arg2[%c2_36, %c2_37, %c0_38, %c0_39] : memref<3x3x4x8xbf16, #tpu.memory_space<vmem>>, vector<1x1x4x8xbf16>
    %21 = vector.shape_cast %20 : vector<1x1x4x8xbf16> to vector<4x8xbf16>
    %cst = arith.constant 0.000000e+00 : f32
    %22 = vector.broadcast %cst : f32 to vector<1x8xf32>
    %cst_40 = arith.constant 0.000000e+00 : f32
    %23 = vector.broadcast %cst_40 : f32 to vector<1x8xf32>
    %cst_41 = arith.constant 0.000000e+00 : f32
    %24 = vector.broadcast %cst_41 : f32 to vector<8x8xf32>
    %c0_42 = arith.constant 0 : index
    %c0_43 = arith.constant 0 : index
    %c0_44 = arith.constant 0 : index
    %25 = vector.load %arg8[%c0_42, %c0_43, %c0_44] : memref<36x9x4xbf16, #tpu.memory_space<vmem>>, vector<1x8x4xbf16>
    %26 = vector.shape_cast %25 : vector<1x8x4xbf16> to vector<8x4xbf16>
    %cst_45 = arith.constant dense<0.000000e+00> : vector<8x8xf32>
    %27 = tpu.matmul %26, %5, %cst_45 {dimension_numbers = #tpu.dot_dimension_numbers<[1], [0], [0], [1], [0, 0, 1, 1], [], []>} : vector<8x4xbf16>, vector<4x8xbf16>, vector<8x8xf32> -> vector<8x8xf32>
    %28 = arith.addf %24, %27 : vector<8x8xf32>
    %c1_46 = arith.constant 1 : index
    %c0_47 = arith.constant 0 : index
    %c0_48 = arith.constant 0 : index
    %29 = vector.load %arg8[%c1_46, %c0_47, %c0_48] : memref<36x9x4xbf16, #tpu.memory_space<vmem>>, vector<1x8x4xbf16>
    %30 = vector.shape_cast %29 : vector<1x8x4xbf16> to vector<8x4xbf16>
    %cst_49 = arith.constant dense<0.000000e+00> : vector<8x8xf32>
    %31 = tpu.matmul %30, %7, %cst_49 {dimension_numbers = #tpu.dot_dimension_numbers<[1], [0], [0], [1], [0, 0, 1, 1], [], []>} : vector<8x4xbf16>, vector<4x8xbf16>, vector<8x8xf32> -> vector<8x8xf32>
    %32 = arith.addf %28, %31 : vector<8x8xf32>
    %c0_50 = arith.constant 0 : index
    %c1_51 = arith.constant 1 : index
    %c0_52 = arith.constant 0 : index
    %33 = vector.load %arg8[%c0_50, %c1_51, %c0_52] : memref<36x9x4xbf16, #tpu.memory_space<vmem>>, vector<1x8x4xbf16>
    %34 = vector.shape_cast %33 : vector<1x8x4xbf16> to vector<8x4xbf16>
    %cst_53 = arith.constant dense<0.000000e+00> : vector<8x8xf32>
    %35 = tpu.matmul %34, %9, %cst_53 {dimension_numbers = #tpu.dot_dimension_numbers<[1], [0], [0], [1], [0, 0, 1, 1], [], []>} : vector<8x4xbf16>, vector<4x8xbf16>, vector<8x8xf32> -> vector<8x8xf32>
    %36 = arith.addf %32, %35 : vector<8x8xf32>
    %c2_54 = arith.constant 2 : index
    %c0_55 = arith.constant 0 : index
    %c0_56 = arith.constant 0 : index
    %37 = vector.load %arg8[%c2_54, %c0_55, %c0_56] : memref<36x9x4xbf16, #tpu.memory_space<vmem>>, vector<1x8x4xbf16>
    %38 = vector.shape_cast %37 : vector<1x8x4xbf16> to vector<8x4xbf16>
    %cst_57 = arith.constant dense<0.000000e+00> : vector<8x8xf32>
    %39 = tpu.matmul %38, %11, %cst_57 {dimension_numbers = #tpu.dot_dimension_numbers<[1], [0], [0], [1], [0, 0, 1, 1], [], []>} : vector<8x4xbf16>, vector<4x8xbf16>, vector<8x8xf32> -> vector<8x8xf32>
    %40 = arith.addf %36, %39 : vector<8x8xf32>
    %c3 = arith.constant 3 : index
    %c0_58 = arith.constant 0 : index
    %c0_59 = arith.constant 0 : index
    %41 = vector.load %arg8[%c3, %c0_58, %c0_59] : memref<36x9x4xbf16, #tpu.memory_space<vmem>>, vector<1x8x4xbf16>
    %42 = vector.shape_cast %41 : vector<1x8x4xbf16> to vector<8x4xbf16>
    %cst_60 = arith.constant dense<0.000000e+00> : vector<8x8xf32>
    %43 = tpu.matmul %42, %13, %cst_60 {dimension_numbers = #tpu.dot_dimension_numbers<[1], [0], [0], [1], [0, 0, 1, 1], [], []>} : vector<8x4xbf16>, vector<4x8xbf16>, vector<8x8xf32> -> vector<8x8xf32>
    %44 = arith.addf %40, %43 : vector<8x8xf32>
    %c2_61 = arith.constant 2 : index
    %c1_62 = arith.constant 1 : index
    %c0_63 = arith.constant 0 : index
    %45 = vector.load %arg8[%c2_61, %c1_62, %c0_63] : memref<36x9x4xbf16, #tpu.memory_space<vmem>>, vector<1x8x4xbf16>
    %46 = vector.shape_cast %45 : vector<1x8x4xbf16> to vector<8x4xbf16>
    %cst_64 = arith.constant dense<0.000000e+00> : vector<8x8xf32>
    %47 = tpu.matmul %46, %15, %cst_64 {dimension_numbers = #tpu.dot_dimension_numbers<[1], [0], [0], [1], [0, 0, 1, 1], [], []>} : vector<8x4xbf16>, vector<4x8xbf16>, vector<8x8xf32> -> vector<8x8xf32>
    %48 = arith.addf %44, %47 : vector<8x8xf32>
    %c4 = arith.constant 4 : index
    %c0_65 = arith.constant 0 : index
    %c0_66 = arith.constant 0 : index
    %49 = vector.load %arg8[%c4, %c0_65, %c0_66] : memref<36x9x4xbf16, #tpu.memory_space<vmem>>, vector<1x8x4xbf16>
    %50 = vector.shape_cast %49 : vector<1x8x4xbf16> to vector<8x4xbf16>
    %cst_67 = arith.constant dense<0.000000e+00> : vector<8x8xf32>
    %51 = tpu.matmul %50, %17, %cst_67 {dimension_numbers = #tpu.dot_dimension_numbers<[1], [0], [0], [1], [0, 0, 1, 1], [], []>} : vector<8x4xbf16>, vector<4x8xbf16>, vector<8x8xf32> -> vector<8x8xf32>
    %52 = arith.addf %48, %51 : vector<8x8xf32>
    %c5 = arith.constant 5 : index
    %c0_68 = arith.constant 0 : index
    %c0_69 = arith.constant 0 : index
    %53 = vector.load %arg8[%c5, %c0_68, %c0_69] : memref<36x9x4xbf16, #tpu.memory_space<vmem>>, vector<1x8x4xbf16>
    %54 = vector.shape_cast %53 : vector<1x8x4xbf16> to vector<8x4xbf16>
    %cst_70 = arith.constant dense<0.000000e+00> : vector<8x8xf32>
    %55 = tpu.matmul %54, %19, %cst_70 {dimension_numbers = #tpu.dot_dimension_numbers<[1], [0], [0], [1], [0, 0, 1, 1], [], []>} : vector<8x4xbf16>, vector<4x8xbf16>, vector<8x8xf32> -> vector<8x8xf32>
    %56 = arith.addf %52, %55 : vector<8x8xf32>
    %c4_71 = arith.constant 4 : index
    %c1_72 = arith.constant 1 : index
    %c0_73 = arith.constant 0 : index
    %57 = vector.load %arg8[%c4_71, %c1_72, %c0_73] : memref<36x9x4xbf16, #tpu.memory_space<vmem>>, vector<1x8x4xbf16>
    %58 = vector.shape_cast %57 : vector<1x8x4xbf16> to vector<8x4xbf16>
    %cst_74 = arith.constant dense<0.000000e+00> : vector<8x8xf32>
    %59 = tpu.matmul %58, %21, %cst_74 {dimension_numbers = #tpu.dot_dimension_numbers<[1], [0], [0], [1], [0, 0, 1, 1], [], []>} : vector<8x4xbf16>, vector<4x8xbf16>, vector<8x8xf32> -> vector<8x8xf32>
    %60 = arith.addf %56, %59 : vector<8x8xf32>
    %c0_75 = arith.constant 0 : index
    %c0_76 = arith.constant 0 : index
    %c0_77 = arith.constant 0 : index
    %c0_78 = arith.constant 0 : index
    %61 = vector.load %arg5[%c0_75, %c0_76, %c0_77, %c0_78] : memref<1x8x8x8xf32, #tpu.memory_space<vmem>>, vector<1x1x8x8xf32>
    %62 = vector.shape_cast %61 : vector<1x1x8x8xf32> to vector<8x8xf32>
    %63 = vector.shape_cast %60 : vector<8x8xf32> to vector<1x1x8x8xf32>
    tpu.vector_store %arg5[%c0_75, %c0_76, %c0_77, %c0_78], %63 {strides = array<i32>} : memref<1x8x8x8xf32, #tpu.memory_space<vmem>>, vector<1x1x8x8xf32>,
    %cst_79 = arith.constant dense<0.000000e+00> : vector<8xf32>
    %64 = vector.multi_reduction <add>, %60, %cst_79 [0] : vector<8x8xf32> to vector<8xf32>
    %65 = vector.shape_cast %64 : vector<8xf32> to vector<1x8xf32>
    %66 = arith.addf %22, %65 : vector<1x8xf32>
    %67 = arith.mulf %60, %60 : vector<8x8xf32>
    %cst_80 = arith.constant dense<0.000000e+00> : vector<8xf32>
    %68 = vector.multi_reduction <add>, %67, %cst_80 [0] : vector<8x8xf32> to vector<8xf32>
    %69 = vector.shape_cast %68 : vector<8xf32> to vector<1x8xf32>
    %70 = arith.addf %23, %69 : vector<1x8xf32>
    %cst_81 = arith.constant 0.000000e+00 : f32
    %71 = vector.broadcast %cst_81 : f32 to vector<8x8xf32>
    %c4_82 = arith.constant 4 : index
    %c0_83 = arith.constant 0 : index
    %c0_84 = arith.constant 0 : index
    %72 = vector.load %arg8[%c4_82, %c0_83, %c0_84] : memref<36x9x4xbf16, #tpu.memory_space<vmem>>, vector<1x8x4xbf16>
    %73 = vector.shape_cast %72 : vector<1x8x4xbf16> to vector<8x4xbf16>
    %cst_85 = arith.constant dense<0.000000e+00> : vector<8x8xf32>
    %74 = tpu.matmul %73, %5, %cst_85 {dimension_numbers = #tpu.dot_dimension_numbers<[1], [0], [0], [1], [0, 0, 1, 1], [], []>} : vector<8x4xbf16>, vector<4x8xbf16>, vector<8x8xf32> -> vector<8x8xf32>
    %75 = arith.addf %71, %74 : vector<8x8xf32>
    %c5_86 = arith.constant 5 : index
    %c0_87 = arith.constant 0 : index
    %c0_88 = arith.constant 0 : index
    %76 = vector.load %arg8[%c5_86, %c0_87, %c0_88] : memref<36x9x4xbf16, #tpu.memory_space<vmem>>, vector<1x8x4xbf16>
    %77 = vector.shape_cast %76 : vector<1x8x4xbf16> to vector<8x4xbf16>
    %cst_89 = arith.constant dense<0.000000e+00> : vector<8x8xf32>
    %78 = tpu.matmul %77, %7, %cst_89 {dimension_numbers = #tpu.dot_dimension_numbers<[1], [0], [0], [1], [0, 0, 1, 1], [], []>} : vector<8x4xbf16>, vector<4x8xbf16>, vector<8x8xf32> -> vector<8x8xf32>
    %79 = arith.addf %75, %78 : vector<8x8xf32>
    %c4_90 = arith.constant 4 : index
    %c1_91 = arith.constant 1 : index
    %c0_92 = arith.constant 0 : index
    %80 = vector.load %arg8[%c4_90, %c1_91, %c0_92] : memref<36x9x4xbf16, #tpu.memory_space<vmem>>, vector<1x8x4xbf16>
    %81 = vector.shape_cast %80 : vector<1x8x4xbf16> to vector<8x4xbf16>
    %cst_93 = arith.constant dense<0.000000e+00> : vector<8x8xf32>
    %82 = tpu.matmul %81, %9, %cst_93 {dimension_numbers = #tpu.dot_dimension_numbers<[1], [0], [0], [1], [0, 0, 1, 1], [], []>} : vector<8x4xbf16>, vector<4x8xbf16>, vector<8x8xf32> -> vector<8x8xf32>
    %83 = arith.addf %79, %82 : vector<8x8xf32>
    %c6 = arith.constant 6 : index
    %c0_94 = arith.constant 0 : index
    %c0_95 = arith.constant 0 : index
    %84 = vector.load %arg8[%c6, %c0_94, %c0_95] : memref<36x9x4xbf16, #tpu.memory_space<vmem>>, vector<1x8x4xbf16>
    %85 = vector.shape_cast %84 : vector<1x8x4xbf16> to vector<8x4xbf16>
    %cst_96 = arith.constant dense<0.000000e+00> : vector<8x8xf32>
    %86 = tpu.matmul %85, %11, %cst_96 {dimension_numbers = #tpu.dot_dimension_numbers<[1], [0], [0], [1], [0, 0, 1, 1], [], []>} : vector<8x4xbf16>, vector<4x8xbf16>, vector<8x8xf32> -> vector<8x8xf32>
    %87 = arith.addf %83, %86 : vector<8x8xf32>
    %c7 = arith.constant 7 : index
    %c0_97 = arith.constant 0 : index
    %c0_98 = arith.constant 0 : index
    %88 = vector.load %arg8[%c7, %c0_97, %c0_98] : memref<36x9x4xbf16, #tpu.memory_space<vmem>>, vector<1x8x4xbf16>
    %89 = vector.shape_cast %88 : vector<1x8x4xbf16> to vector<8x4xbf16>
    %cst_99 = arith.constant dense<0.000000e+00> : vector<8x8xf32>
    %90 = tpu.matmul %89, %13, %cst_99 {dimension_numbers = #tpu.dot_dimension_numbers<[1], [0], [0], [1], [0, 0, 1, 1], [], []>} : vector<8x4xbf16>, vector<4x8xbf16>, vector<8x8xf32> -> vector<8x8xf32>
    %91 = arith.addf %87, %90 : vector<8x8xf32>
    %c6_100 = arith.constant 6 : index
    %c1_101 = arith.constant 1 : index
    %c0_102 = arith.constant 0 : index
    %92 = vector.load %arg8[%c6_100, %c1_101, %c0_102] : memref<36x9x4xbf16, #tpu.memory_space<vmem>>, vector<1x8x4xbf16>
    %93 = vector.shape_cast %92 : vector<1x8x4xbf16> to vector<8x4xbf16>
    %cst_103 = arith.constant dense<0.000000e+00> : vector<8x8xf32>
    %94 = tpu.matmul %93, %15, %cst_103 {dimension_numbers = #tpu.dot_dimension_numbers<[1], [0], [0], [1], [0, 0, 1, 1], [], []>} : vector<8x4xbf16>, vector<4x8xbf16>, vector<8x8xf32> -> vector<8x8xf32>
    %95 = arith.addf %91, %94 : vector<8x8xf32>
    %c8 = arith.constant 8 : index
    %c0_104 = arith.constant 0 : index
    %c0_105 = arith.constant 0 : index
    %96 = vector.load %arg8[%c8, %c0_104, %c0_105] : memref<36x9x4xbf16, #tpu.memory_space<vmem>>, vector<1x8x4xbf16>
    %97 = vector.shape_cast %96 : vector<1x8x4xbf16> to vector<8x4xbf16>
    %cst_106 = arith.constant dense<0.000000e+00> : vector<8x8xf32>
    %98 = tpu.matmul %97, %17, %cst_106 {dimension_numbers = #tpu.dot_dimension_numbers<[1], [0], [0], [1], [0, 0, 1, 1], [], []>} : vector<8x4xbf16>, vector<4x8xbf16>, vector<8x8xf32> -> vector<8x8xf32>
    %99 = arith.addf %95, %98 : vector<8x8xf32>
    %c9 = arith.constant 9 : index
    %c0_107 = arith.constant 0 : index
    %c0_108 = arith.constant 0 : index
    %100 = vector.load %arg8[%c9, %c0_107, %c0_108] : memref<36x9x4xbf16, #tpu.memory_space<vmem>>, vector<1x8x4xbf16>
    %101 = vector.shape_cast %100 : vector<1x8x4xbf16> to vector<8x4xbf16>
    %cst_109 = arith.constant dense<0.000000e+00> : vector<8x8xf32>
    %102 = tpu.matmul %101, %19, %cst_109 {dimension_numbers = #tpu.dot_dimension_numbers<[1], [0], [0], [1], [0, 0, 1, 1], [], []>} : vector<8x4xbf16>, vector<4x8xbf16>, vector<8x8xf32> -> vector<8x8xf32>
    %103 = arith.addf %99, %102 : vector<8x8xf32>
    %c8_110 = arith.constant 8 : index
    %c1_111 = arith.constant 1 : index
    %c0_112 = arith.constant 0 : index
    %104 = vector.load %arg8[%c8_110, %c1_111, %c0_112] : memref<36x9x4xbf16, #tpu.memory_space<vmem>>, vector<1x8x4xbf16>
    %105 = vector.shape_cast %104 : vector<1x8x4xbf16> to vector<8x4xbf16>
    %cst_113 = arith.constant dense<0.000000e+00> : vector<8x8xf32>
    %106 = tpu.matmul %105, %21, %cst_113 {dimension_numbers = #tpu.dot_dimension_numbers<[1], [0], [0], [1], [0, 0, 1, 1], [], []>} : vector<8x4xbf16>, vector<4x8xbf16>, vector<8x8xf32> -> vector<8x8xf32>
    %107 = arith.addf %103, %106 : vector<8x8xf32>
    %c0_114 = arith.constant 0 : index
    %c1_115 = arith.constant 1 : index
    %c0_116 = arith.constant 0 : index
    %c0_117 = arith.constant 0 : index
    %108 = vector.load %arg5[%c0_114, %c1_115, %c0_116, %c0_117] : memref<1x8x8x8xf32, #tpu.memory_space<vmem>>, vector<1x1x8x8xf32>
    %109 = vector.shape_cast %108 : vector<1x1x8x8xf32> to vector<8x8xf32>
    %110 = vector.shape_cast %107 : vector<8x8xf32> to vector<1x1x8x8xf32>
    tpu.vector_store %arg5[%c0_114, %c1_115, %c0_116, %c0_117], %110 {strides = array<i32>} : memref<1x8x8x8xf32, #tpu.memory_space<vmem>>, vector<1x1x8x8xf32>,
    %cst_118 = arith.constant dense<0.000000e+00> : vector<8xf32>
    %111 = vector.multi_reduction <add>, %107, %cst_118 [0] : vector<8x8xf32> to vector<8xf32>
    %112 = vector.shape_cast %111 : vector<8xf32> to vector<1x8xf32>
    %113 = arith.addf %66, %112 : vector<1x8xf32>
    %114 = arith.mulf %107, %107 : vector<8x8xf32>
    %cst_119 = arith.constant dense<0.000000e+00> : vector<8xf32>
    %115 = vector.multi_reduction <add>, %114, %cst_119 [0] : vector<8x8xf32> to vector<8xf32>
    %116 = vector.shape_cast %115 : vector<8xf32> to vector<1x8xf32>
    %117 = arith.addf %70, %116 : vector<1x8xf32>
    %cst_120 = arith.constant 0.000000e+00 : f32
    %118 = vector.broadcast %cst_120 : f32 to vector<8x8xf32>
    %c8_121 = arith.constant 8 : index
    %c0_122 = arith.constant 0 : index
    %c0_123 = arith.constant 0 : index
    %119 = vector.load %arg8[%c8_121, %c0_122, %c0_123] : memref<36x9x4xbf16, #tpu.memory_space<vmem>>, vector<1x8x4xbf16>
    %120 = vector.shape_cast %119 : vector<1x8x4xbf16> to vector<8x4xbf16>
    %cst_124 = arith.constant dense<0.000000e+00> : vector<8x8xf32>
    %121 = tpu.matmul %120, %5, %cst_124 {dimension_numbers = #tpu.dot_dimension_numbers<[1], [0], [0], [1], [0, 0, 1, 1], [], []>} : vector<8x4xbf16>, vector<4x8xbf16>, vector<8x8xf32> -> vector<8x8xf32>
    %122 = arith.addf %118, %121 : vector<8x8xf32>
    %c9_125 = arith.constant 9 : index
    %c0_126 = arith.constant 0 : index
    %c0_127 = arith.constant 0 : index
    %123 = vector.load %arg8[%c9_125, %c0_126, %c0_127] : memref<36x9x4xbf16, #tpu.memory_space<vmem>>, vector<1x8x4xbf16>
    %124 = vector.shape_cast %123 : vector<1x8x4xbf16> to vector<8x4xbf16>
    %cst_128 = arith.constant dense<0.000000e+00> : vector<8x8xf32>
    %125 = tpu.matmul %124, %7, %cst_128 {dimension_numbers = #tpu.dot_dimension_numbers<[1], [0], [0], [1], [0, 0, 1, 1], [], []>} : vector<8x4xbf16>, vector<4x8xbf16>, vector<8x8xf32> -> vector<8x8xf32>
    %126 = arith.addf %122, %125 : vector<8x8xf32>
    %c8_129 = arith.constant 8 : index
    %c1_130 = arith.constant 1 : index
    %c0_131 = arith.constant 0 : index
    %127 = vector.load %arg8[%c8_129, %c1_130, %c0_131] : memref<36x9x4xbf16, #tpu.memory_space<vmem>>, vector<1x8x4xbf16>
    %128 = vector.shape_cast %127 : vector<1x8x4xbf16> to vector<8x4xbf16>
    %cst_132 = arith.constant dense<0.000000e+00> : vector<8x8xf32>
    %129 = tpu.matmul %128, %9, %cst_132 {dimension_numbers = #tpu.dot_dimension_numbers<[1], [0], [0], [1], [0, 0, 1, 1], [], []>} : vector<8x4xbf16>, vector<4x8xbf16>, vector<8x8xf32> -> vector<8x8xf32>
    %130 = arith.addf %126, %129 : vector<8x8xf32>
    %c10 = arith.constant 10 : index
    %c0_133 = arith.constant 0 : index
    %c0_134 = arith.constant 0 : index
    %131 = vector.load %arg8[%c10, %c0_133, %c0_134] : memref<36x9x4xbf16, #tpu.memory_space<vmem>>, vector<1x8x4xbf16>
    %132 = vector.shape_cast %131 : vector<1x8x4xbf16> to vector<8x4xbf16>
    %cst_135 = arith.constant dense<0.000000e+00> : vector<8x8xf32>
    %133 = tpu.matmul %132, %11, %cst_135 {dimension_numbers = #tpu.dot_dimension_numbers<[1], [0], [0], [1], [0, 0, 1, 1], [], []>} : vector<8x4xbf16>, vector<4x8xbf16>, vector<8x8xf32> -> vector<8x8xf32>
    %134 = arith.addf %130, %133 : vector<8x8xf32>
    %c11 = arith.constant 11 : index
    %c0_136 = arith.constant 0 : index
    %c0_137 = arith.constant 0 : index
    %135 = vector.load %arg8[%c11, %c0_136, %c0_137] : memref<36x9x4xbf16, #tpu.memory_space<vmem>>, vector<1x8x4xbf16>
    %136 = vector.shape_cast %135 : vector<1x8x4xbf16> to vector<8x4xbf16>
    %cst_138 = arith.constant dense<0.000000e+00> : vector<8x8xf32>
    %137 = tpu.matmul %136, %13, %cst_138 {dimension_numbers = #tpu.dot_dimension_numbers<[1], [0], [0], [1], [0, 0, 1, 1], [], []>} : vector<8x4xbf16>, vector<4x8xbf16>, vector<8x8xf32> -> vector<8x8xf32>
    %138 = arith.addf %134, %137 : vector<8x8xf32>
    %c10_139 = arith.constant 10 : index
    %c1_140 = arith.constant 1 : index
    %c0_141 = arith.constant 0 : index
    %139 = vector.load %arg8[%c10_139, %c1_140, %c0_141] : memref<36x9x4xbf16, #tpu.memory_space<vmem>>, vector<1x8x4xbf16>
    %140 = vector.shape_cast %139 : vector<1x8x4xbf16> to vector<8x4xbf16>
    %cst_142 = arith.constant dense<0.000000e+00> : vector<8x8xf32>
    %141 = tpu.matmul %140, %15, %cst_142 {dimension_numbers = #tpu.dot_dimension_numbers<[1], [0], [0], [1], [0, 0, 1, 1], [], []>} : vector<8x4xbf16>, vector<4x8xbf16>, vector<8x8xf32> -> vector<8x8xf32>
    %142 = arith.addf %138, %141 : vector<8x8xf32>
    %c12 = arith.constant 12 : index
    %c0_143 = arith.constant 0 : index
    %c0_144 = arith.constant 0 : index
    %143 = vector.load %arg8[%c12, %c0_143, %c0_144] : memref<36x9x4xbf16, #tpu.memory_space<vmem>>, vector<1x8x4xbf16>
    %144 = vector.shape_cast %143 : vector<1x8x4xbf16> to vector<8x4xbf16>
    %cst_145 = arith.constant dense<0.000000e+00> : vector<8x8xf32>
    %145 = tpu.matmul %144, %17, %cst_145 {dimension_numbers = #tpu.dot_dimension_numbers<[1], [0], [0], [1], [0, 0, 1, 1], [], []>} : vector<8x4xbf16>, vector<4x8xbf16>, vector<8x8xf32> -> vector<8x8xf32>
    %146 = arith.addf %142, %145 : vector<8x8xf32>
    %c13 = arith.constant 13 : index
    %c0_146 = arith.constant 0 : index
    %c0_147 = arith.constant 0 : index
    %147 = vector.load %arg8[%c13, %c0_146, %c0_147] : memref<36x9x4xbf16, #tpu.memory_space<vmem>>, vector<1x8x4xbf16>
    %148 = vector.shape_cast %147 : vector<1x8x4xbf16> to vector<8x4xbf16>
    %cst_148 = arith.constant dense<0.000000e+00> : vector<8x8xf32>
    %149 = tpu.matmul %148, %19, %cst_148 {dimension_numbers = #tpu.dot_dimension_numbers<[1], [0], [0], [1], [0, 0, 1, 1], [], []>} : vector<8x4xbf16>, vector<4x8xbf16>, vector<8x8xf32> -> vector<8x8xf32>
    %150 = arith.addf %146, %149 : vector<8x8xf32>
    %c12_149 = arith.constant 12 : index
    %c1_150 = arith.constant 1 : index
    %c0_151 = arith.constant 0 : index
    %151 = vector.load %arg8[%c12_149, %c1_150, %c0_151] : memref<36x9x4xbf16, #tpu.memory_space<vmem>>, vector<1x8x4xbf16>
    %152 = vector.shape_cast %151 : vector<1x8x4xbf16> to vector<8x4xbf16>
    %cst_152 = arith.constant dense<0.000000e+00> : vector<8x8xf32>
    %153 = tpu.matmul %152, %21, %cst_152 {dimension_numbers = #tpu.dot_dimension_numbers<[1], [0], [0], [1], [0, 0, 1, 1], [], []>} : vector<8x4xbf16>, vector<4x8xbf16>, vector<8x8xf32> -> vector<8x8xf32>
    %154 = arith.addf %150, %153 : vector<8x8xf32>
    %c0_153 = arith.constant 0 : index
    %c2_154 = arith.constant 2 : index
    %c0_155 = arith.constant 0 : index
    %c0_156 = arith.constant 0 : index
    %155 = vector.load %arg5[%c0_153, %c2_154, %c0_155, %c0_156] : memref<1x8x8x8xf32, #tpu.memory_space<vmem>>, vector<1x1x8x8xf32>
    %156 = vector.shape_cast %155 : vector<1x1x8x8xf32> to vector<8x8xf32>
    %157 = vector.shape_cast %154 : vector<8x8xf32> to vector<1x1x8x8xf32>
    tpu.vector_store %arg5[%c0_153, %c2_154, %c0_155, %c0_156], %157 {strides = array<i32>} : memref<1x8x8x8xf32, #tpu.memory_space<vmem>>, vector<1x1x8x8xf32>,
    %cst_157 = arith.constant dense<0.000000e+00> : vector<8xf32>
    %158 = vector.multi_reduction <add>, %154, %cst_157 [0] : vector<8x8xf32> to vector<8xf32>
    %159 = vector.shape_cast %158 : vector<8xf32> to vector<1x8xf32>
    %160 = arith.addf %113, %159 : vector<1x8xf32>
    %161 = arith.mulf %154, %154 : vector<8x8xf32>
    %cst_158 = arith.constant dense<0.000000e+00> : vector<8xf32>
    %162 = vector.multi_reduction <add>, %161, %cst_158 [0] : vector<8x8xf32> to vector<8xf32>
    %163 = vector.shape_cast %162 : vector<8xf32> to vector<1x8xf32>
    %164 = arith.addf %117, %163 : vector<1x8xf32>
    %cst_159 = arith.constant 0.000000e+00 : f32
    %165 = vector.broadcast %cst_159 : f32 to vector<8x8xf32>
    %c12_160 = arith.constant 12 : index
    %c0_161 = arith.constant 0 : index
    %c0_162 = arith.constant 0 : index
    %166 = vector.load %arg8[%c12_160, %c0_161, %c0_162] : memref<36x9x4xbf16, #tpu.memory_space<vmem>>, vector<1x8x4xbf16>
    %167 = vector.shape_cast %166 : vector<1x8x4xbf16> to vector<8x4xbf16>
    %cst_163 = arith.constant dense<0.000000e+00> : vector<8x8xf32>
    %168 = tpu.matmul %167, %5, %cst_163 {dimension_numbers = #tpu.dot_dimension_numbers<[1], [0], [0], [1], [0, 0, 1, 1], [], []>} : vector<8x4xbf16>, vector<4x8xbf16>, vector<8x8xf32> -> vector<8x8xf32>
    %169 = arith.addf %165, %168 : vector<8x8xf32>
    %c13_164 = arith.constant 13 : index
    %c0_165 = arith.constant 0 : index
    %c0_166 = arith.constant 0 : index
    %170 = vector.load %arg8[%c13_164, %c0_165, %c0_166] : memref<36x9x4xbf16, #tpu.memory_space<vmem>>, vector<1x8x4xbf16>
    %171 = vector.shape_cast %170 : vector<1x8x4xbf16> to vector<8x4xbf16>
    %cst_167 = arith.constant dense<0.000000e+00> : vector<8x8xf32>
    %172 = tpu.matmul %171, %7, %cst_167 {dimension_numbers = #tpu.dot_dimension_numbers<[1], [0], [0], [1], [0, 0, 1, 1], [], []>} : vector<8x4xbf16>, vector<4x8xbf16>, vector<8x8xf32> -> vector<8x8xf32>
    %173 = arith.addf %169, %172 : vector<8x8xf32>
    %c12_168 = arith.constant 12 : index
    %c1_169 = arith.constant 1 : index
    %c0_170 = arith.constant 0 : index
    %174 = vector.load %arg8[%c12_168, %c1_169, %c0_170] : memref<36x9x4xbf16, #tpu.memory_space<vmem>>, vector<1x8x4xbf16>
    %175 = vector.shape_cast %174 : vector<1x8x4xbf16> to vector<8x4xbf16>
    %cst_171 = arith.constant dense<0.000000e+00> : vector<8x8xf32>
    %176 = tpu.matmul %175, %9, %cst_171 {dimension_numbers = #tpu.dot_dimension_numbers<[1], [0], [0], [1], [0, 0, 1, 1], [], []>} : vector<8x4xbf16>, vector<4x8xbf16>, vector<8x8xf32> -> vector<8x8xf32>
    %177 = arith.addf %173, %176 : vector<8x8xf32>
    %c14 = arith.constant 14 : index
    %c0_172 = arith.constant 0 : index
    %c0_173 = arith.constant 0 : index
    %178 = vector.load %arg8[%c14, %c0_172, %c0_173] : memref<36x9x4xbf16, #tpu.memory_space<vmem>>, vector<1x8x4xbf16>
    %179 = vector.shape_cast %178 : vector<1x8x4xbf16> to vector<8x4xbf16>
    %cst_174 = arith.constant dense<0.000000e+00> : vector<8x8xf32>
    %180 = tpu.matmul %179, %11, %cst_174 {dimension_numbers = #tpu.dot_dimension_numbers<[1], [0], [0], [1], [0, 0, 1, 1], [], []>} : vector<8x4xbf16>, vector<4x8xbf16>, vector<8x8xf32> -> vector<8x8xf32>
    %181 = arith.addf %177, %180 : vector<8x8xf32>
    %c15 = arith.constant 15 : index
    %c0_175 = arith.constant 0 : index
    %c0_176 = arith.constant 0 : index
    %182 = vector.load %arg8[%c15, %c0_175, %c0_176] : memref<36x9x4xbf16, #tpu.memory_space<vmem>>, vector<1x8x4xbf16>
    %183 = vector.shape_cast %182 : vector<1x8x4xbf16> to vector<8x4xbf16>
    %cst_177 = arith.constant dense<0.000000e+00> : vector<8x8xf32>
    %184 = tpu.matmul %183, %13, %cst_177 {dimension_numbers = #tpu.dot_dimension_numbers<[1], [0], [0], [1], [0, 0, 1, 1], [], []>} : vector<8x4xbf16>, vector<4x8xbf16>, vector<8x8xf32> -> vector<8x8xf32>
    %185 = arith.addf %181, %184 : vector<8x8xf32>
    %c14_178 = arith.constant 14 : index
    %c1_179 = arith.constant 1 : index
    %c0_180 = arith.constant 0 : index
    %186 = vector.load %arg8[%c14_178, %c1_179, %c0_180] : memref<36x9x4xbf16, #tpu.memory_space<vmem>>, vector<1x8x4xbf16>
    %187 = vector.shape_cast %186 : vector<1x8x4xbf16> to vector<8x4xbf16>
    %cst_181 = arith.constant dense<0.000000e+00> : vector<8x8xf32>
    %188 = tpu.matmul %187, %15, %cst_181 {dimension_numbers = #tpu.dot_dimension_numbers<[1], [0], [0], [1], [0, 0, 1, 1], [], []>} : vector<8x4xbf16>, vector<4x8xbf16>, vector<8x8xf32> -> vector<8x8xf32>
    %189 = arith.addf %185, %188 : vector<8x8xf32>
    %c16 = arith.constant 16 : index
    %c0_182 = arith.constant 0 : index
    %c0_183 = arith.constant 0 : index
    %190 = vector.load %arg8[%c16, %c0_182, %c0_183] : memref<36x9x4xbf16, #tpu.memory_space<vmem>>, vector<1x8x4xbf16>
    %191 = vector.shape_cast %190 : vector<1x8x4xbf16> to vector<8x4xbf16>
    %cst_184 = arith.constant dense<0.000000e+00> : vector<8x8xf32>
    %192 = tpu.matmul %191, %17, %cst_184 {dimension_numbers = #tpu.dot_dimension_numbers<[1], [0], [0], [1], [0, 0, 1, 1], [], []>} : vector<8x4xbf16>, vector<4x8xbf16>, vector<8x8xf32> -> vector<8x8xf32>
    %193 = arith.addf %189, %192 : vector<8x8xf32>
    %c17 = arith.constant 17 : index
    %c0_185 = arith.constant 0 : index
    %c0_186 = arith.constant 0 : index
    %194 = vector.load %arg8[%c17, %c0_185, %c0_186] : memref<36x9x4xbf16, #tpu.memory_space<vmem>>, vector<1x8x4xbf16>
    %195 = vector.shape_cast %194 : vector<1x8x4xbf16> to vector<8x4xbf16>
    %cst_187 = arith.constant dense<0.000000e+00> : vector<8x8xf32>
    %196 = tpu.matmul %195, %19, %cst_187 {dimension_numbers = #tpu.dot_dimension_numbers<[1], [0], [0], [1], [0, 0, 1, 1], [], []>} : vector<8x4xbf16>, vector<4x8xbf16>, vector<8x8xf32> -> vector<8x8xf32>
    %197 = arith.addf %193, %196 : vector<8x8xf32>
    %c16_188 = arith.constant 16 : index
    %c1_189 = arith.constant 1 : index
    %c0_190 = arith.constant 0 : index
    %198 = vector.load %arg8[%c16_188, %c1_189, %c0_190] : memref<36x9x4xbf16, #tpu.memory_space<vmem>>, vector<1x8x4xbf16>
    %199 = vector.shape_cast %198 : vector<1x8x4xbf16> to vector<8x4xbf16>
    %cst_191 = arith.constant dense<0.000000e+00> : vector<8x8xf32>
    %200 = tpu.matmul %199, %21, %cst_191 {dimension_numbers = #tpu.dot_dimension_numbers<[1], [0], [0], [1], [0, 0, 1, 1], [], []>} : vector<8x4xbf16>, vector<4x8xbf16>, vector<8x8xf32> -> vector<8x8xf32>
    %201 = arith.addf %197, %200 : vector<8x8xf32>
    %c0_192 = arith.constant 0 : index
    %c3_193 = arith.constant 3 : index
    %c0_194 = arith.constant 0 : index
    %c0_195 = arith.constant 0 : index
    %202 = vector.load %arg5[%c0_192, %c3_193, %c0_194, %c0_195] : memref<1x8x8x8xf32, #tpu.memory_space<vmem>>, vector<1x1x8x8xf32>
    %203 = vector.shape_cast %202 : vector<1x1x8x8xf32> to vector<8x8xf32>
    %204 = vector.shape_cast %201 : vector<8x8xf32> to vector<1x1x8x8xf32>
    tpu.vector_store %arg5[%c0_192, %c3_193, %c0_194, %c0_195], %204 {strides = array<i32>} : memref<1x8x8x8xf32, #tpu.memory_space<vmem>>, vector<1x1x8x8xf32>,
    %cst_196 = arith.constant dense<0.000000e+00> : vector<8xf32>
    %205 = vector.multi_reduction <add>, %201, %cst_196 [0] : vector<8x8xf32> to vector<8xf32>
    %206 = vector.shape_cast %205 : vector<8xf32> to vector<1x8xf32>
    %207 = arith.addf %160, %206 : vector<1x8xf32>
    %208 = arith.mulf %201, %201 : vector<8x8xf32>
    %cst_197 = arith.constant dense<0.000000e+00> : vector<8xf32>
    %209 = vector.multi_reduction <add>, %208, %cst_197 [0] : vector<8x8xf32> to vector<8xf32>
    %210 = vector.shape_cast %209 : vector<8xf32> to vector<1x8xf32>
    %211 = arith.addf %164, %210 : vector<1x8xf32>
    %cst_198 = arith.constant 0.000000e+00 : f32
    %212 = vector.broadcast %cst_198 : f32 to vector<8x8xf32>
    %c16_199 = arith.constant 16 : index
    %c0_200 = arith.constant 0 : index
    %c0_201 = arith.constant 0 : index
    %213 = vector.load %arg8[%c16_199, %c0_200, %c0_201] : memref<36x9x4xbf16, #tpu.memory_space<vmem>>, vector<1x8x4xbf16>
    %214 = vector.shape_cast %213 : vector<1x8x4xbf16> to vector<8x4xbf16>
    %cst_202 = arith.constant dense<0.000000e+00> : vector<8x8xf32>
    %215 = tpu.matmul %214, %5, %cst_202 {dimension_numbers = #tpu.dot_dimension_numbers<[1], [0], [0], [1], [0, 0, 1, 1], [], []>} : vector<8x4xbf16>, vector<4x8xbf16>, vector<8x8xf32> -> vector<8x8xf32>
    %216 = arith.addf %212, %215 : vector<8x8xf32>
    %c17_203 = arith.constant 17 : index
    %c0_204 = arith.constant 0 : index
    %c0_205 = arith.constant 0 : index
    %217 = vector.load %arg8[%c17_203, %c0_204, %c0_205] : memref<36x9x4xbf16, #tpu.memory_space<vmem>>, vector<1x8x4xbf16>
    %218 = vector.shape_cast %217 : vector<1x8x4xbf16> to vector<8x4xbf16>
    %cst_206 = arith.constant dense<0.000000e+00> : vector<8x8xf32>
    %219 = tpu.matmul %218, %7, %cst_206 {dimension_numbers = #tpu.dot_dimension_numbers<[1], [0], [0], [1], [0, 0, 1, 1], [], []>} : vector<8x4xbf16>, vector<4x8xbf16>, vector<8x8xf32> -> vector<8x8xf32>
    %220 = arith.addf %216, %219 : vector<8x8xf32>
    %c16_207 = arith.constant 16 : index
    %c1_208 = arith.constant 1 : index
    %c0_209 = arith.constant 0 : index
    %221 = vector.load %arg8[%c16_207, %c1_208, %c0_209] : memref<36x9x4xbf16, #tpu.memory_space<vmem>>, vector<1x8x4xbf16>
    %222 = vector.shape_cast %221 : vector<1x8x4xbf16> to vector<8x4xbf16>
    %cst_210 = arith.constant dense<0.000000e+00> : vector<8x8xf32>
    %223 = tpu.matmul %222, %9, %cst_210 {dimension_numbers = #tpu.dot_dimension_numbers<[1], [0], [0], [1], [0, 0, 1, 1], [], []>} : vector<8x4xbf16>, vector<4x8xbf16>, vector<8x8xf32> -> vector<8x8xf32>
    %224 = arith.addf %220, %223 : vector<8x8xf32>
    %c18 = arith.constant 18 : index
    %c0_211 = arith.constant 0 : index
    %c0_212 = arith.constant 0 : index
    %225 = vector.load %arg8[%c18, %c0_211, %c0_212] : memref<36x9x4xbf16, #tpu.memory_space<vmem>>, vector<1x8x4xbf16>
    %226 = vector.shape_cast %225 : vector<1x8x4xbf16> to vector<8x4xbf16>
    %cst_213 = arith.constant dense<0.000000e+00> : vector<8x8xf32>
    %227 = tpu.matmul %226, %11, %cst_213 {dimension_numbers = #tpu.dot_dimension_numbers<[1], [0], [0], [1], [0, 0, 1, 1], [], []>} : vector<8x4xbf16>, vector<4x8xbf16>, vector<8x8xf32> -> vector<8x8xf32>
    %228 = arith.addf %224, %227 : vector<8x8xf32>
    %c19 = arith.constant 19 : index
    %c0_214 = arith.constant 0 : index
    %c0_215 = arith.constant 0 : index
    %229 = vector.load %arg8[%c19, %c0_214, %c0_215] : memref<36x9x4xbf16, #tpu.memory_space<vmem>>, vector<1x8x4xbf16>
    %230 = vector.shape_cast %229 : vector<1x8x4xbf16> to vector<8x4xbf16>
    %cst_216 = arith.constant dense<0.000000e+00> : vector<8x8xf32>
    %231 = tpu.matmul %230, %13, %cst_216 {dimension_numbers = #tpu.dot_dimension_numbers<[1], [0], [0], [1], [0, 0, 1, 1], [], []>} : vector<8x4xbf16>, vector<4x8xbf16>, vector<8x8xf32> -> vector<8x8xf32>
    %232 = arith.addf %228, %231 : vector<8x8xf32>
    %c18_217 = arith.constant 18 : index
    %c1_218 = arith.constant 1 : index
    %c0_219 = arith.constant 0 : index
    %233 = vector.load %arg8[%c18_217, %c1_218, %c0_219] : memref<36x9x4xbf16, #tpu.memory_space<vmem>>, vector<1x8x4xbf16>
    %234 = vector.shape_cast %233 : vector<1x8x4xbf16> to vector<8x4xbf16>
    %cst_220 = arith.constant dense<0.000000e+00> : vector<8x8xf32>
    %235 = tpu.matmul %234, %15, %cst_220 {dimension_numbers = #tpu.dot_dimension_numbers<[1], [0], [0], [1], [0, 0, 1, 1], [], []>} : vector<8x4xbf16>, vector<4x8xbf16>, vector<8x8xf32> -> vector<8x8xf32>
    %236 = arith.addf %232, %235 : vector<8x8xf32>
    %c20 = arith.constant 20 : index
    %c0_221 = arith.constant 0 : index
    %c0_222 = arith.constant 0 : index
    %237 = vector.load %arg8[%c20, %c0_221, %c0_222] : memref<36x9x4xbf16, #tpu.memory_space<vmem>>, vector<1x8x4xbf16>
    %238 = vector.shape_cast %237 : vector<1x8x4xbf16> to vector<8x4xbf16>
    %cst_223 = arith.constant dense<0.000000e+00> : vector<8x8xf32>
    %239 = tpu.matmul %238, %17, %cst_223 {dimension_numbers = #tpu.dot_dimension_numbers<[1], [0], [0], [1], [0, 0, 1, 1], [], []>} : vector<8x4xbf16>, vector<4x8xbf16>, vector<8x8xf32> -> vector<8x8xf32>
    %240 = arith.addf %236, %239 : vector<8x8xf32>
    %c21 = arith.constant 21 : index
    %c0_224 = arith.constant 0 : index
    %c0_225 = arith.constant 0 : index
    %241 = vector.load %arg8[%c21, %c0_224, %c0_225] : memref<36x9x4xbf16, #tpu.memory_space<vmem>>, vector<1x8x4xbf16>
    %242 = vector.shape_cast %241 : vector<1x8x4xbf16> to vector<8x4xbf16>
    %cst_226 = arith.constant dense<0.000000e+00> : vector<8x8xf32>
    %243 = tpu.matmul %242, %19, %cst_226 {dimension_numbers = #tpu.dot_dimension_numbers<[1], [0], [0], [1], [0, 0, 1, 1], [], []>} : vector<8x4xbf16>, vector<4x8xbf16>, vector<8x8xf32> -> vector<8x8xf32>
    %244 = arith.addf %240, %243 : vector<8x8xf32>
    %c20_227 = arith.constant 20 : index
    %c1_228 = arith.constant 1 : index
    %c0_229 = arith.constant 0 : index
    %245 = vector.load %arg8[%c20_227, %c1_228, %c0_229] : memref<36x9x4xbf16, #tpu.memory_space<vmem>>, vector<1x8x4xbf16>
    %246 = vector.shape_cast %245 : vector<1x8x4xbf16> to vector<8x4xbf16>
    %cst_230 = arith.constant dense<0.000000e+00> : vector<8x8xf32>
    %247 = tpu.matmul %246, %21, %cst_230 {dimension_numbers = #tpu.dot_dimension_numbers<[1], [0], [0], [1], [0, 0, 1, 1], [], []>} : vector<8x4xbf16>, vector<4x8xbf16>, vector<8x8xf32> -> vector<8x8xf32>
    %248 = arith.addf %244, %247 : vector<8x8xf32>
    %c0_231 = arith.constant 0 : index
    %c4_232 = arith.constant 4 : index
    %c0_233 = arith.constant 0 : index
    %c0_234 = arith.constant 0 : index
    %249 = vector.load %arg5[%c0_231, %c4_232, %c0_233, %c0_234] : memref<1x8x8x8xf32, #tpu.memory_space<vmem>>, vector<1x1x8x8xf32>
    %250 = vector.shape_cast %249 : vector<1x1x8x8xf32> to vector<8x8xf32>
    %251 = vector.shape_cast %248 : vector<8x8xf32> to vector<1x1x8x8xf32>
    tpu.vector_store %arg5[%c0_231, %c4_232, %c0_233, %c0_234], %251 {strides = array<i32>} : memref<1x8x8x8xf32, #tpu.memory_space<vmem>>, vector<1x1x8x8xf32>,
    %cst_235 = arith.constant dense<0.000000e+00> : vector<8xf32>
    %252 = vector.multi_reduction <add>, %248, %cst_235 [0] : vector<8x8xf32> to vector<8xf32>
    %253 = vector.shape_cast %252 : vector<8xf32> to vector<1x8xf32>
    %254 = arith.addf %207, %253 : vector<1x8xf32>
    %255 = arith.mulf %248, %248 : vector<8x8xf32>
    %cst_236 = arith.constant dense<0.000000e+00> : vector<8xf32>
    %256 = vector.multi_reduction <add>, %255, %cst_236 [0] : vector<8x8xf32> to vector<8xf32>
    %257 = vector.shape_cast %256 : vector<8xf32> to vector<1x8xf32>
    %258 = arith.addf %211, %257 : vector<1x8xf32>
    %cst_237 = arith.constant 0.000000e+00 : f32
    %259 = vector.broadcast %cst_237 : f32 to vector<8x8xf32>
    %c20_238 = arith.constant 20 : index
    %c0_239 = arith.constant 0 : index
    %c0_240 = arith.constant 0 : index
    %260 = vector.load %arg8[%c20_238, %c0_239, %c0_240] : memref<36x9x4xbf16, #tpu.memory_space<vmem>>, vector<1x8x4xbf16>
    %261 = vector.shape_cast %260 : vector<1x8x4xbf16> to vector<8x4xbf16>
    %cst_241 = arith.constant dense<0.000000e+00> : vector<8x8xf32>
    %262 = tpu.matmul %261, %5, %cst_241 {dimension_numbers = #tpu.dot_dimension_numbers<[1], [0], [0], [1], [0, 0, 1, 1], [], []>} : vector<8x4xbf16>, vector<4x8xbf16>, vector<8x8xf32> -> vector<8x8xf32>
    %263 = arith.addf %259, %262 : vector<8x8xf32>
    %c21_242 = arith.constant 21 : index
    %c0_243 = arith.constant 0 : index
    %c0_244 = arith.constant 0 : index
    %264 = vector.load %arg8[%c21_242, %c0_243, %c0_244] : memref<36x9x4xbf16, #tpu.memory_space<vmem>>, vector<1x8x4xbf16>
    %265 = vector.shape_cast %264 : vector<1x8x4xbf16> to vector<8x4xbf16>
    %cst_245 = arith.constant dense<0.000000e+00> : vector<8x8xf32>
    %266 = tpu.matmul %265, %7, %cst_245 {dimension_numbers = #tpu.dot_dimension_numbers<[1], [0], [0], [1], [0, 0, 1, 1], [], []>} : vector<8x4xbf16>, vector<4x8xbf16>, vector<8x8xf32> -> vector<8x8xf32>
    %267 = arith.addf %263, %266 : vector<8x8xf32>
    %c20_246 = arith.constant 20 : index
    %c1_247 = arith.constant 1 : index
    %c0_248 = arith.constant 0 : index
    %268 = vector.load %arg8[%c20_246, %c1_247, %c0_248] : memref<36x9x4xbf16, #tpu.memory_space<vmem>>, vector<1x8x4xbf16>
    %269 = vector.shape_cast %268 : vector<1x8x4xbf16> to vector<8x4xbf16>
    %cst_249 = arith.constant dense<0.000000e+00> : vector<8x8xf32>
    %270 = tpu.matmul %269, %9, %cst_249 {dimension_numbers = #tpu.dot_dimension_numbers<[1], [0], [0], [1], [0, 0, 1, 1], [], []>} : vector<8x4xbf16>, vector<4x8xbf16>, vector<8x8xf32> -> vector<8x8xf32>
    %271 = arith.addf %267, %270 : vector<8x8xf32>
    %c22 = arith.constant 22 : index
    %c0_250 = arith.constant 0 : index
    %c0_251 = arith.constant 0 : index
    %272 = vector.load %arg8[%c22, %c0_250, %c0_251] : memref<36x9x4xbf16, #tpu.memory_space<vmem>>, vector<1x8x4xbf16>
    %273 = vector.shape_cast %272 : vector<1x8x4xbf16> to vector<8x4xbf16>
    %cst_252 = arith.constant dense<0.000000e+00> : vector<8x8xf32>
    %274 = tpu.matmul %273, %11, %cst_252 {dimension_numbers = #tpu.dot_dimension_numbers<[1], [0], [0], [1], [0, 0, 1, 1], [], []>} : vector<8x4xbf16>, vector<4x8xbf16>, vector<8x8xf32> -> vector<8x8xf32>
    %275 = arith.addf %271, %274 : vector<8x8xf32>
    %c23 = arith.constant 23 : index
    %c0_253 = arith.constant 0 : index
    %c0_254 = arith.constant 0 : index
    %276 = vector.load %arg8[%c23, %c0_253, %c0_254] : memref<36x9x4xbf16, #tpu.memory_space<vmem>>, vector<1x8x4xbf16>
    %277 = vector.shape_cast %276 : vector<1x8x4xbf16> to vector<8x4xbf16>
    %cst_255 = arith.constant dense<0.000000e+00> : vector<8x8xf32>
    %278 = tpu.matmul %277, %13, %cst_255 {dimension_numbers = #tpu.dot_dimension_numbers<[1], [0], [0], [1], [0, 0, 1, 1], [], []>} : vector<8x4xbf16>, vector<4x8xbf16>, vector<8x8xf32> -> vector<8x8xf32>
    %279 = arith.addf %275, %278 : vector<8x8xf32>
    %c22_256 = arith.constant 22 : index
    %c1_257 = arith.constant 1 : index
    %c0_258 = arith.constant 0 : index
    %280 = vector.load %arg8[%c22_256, %c1_257, %c0_258] : memref<36x9x4xbf16, #tpu.memory_space<vmem>>, vector<1x8x4xbf16>
    %281 = vector.shape_cast %280 : vector<1x8x4xbf16> to vector<8x4xbf16>
    %cst_259 = arith.constant dense<0.000000e+00> : vector<8x8xf32>
    %282 = tpu.matmul %281, %15, %cst_259 {dimension_numbers = #tpu.dot_dimension_numbers<[1], [0], [0], [1], [0, 0, 1, 1], [], []>} : vector<8x4xbf16>, vector<4x8xbf16>, vector<8x8xf32> -> vector<8x8xf32>
    %283 = arith.addf %279, %282 : vector<8x8xf32>
    %c24 = arith.constant 24 : index
    %c0_260 = arith.constant 0 : index
    %c0_261 = arith.constant 0 : index
    %284 = vector.load %arg8[%c24, %c0_260, %c0_261] : memref<36x9x4xbf16, #tpu.memory_space<vmem>>, vector<1x8x4xbf16>
    %285 = vector.shape_cast %284 : vector<1x8x4xbf16> to vector<8x4xbf16>
    %cst_262 = arith.constant dense<0.000000e+00> : vector<8x8xf32>
    %286 = tpu.matmul %285, %17, %cst_262 {dimension_numbers = #tpu.dot_dimension_numbers<[1], [0], [0], [1], [0, 0, 1, 1], [], []>} : vector<8x4xbf16>, vector<4x8xbf16>, vector<8x8xf32> -> vector<8x8xf32>
    %287 = arith.addf %283, %286 : vector<8x8xf32>
    %c25 = arith.constant 25 : index
    %c0_263 = arith.constant 0 : index
    %c0_264 = arith.constant 0 : index
    %288 = vector.load %arg8[%c25, %c0_263, %c0_264] : memref<36x9x4xbf16, #tpu.memory_space<vmem>>, vector<1x8x4xbf16>
    %289 = vector.shape_cast %288 : vector<1x8x4xbf16> to vector<8x4xbf16>
    %cst_265 = arith.constant dense<0.000000e+00> : vector<8x8xf32>
    %290 = tpu.matmul %289, %19, %cst_265 {dimension_numbers = #tpu.dot_dimension_numbers<[1], [0], [0], [1], [0, 0, 1, 1], [], []>} : vector<8x4xbf16>, vector<4x8xbf16>, vector<8x8xf32> -> vector<8x8xf32>
    %291 = arith.addf %287, %290 : vector<8x8xf32>
    %c24_266 = arith.constant 24 : index
    %c1_267 = arith.constant 1 : index
    %c0_268 = arith.constant 0 : index
    %292 = vector.load %arg8[%c24_266, %c1_267, %c0_268] : memref<36x9x4xbf16, #tpu.memory_space<vmem>>, vector<1x8x4xbf16>
    %293 = vector.shape_cast %292 : vector<1x8x4xbf16> to vector<8x4xbf16>
    %cst_269 = arith.constant dense<0.000000e+00> : vector<8x8xf32>
    %294 = tpu.matmul %293, %21, %cst_269 {dimension_numbers = #tpu.dot_dimension_numbers<[1], [0], [0], [1], [0, 0, 1, 1], [], []>} : vector<8x4xbf16>, vector<4x8xbf16>, vector<8x8xf32> -> vector<8x8xf32>
    %295 = arith.addf %291, %294 : vector<8x8xf32>
    %c0_270 = arith.constant 0 : index
    %c5_271 = arith.constant 5 : index
    %c0_272 = arith.constant 0 : index
    %c0_273 = arith.constant 0 : index
    %296 = vector.load %arg5[%c0_270, %c5_271, %c0_272, %c0_273] : memref<1x8x8x8xf32, #tpu.memory_space<vmem>>, vector<1x1x8x8xf32>
    %297 = vector.shape_cast %296 : vector<1x1x8x8xf32> to vector<8x8xf32>
    %298 = vector.shape_cast %295 : vector<8x8xf32> to vector<1x1x8x8xf32>
    tpu.vector_store %arg5[%c0_270, %c5_271, %c0_272, %c0_273], %298 {strides = array<i32>} : memref<1x8x8x8xf32, #tpu.memory_space<vmem>>, vector<1x1x8x8xf32>,
    %cst_274 = arith.constant dense<0.000000e+00> : vector<8xf32>
    %299 = vector.multi_reduction <add>, %295, %cst_274 [0] : vector<8x8xf32> to vector<8xf32>
    %300 = vector.shape_cast %299 : vector<8xf32> to vector<1x8xf32>
    %301 = arith.addf %254, %300 : vector<1x8xf32>
    %302 = arith.mulf %295, %295 : vector<8x8xf32>
    %cst_275 = arith.constant dense<0.000000e+00> : vector<8xf32>
    %303 = vector.multi_reduction <add>, %302, %cst_275 [0] : vector<8x8xf32> to vector<8xf32>
    %304 = vector.shape_cast %303 : vector<8xf32> to vector<1x8xf32>
    %305 = arith.addf %258, %304 : vector<1x8xf32>
    %cst_276 = arith.constant 0.000000e+00 : f32
    %306 = vector.broadcast %cst_276 : f32 to vector<8x8xf32>
    %c24_277 = arith.constant 24 : index
    %c0_278 = arith.constant 0 : index
    %c0_279 = arith.constant 0 : index
    %307 = vector.load %arg8[%c24_277, %c0_278, %c0_279] : memref<36x9x4xbf16, #tpu.memory_space<vmem>>, vector<1x8x4xbf16>
    %308 = vector.shape_cast %307 : vector<1x8x4xbf16> to vector<8x4xbf16>
    %cst_280 = arith.constant dense<0.000000e+00> : vector<8x8xf32>
    %309 = tpu.matmul %308, %5, %cst_280 {dimension_numbers = #tpu.dot_dimension_numbers<[1], [0], [0], [1], [0, 0, 1, 1], [], []>} : vector<8x4xbf16>, vector<4x8xbf16>, vector<8x8xf32> -> vector<8x8xf32>
    %310 = arith.addf %306, %309 : vector<8x8xf32>
    %c25_281 = arith.constant 25 : index
    %c0_282 = arith.constant 0 : index
    %c0_283 = arith.constant 0 : index
    %311 = vector.load %arg8[%c25_281, %c0_282, %c0_283] : memref<36x9x4xbf16, #tpu.memory_space<vmem>>, vector<1x8x4xbf16>
    %312 = vector.shape_cast %311 : vector<1x8x4xbf16> to vector<8x4xbf16>
    %cst_284 = arith.constant dense<0.000000e+00> : vector<8x8xf32>
    %313 = tpu.matmul %312, %7, %cst_284 {dimension_numbers = #tpu.dot_dimension_numbers<[1], [0], [0], [1], [0, 0, 1, 1], [], []>} : vector<8x4xbf16>, vector<4x8xbf16>, vector<8x8xf32> -> vector<8x8xf32>
    %314 = arith.addf %310, %313 : vector<8x8xf32>
    %c24_285 = arith.constant 24 : index
    %c1_286 = arith.constant 1 : index
    %c0_287 = arith.constant 0 : index
    %315 = vector.load %arg8[%c24_285, %c1_286, %c0_287] : memref<36x9x4xbf16, #tpu.memory_space<vmem>>, vector<1x8x4xbf16>
    %316 = vector.shape_cast %315 : vector<1x8x4xbf16> to vector<8x4xbf16>
    %cst_288 = arith.constant dense<0.000000e+00> : vector<8x8xf32>
    %317 = tpu.matmul %316, %9, %cst_288 {dimension_numbers = #tpu.dot_dimension_numbers<[1], [0], [0], [1], [0, 0, 1, 1], [], []>} : vector<8x4xbf16>, vector<4x8xbf16>, vector<8x8xf32> -> vector<8x8xf32>
    %318 = arith.addf %314, %317 : vector<8x8xf32>
    %c26 = arith.constant 26 : index
    %c0_289 = arith.constant 0 : index
    %c0_290 = arith.constant 0 : index
    %319 = vector.load %arg8[%c26, %c0_289, %c0_290] : memref<36x9x4xbf16, #tpu.memory_space<vmem>>, vector<1x8x4xbf16>
    %320 = vector.shape_cast %319 : vector<1x8x4xbf16> to vector<8x4xbf16>
    %cst_291 = arith.constant dense<0.000000e+00> : vector<8x8xf32>
    %321 = tpu.matmul %320, %11, %cst_291 {dimension_numbers = #tpu.dot_dimension_numbers<[1], [0], [0], [1], [0, 0, 1, 1], [], []>} : vector<8x4xbf16>, vector<4x8xbf16>, vector<8x8xf32> -> vector<8x8xf32>
    %322 = arith.addf %318, %321 : vector<8x8xf32>
    %c27 = arith.constant 27 : index
    %c0_292 = arith.constant 0 : index
    %c0_293 = arith.constant 0 : index
    %323 = vector.load %arg8[%c27, %c0_292, %c0_293] : memref<36x9x4xbf16, #tpu.memory_space<vmem>>, vector<1x8x4xbf16>
    %324 = vector.shape_cast %323 : vector<1x8x4xbf16> to vector<8x4xbf16>
    %cst_294 = arith.constant dense<0.000000e+00> : vector<8x8xf32>
    %325 = tpu.matmul %324, %13, %cst_294 {dimension_numbers = #tpu.dot_dimension_numbers<[1], [0], [0], [1], [0, 0, 1, 1], [], []>} : vector<8x4xbf16>, vector<4x8xbf16>, vector<8x8xf32> -> vector<8x8xf32>
    %326 = arith.addf %322, %325 : vector<8x8xf32>
    %c26_295 = arith.constant 26 : index
    %c1_296 = arith.constant 1 : index
    %c0_297 = arith.constant 0 : index
    %327 = vector.load %arg8[%c26_295, %c1_296, %c0_297] : memref<36x9x4xbf16, #tpu.memory_space<vmem>>, vector<1x8x4xbf16>
    %328 = vector.shape_cast %327 : vector<1x8x4xbf16> to vector<8x4xbf16>
    %cst_298 = arith.constant dense<0.000000e+00> : vector<8x8xf32>
    %329 = tpu.matmul %328, %15, %cst_298 {dimension_numbers = #tpu.dot_dimension_numbers<[1], [0], [0], [1], [0, 0, 1, 1], [], []>} : vector<8x4xbf16>, vector<4x8xbf16>, vector<8x8xf32> -> vector<8x8xf32>
    %330 = arith.addf %326, %329 : vector<8x8xf32>
    %c28 = arith.constant 28 : index
    %c0_299 = arith.constant 0 : index
    %c0_300 = arith.constant 0 : index
    %331 = vector.load %arg8[%c28, %c0_299, %c0_300] : memref<36x9x4xbf16, #tpu.memory_space<vmem>>, vector<1x8x4xbf16>
    %332 = vector.shape_cast %331 : vector<1x8x4xbf16> to vector<8x4xbf16>
    %cst_301 = arith.constant dense<0.000000e+00> : vector<8x8xf32>
    %333 = tpu.matmul %332, %17, %cst_301 {dimension_numbers = #tpu.dot_dimension_numbers<[1], [0], [0], [1], [0, 0, 1, 1], [], []>} : vector<8x4xbf16>, vector<4x8xbf16>, vector<8x8xf32> -> vector<8x8xf32>
    %334 = arith.addf %330, %333 : vector<8x8xf32>
    %c29 = arith.constant 29 : index
    %c0_302 = arith.constant 0 : index
    %c0_303 = arith.constant 0 : index
    %335 = vector.load %arg8[%c29, %c0_302, %c0_303] : memref<36x9x4xbf16, #tpu.memory_space<vmem>>, vector<1x8x4xbf16>
    %336 = vector.shape_cast %335 : vector<1x8x4xbf16> to vector<8x4xbf16>
    %cst_304 = arith.constant dense<0.000000e+00> : vector<8x8xf32>
    %337 = tpu.matmul %336, %19, %cst_304 {dimension_numbers = #tpu.dot_dimension_numbers<[1], [0], [0], [1], [0, 0, 1, 1], [], []>} : vector<8x4xbf16>, vector<4x8xbf16>, vector<8x8xf32> -> vector<8x8xf32>
    %338 = arith.addf %334, %337 : vector<8x8xf32>
    %c28_305 = arith.constant 28 : index
    %c1_306 = arith.constant 1 : index
    %c0_307 = arith.constant 0 : index
    %339 = vector.load %arg8[%c28_305, %c1_306, %c0_307] : memref<36x9x4xbf16, #tpu.memory_space<vmem>>, vector<1x8x4xbf16>
    %340 = vector.shape_cast %339 : vector<1x8x4xbf16> to vector<8x4xbf16>
    %cst_308 = arith.constant dense<0.000000e+00> : vector<8x8xf32>
    %341 = tpu.matmul %340, %21, %cst_308 {dimension_numbers = #tpu.dot_dimension_numbers<[1], [0], [0], [1], [0, 0, 1, 1], [], []>} : vector<8x4xbf16>, vector<4x8xbf16>, vector<8x8xf32> -> vector<8x8xf32>
    %342 = arith.addf %338, %341 : vector<8x8xf32>
    %c0_309 = arith.constant 0 : index
    %c6_310 = arith.constant 6 : index
    %c0_311 = arith.constant 0 : index
    %c0_312 = arith.constant 0 : index
    %343 = vector.load %arg5[%c0_309, %c6_310, %c0_311, %c0_312] : memref<1x8x8x8xf32, #tpu.memory_space<vmem>>, vector<1x1x8x8xf32>
    %344 = vector.shape_cast %343 : vector<1x1x8x8xf32> to vector<8x8xf32>
    %345 = vector.shape_cast %342 : vector<8x8xf32> to vector<1x1x8x8xf32>
    tpu.vector_store %arg5[%c0_309, %c6_310, %c0_311, %c0_312], %345 {strides = array<i32>} : memref<1x8x8x8xf32, #tpu.memory_space<vmem>>, vector<1x1x8x8xf32>,
    %cst_313 = arith.constant dense<0.000000e+00> : vector<8xf32>
    %346 = vector.multi_reduction <add>, %342, %cst_313 [0] : vector<8x8xf32> to vector<8xf32>
    %347 = vector.shape_cast %346 : vector<8xf32> to vector<1x8xf32>
    %348 = arith.addf %301, %347 : vector<1x8xf32>
    %349 = arith.mulf %342, %342 : vector<8x8xf32>
    %cst_314 = arith.constant dense<0.000000e+00> : vector<8xf32>
    %350 = vector.multi_reduction <add>, %349, %cst_314 [0] : vector<8x8xf32> to vector<8xf32>
    %351 = vector.shape_cast %350 : vector<8xf32> to vector<1x8xf32>
    %352 = arith.addf %305, %351 : vector<1x8xf32>
    %cst_315 = arith.constant 0.000000e+00 : f32
    %353 = vector.broadcast %cst_315 : f32 to vector<8x8xf32>
    %c28_316 = arith.constant 28 : index
    %c0_317 = arith.constant 0 : index
    %c0_318 = arith.constant 0 : index
    %354 = vector.load %arg8[%c28_316, %c0_317, %c0_318] : memref<36x9x4xbf16, #tpu.memory_space<vmem>>, vector<1x8x4xbf16>
    %355 = vector.shape_cast %354 : vector<1x8x4xbf16> to vector<8x4xbf16>
    %cst_319 = arith.constant dense<0.000000e+00> : vector<8x8xf32>
    %356 = tpu.matmul %355, %5, %cst_319 {dimension_numbers = #tpu.dot_dimension_numbers<[1], [0], [0], [1], [0, 0, 1, 1], [], []>} : vector<8x4xbf16>, vector<4x8xbf16>, vector<8x8xf32> -> vector<8x8xf32>
    %357 = arith.addf %353, %356 : vector<8x8xf32>
    %c29_320 = arith.constant 29 : index
    %c0_321 = arith.constant 0 : index
    %c0_322 = arith.constant 0 : index
    %358 = vector.load %arg8[%c29_320, %c0_321, %c0_322] : memref<36x9x4xbf16, #tpu.memory_space<vmem>>, vector<1x8x4xbf16>
    %359 = vector.shape_cast %358 : vector<1x8x4xbf16> to vector<8x4xbf16>
    %cst_323 = arith.constant dense<0.000000e+00> : vector<8x8xf32>
    %360 = tpu.matmul %359, %7, %cst_323 {dimension_numbers = #tpu.dot_dimension_numbers<[1], [0], [0], [1], [0, 0, 1, 1], [], []>} : vector<8x4xbf16>, vector<4x8xbf16>, vector<8x8xf32> -> vector<8x8xf32>
    %361 = arith.addf %357, %360 : vector<8x8xf32>
    %c28_324 = arith.constant 28 : index
    %c1_325 = arith.constant 1 : index
    %c0_326 = arith.constant 0 : index
    %362 = vector.load %arg8[%c28_324, %c1_325, %c0_326] : memref<36x9x4xbf16, #tpu.memory_space<vmem>>, vector<1x8x4xbf16>
    %363 = vector.shape_cast %362 : vector<1x8x4xbf16> to vector<8x4xbf16>
    %cst_327 = arith.constant dense<0.000000e+00> : vector<8x8xf32>
    %364 = tpu.matmul %363, %9, %cst_327 {dimension_numbers = #tpu.dot_dimension_numbers<[1], [0], [0], [1], [0, 0, 1, 1], [], []>} : vector<8x4xbf16>, vector<4x8xbf16>, vector<8x8xf32> -> vector<8x8xf32>
    %365 = arith.addf %361, %364 : vector<8x8xf32>
    %c30 = arith.constant 30 : index
    %c0_328 = arith.constant 0 : index
    %c0_329 = arith.constant 0 : index
    %366 = vector.load %arg8[%c30, %c0_328, %c0_329] : memref<36x9x4xbf16, #tpu.memory_space<vmem>>, vector<1x8x4xbf16>
    %367 = vector.shape_cast %366 : vector<1x8x4xbf16> to vector<8x4xbf16>
    %cst_330 = arith.constant dense<0.000000e+00> : vector<8x8xf32>
    %368 = tpu.matmul %367, %11, %cst_330 {dimension_numbers = #tpu.dot_dimension_numbers<[1], [0], [0], [1], [0, 0, 1, 1], [], []>} : vector<8x4xbf16>, vector<4x8xbf16>, vector<8x8xf32> -> vector<8x8xf32>
    %369 = arith.addf %365, %368 : vector<8x8xf32>
    %c31 = arith.constant 31 : index
    %c0_331 = arith.constant 0 : index
    %c0_332 = arith.constant 0 : index
    %370 = vector.load %arg8[%c31, %c0_331, %c0_332] : memref<36x9x4xbf16, #tpu.memory_space<vmem>>, vector<1x8x4xbf16>
    %371 = vector.shape_cast %370 : vector<1x8x4xbf16> to vector<8x4xbf16>
    %cst_333 = arith.constant dense<0.000000e+00> : vector<8x8xf32>
    %372 = tpu.matmul %371, %13, %cst_333 {dimension_numbers = #tpu.dot_dimension_numbers<[1], [0], [0], [1], [0, 0, 1, 1], [], []>} : vector<8x4xbf16>, vector<4x8xbf16>, vector<8x8xf32> -> vector<8x8xf32>
    %373 = arith.addf %369, %372 : vector<8x8xf32>
    %c30_334 = arith.constant 30 : index
    %c1_335 = arith.constant 1 : index
    %c0_336 = arith.constant 0 : index
    %374 = vector.load %arg8[%c30_334, %c1_335, %c0_336] : memref<36x9x4xbf16, #tpu.memory_space<vmem>>, vector<1x8x4xbf16>
    %375 = vector.shape_cast %374 : vector<1x8x4xbf16> to vector<8x4xbf16>
    %cst_337 = arith.constant dense<0.000000e+00> : vector<8x8xf32>
    %376 = tpu.matmul %375, %15, %cst_337 {dimension_numbers = #tpu.dot_dimension_numbers<[1], [0], [0], [1], [0, 0, 1, 1], [], []>} : vector<8x4xbf16>, vector<4x8xbf16>, vector<8x8xf32> -> vector<8x8xf32>
    %377 = arith.addf %373, %376 : vector<8x8xf32>
    %c32 = arith.constant 32 : index
    %c0_338 = arith.constant 0 : index
    %c0_339 = arith.constant 0 : index
    %378 = vector.load %arg8[%c32, %c0_338, %c0_339] : memref<36x9x4xbf16, #tpu.memory_space<vmem>>, vector<1x8x4xbf16>
    %379 = vector.shape_cast %378 : vector<1x8x4xbf16> to vector<8x4xbf16>
    %cst_340 = arith.constant dense<0.000000e+00> : vector<8x8xf32>
    %380 = tpu.matmul %379, %17, %cst_340 {dimension_numbers = #tpu.dot_dimension_numbers<[1], [0], [0], [1], [0, 0, 1, 1], [], []>} : vector<8x4xbf16>, vector<4x8xbf16>, vector<8x8xf32> -> vector<8x8xf32>
    %381 = arith.addf %377, %380 : vector<8x8xf32>
    %c33 = arith.constant 33 : index
    %c0_341 = arith.constant 0 : index
    %c0_342 = arith.constant 0 : index
    %382 = vector.load %arg8[%c33, %c0_341, %c0_342] : memref<36x9x4xbf16, #tpu.memory_space<vmem>>, vector<1x8x4xbf16>
    %383 = vector.shape_cast %382 : vector<1x8x4xbf16> to vector<8x4xbf16>
    %cst_343 = arith.constant dense<0.000000e+00> : vector<8x8xf32>
    %384 = tpu.matmul %383, %19, %cst_343 {dimension_numbers = #tpu.dot_dimension_numbers<[1], [0], [0], [1], [0, 0, 1, 1], [], []>} : vector<8x4xbf16>, vector<4x8xbf16>, vector<8x8xf32> -> vector<8x8xf32>
    %385 = arith.addf %381, %384 : vector<8x8xf32>
    %c32_344 = arith.constant 32 : index
    %c1_345 = arith.constant 1 : index
    %c0_346 = arith.constant 0 : index
    %386 = vector.load %arg8[%c32_344, %c1_345, %c0_346] : memref<36x9x4xbf16, #tpu.memory_space<vmem>>, vector<1x8x4xbf16>
    %387 = vector.shape_cast %386 : vector<1x8x4xbf16> to vector<8x4xbf16>
    %cst_347 = arith.constant dense<0.000000e+00> : vector<8x8xf32>
    %388 = tpu.matmul %387, %21, %cst_347 {dimension_numbers = #tpu.dot_dimension_numbers<[1], [0], [0], [1], [0, 0, 1, 1], [], []>} : vector<8x4xbf16>, vector<4x8xbf16>, vector<8x8xf32> -> vector<8x8xf32>
    %389 = arith.addf %385, %388 : vector<8x8xf32>
    %c0_348 = arith.constant 0 : index
    %c7_349 = arith.constant 7 : index
    %c0_350 = arith.constant 0 : index
    %c0_351 = arith.constant 0 : index
    %390 = vector.load %arg5[%c0_348, %c7_349, %c0_350, %c0_351] : memref<1x8x8x8xf32, #tpu.memory_space<vmem>>, vector<1x1x8x8xf32>
    %391 = vector.shape_cast %390 : vector<1x1x8x8xf32> to vector<8x8xf32>
    %392 = vector.shape_cast %389 : vector<8x8xf32> to vector<1x1x8x8xf32>
    tpu.vector_store %arg5[%c0_348, %c7_349, %c0_350, %c0_351], %392 {strides = array<i32>} : memref<1x8x8x8xf32, #tpu.memory_space<vmem>>, vector<1x1x8x8xf32>,
    %cst_352 = arith.constant dense<0.000000e+00> : vector<8xf32>
    %393 = vector.multi_reduction <add>, %389, %cst_352 [0] : vector<8x8xf32> to vector<8xf32>
    %394 = vector.shape_cast %393 : vector<8xf32> to vector<1x8xf32>
    %395 = arith.addf %348, %394 : vector<1x8xf32>
    %396 = arith.mulf %389, %389 : vector<8x8xf32>
    %cst_353 = arith.constant dense<0.000000e+00> : vector<8xf32>
    %397 = vector.multi_reduction <add>, %396, %cst_353 [0] : vector<8x8xf32> to vector<8xf32>
    %398 = vector.shape_cast %397 : vector<8xf32> to vector<1x8xf32>
    %399 = arith.addf %352, %398 : vector<1x8xf32>
    %c0_354 = arith.constant 0 : index
    %c0_355 = arith.constant 0 : index
    %c0_356 = arith.constant 0 : index
    %400 = vector.load %arg6[%c0_354, %c0_355, %c0_356] : memref<1x1x8xf32, #tpu.memory_space<vmem>>, vector<1x1x8xf32>
    %401 = vector.shape_cast %400 : vector<1x1x8xf32> to vector<1x8xf32>
    %402 = vector.shape_cast %395 : vector<1x8xf32> to vector<1x1x8xf32>
    tpu.vector_store %arg6[%c0_354, %c0_355, %c0_356], %402 {strides = array<i32>} : memref<1x1x8xf32, #tpu.memory_space<vmem>>, vector<1x1x8xf32>,
    %c0_357 = arith.constant 0 : index
    %c0_358 = arith.constant 0 : index
    %c0_359 = arith.constant 0 : index
    %403 = vector.load %arg7[%c0_357, %c0_358, %c0_359] : memref<1x1x8xf32, #tpu.memory_space<vmem>>, vector<1x1x8xf32>
    %404 = vector.shape_cast %403 : vector<1x1x8xf32> to vector<1x8xf32>
    %405 = vector.shape_cast %399 : vector<1x8xf32> to vector<1x1x8xf32>
    tpu.vector_store %arg7[%c0_357, %c0_358, %c0_359], %405 {strides = array<i32>} : memref<1x1x8xf32, #tpu.memory_space<vmem>>, vector<1x1x8xf32>,
    return
  }
  func.func @transform_0(%arg0: i32) -> (i32, i32, i32, i32) {
    %c0_i32 = arith.constant 0 : i32
    %c0_i32_0 = arith.constant 0 : i32
    %c0_i32_1 = arith.constant 0 : i32
    %c0_i32_2 = arith.constant 0 : i32
    return %arg0, %c0_i32, %c0_i32_0, %c0_i32_1 : i32, i32, i32, i32
  }
  func.func @transform_1(%arg0: i32) -> (i32, i32, i32, i32) {
    %c0_i32 = arith.constant 0 : i32
    %c0_i32_0 = arith.constant 0 : i32
    %c0_i32_1 = arith.constant 0 : i32
    %c0_i32_2 = arith.constant 0 : i32
    %c0_i32_3 = arith.constant 0 : i32
    return %c0_i32, %c0_i32_0, %c0_i32_1, %c0_i32_2 : i32, i32, i32, i32
  }
  func.func @transform_2(%arg0: i32) -> (i32, i32) {
    %c0_i32 = arith.constant 0 : i32
    %c0_i32_0 = arith.constant 0 : i32
    %c0_i32_1 = arith.constant 0 : i32
    return %c0_i32, %c0_i32_0 : i32, i32
  }
  func.func @transform_3(%arg0: i32) -> (i32, i32) {
    %c0_i32 = arith.constant 0 : i32
    %c0_i32_0 = arith.constant 0 : i32
    %c0_i32_1 = arith.constant 0 : i32
    return %c0_i32, %c0_i32_0 : i32, i32
  }
  func.func @transform_4(%arg0: i32) -> (i32, i32, i32, i32) {
    %c0_i32 = arith.constant 0 : i32
    %c0_i32_0 = arith.constant 0 : i32
    %c0_i32_1 = arith.constant 0 : i32
    %c0_i32_2 = arith.constant 0 : i32
    return %arg0, %c0_i32, %c0_i32_0, %c0_i32_1 : i32, i32, i32, i32
  }
  func.func @transform_5(%arg0: i32) -> (i32, i32, i32) {
    %c0_i32 = arith.constant 0 : i32
    %c0_i32_0 = arith.constant 0 : i32
    %c0_i32_1 = arith.constant 0 : i32
    return %arg0, %c0_i32, %c0_i32_0 : i32, i32, i32
  }
  func.func @transform_6(%arg0: i32) -> (i32, i32, i32) {
    %c0_i32 = arith.constant 0 : i32
    %c0_i32_0 = arith.constant 0 : i32
    %c0_i32_1 = arith.constant 0 : i32
    return %arg0, %c0_i32, %c0_i32_0 : i32, i32, i32
  }
}

</mosaic_0001>

<bundles_post_ra>
// kernel: tpu_custom_call.1
= control target key start
LH: loop header
LB: loop body
LE: loop exit
PB: predicated region body
PF: predicated region fallthrough
CT: control target
= control target key end

     0   :  { %12 = vsyncpa [#allocation4], 0  ;;  %s3589_s0 = inlined_call_operand.vmem [shape: f32[2,36,9,4], index: 0, kind: input, shape index: {}]   ;;  %s3590_s1 = inlined_call_operand.vmem [shape: bf16[3,3,4,8], index: 1, kind: input, shape index: {}]   ;;  %s3591_s2 = inlined_call_operand.vmem [shape: f32[1,4], index: 2, kind: input, shape index: {}]   ;;  %s3592_s3 = inlined_call_operand.vmem [shape: f32[1,4], index: 3, kind: input, shape index: {}]   ;;  %s3593_s4 = inlined_call_operand.hbm [shape: f32[2,8,8,8], index: 4, kind: output, shape index: {0}]   ;;  %s3594_s5 = inlined_call_operand.hbm [shape: f32[2,1,8], index: 5, kind: output, shape index: {1}]   ;;  %s3595_s6 = inlined_call_operand.hbm [shape: f32[2,1,8], index: 6, kind: output, shape index: {2}]  }
   0x1   :  { %14 = vsyncpa [#allocation4 + $0x1], 0 }
   0x2   :  { %15 = vsyncpa [#allocation6], 0 }
   0x3   :  { %17 = vsyncpa [#allocation6 + $0x1], 0  ;;  %s2982_s21 = smov 0   ;;  %s2984_s22 = smov 0  }
   0x4   :  { %s2986_s2 = smov 0   ;;  %s2988_s3 = smov 0  }
   0x5 LB: > { %s3003_s23 = sadd.s32 4294967295, %s2943_s3   ;;  %s2550_s24 = sadd.s32 4294967294, %s2943_s3   ;;  %s2943_s3 = sphi %s2988_s3, %s3603_s3   ;;  %s2939_s2 = sphi %s2986_s2, %s3602_s2   ;;  %s2935_s22 = sphi %s2984_s22, %s3601_s22   ;;  %s2931_s21 = sphi %s2982_s21, %s3600_s21  }
   0x6   : > { %s3007_s25 = sadd.s32 1, %s2943_s3   ;;  %s119_s26 = sadd.s32 1, %s2939_s2 }
   0x7   : > { %s116_s27 = ssub.s32 %s2943_s3, %s3007_s25  ;;  %p129_p0 = scmp.ne.s32.totalorder %s2939_s2, %s2935_s22 }
   0x8   : > { %p117_p1 = scmp.eq.s32.totalorder %s116_s27, 0  ;;  %p130_p2 = scmp.eq.s32.totalorder %s3003_s23, 1 }
   0x9   : > { %p135_p3 = scmp.ne.s32.totalorder %s2935_s22, %s2931_s21  ;;  %p136_p4 = scmp.eq.s32.totalorder %s2550_s24, 1 }
   0xa   : > { %s3020_s28 = scalar_select %p117_p1, %s2939_s2, %s119_s26  }
   0xb   : > { %p3022_p5 = por %p130_p2, %p129_p0  ;;  %p3026_p6 = por %p136_p4, %p135_p3 }
   0xc   : > { %p2553_p7 = scmp.ge.s32.totalorder %s2943_s3, 1  ;;  %p223_p8 = scmp.lt.s32.totalorder %s2943_s3, 3 }
   0xe   : > { %p224_p9 = pnand %p2553_p7, %p223_p8 }
   0xf   : > { %p261_p10 = scmp.lt.s32.totalorder (!%p224_p9), %s3003_s23, 1  ;;  %s3335_s14 = sand.u32 (!%p224_p9), 1, %s2935_s22  }
  0x10   : > { %227 = sbr.rel (%p224_p9) target bundleno = 495 (0x1ef), region = 36  ;;  %s2554_s15 = sshll.u32 (!%p224_p9), %s3335_s14, 6 }
  0x11   : > { %s2768_s17 = sshll.u32 (!%p224_p9), %s3003_s23, 6  ;;  %s2386_s7 = scalar_lea.sflag (!%p224_p9), [#allocation4], %s3335_s14 }
  0x12   : > { %s2405_s20 = scalar_lea.hbm (!%p224_p9), %s3593_s4, %s2768_s17  ;;  %s2841_s12 = scalar_lea.hbm (!%p224_p9), %s3593_s4, 128 }
  0x13   : > { %s2408_s27 = sshll.u32 (!%p224_p9), %s2405_s20, 4  ;;  %s3497_s27 = int_to_ptr.hbm [resolvable:$true] %s2408_s27 }
  0x14   : > { %s2835_s8 = sshra.s32 (!%p224_p9), %s3497_s27, 4  ;;  %s2836_s8 = int_to_ptr.hbm [resolvable:$true] %s2835_s8 }
  0x15   : > { %v2556_v0 = vld [vmem:[%s3590_s1 + $0x2] sm:$0x3]  ;;  %vm583_vm0 = vcmask 1041408   ;;  %v559_v1 = vld [vmem:[%s3590_s1] sm:$0x3]  ;;  %s262_s13 = scalar_select %p261_p10, %s3003_s23, 1 }
  0x16   : > { %v3040_v2 = vsel %vm583_vm0, %v2556_v0, 0  ;;  %v3043_v3 = vsel %vm583_vm0, %v559_v1, 0  ;;  %v2558_v4 = vld [vmem:[%s3590_s1 + $0x6] sm:$0x3]  ;;  %v2557_v6 = vld [vmem:[%s3590_s1 + $0x4] sm:$0x3]  ;;  %p2842_p0 = scmp.lt.s32.totalorder %s2836_s8, %s3593_s4 }
  0x17   : > { %594 = vmatpush.bf16.msra.mxu0 %v3040_v2  ;;  %613 = vmatpush.bf16.msra.mxu1 %v3043_v3  ;;  %v3051_v5 = vsel %vm583_vm0, %v2558_v4, 0  ;;  %v3059_v7 = vsel %vm583_vm0, %v2557_v6, 0  ;;  %s2769_s16 = smul.u32 576, %s262_s13  ;;  %vm411_vm1 = vcmask 27648   ;;  %vm413_vm2 = vcmask 24576   ;;  %s2837_s9 = scalar_lea.hbm %s2836_s8, 64 }
  0x18   : > { %668 = vmatpush.bf16.msra.mxu3 %v3051_v5  ;;  %646 = vmatpush.bf16.msra.mxu2 %v3059_v7  ;;  %vm414_vm3 = vsmask.f32 256  ;;  %vm579_vm4 = vcmask 31744   ;;  %v416_v22 = vld [vmem:[#allocation2 + $0x4] sm:$0x1]  ;;  %vm809_vm6 = vcmask 64512   ;;  %p2838_p11 = scmp.ne.s32.totalorder %s2836_s8, %s2837_s9  ;;  %p2843_p1 = scmp.lt.s32.totalorder %s2841_s12, %s2837_s9 }
  0x19   : > { %s3065_s19 = scalar_lea.vmem %s3589_s0, %s2769_s16  ;;  %vm3077_vm5 = vmand %vm413_vm2, %vm414_vm3  ;;  %v420_v25 = vld [vmem:[#allocation2 + $0xc] sm:$0x1]  ;;  %v428_v28 = vld [vmem:[#allocation2 + $0x1c] sm:$0x1]  ;;  %s3347_s16 = scalar_lea.vmem [#allocation3], %s2554_s15 }
  0x1a   : > { %v269_v8 = vld [vmem:[%s3065_s19 + $0x10] sm:$0xff]  ;;  %v267_v10 = vld [vmem:[%s3065_s19] sm:$0xff]  ;;  %v268_v12 = vld [vmem:[%s3065_s19 + $0x8] sm:$0x1]  ;;  %s2406_s26 = sshll.u32 %s3347_s16, 4  ;;  %p2839_p12 = pnand %p2838_p11, %p3022_p5  ;;  %s3495_s26 = int_to_ptr.vmem [resolvable:$true] %s2406_s26 }
  0x1b   : > { %v341_v9 = vpack.c.bf16 %v269_v8, %v269_v8  ;;  %v271_v11 = vld [vmem:[%s3065_s19 + $0x20] sm:$0xff]  ;;  %v339_v13 = vpack.c.bf16 %v267_v10, %v267_v10  ;;  %v270_v14 = vld [vmem:[%s3065_s19 + $0x18] sm:$0x1]  ;;  %v340_v18 = vpack.c.bf16 %v268_v12, %v268_v12  ;;  %v436_v32 = vld [vmem:[#allocation2 + $0x2c] sm:$0x1]  ;;  %p2844_p2 = por %p2843_p1, %p2842_p0 }
  0x1c   : > { %v274_v15 = vld [vmem:[%s3065_s19 + $0x38] sm:$0x1]  ;;  %v343_v16 = vpack.c.bf16 %v271_v11, %v271_v11  ;;  %v342_v20 = vpack.c.bf16 %v270_v14, %v270_v14  ;;  %v444_v36 = vld [vmem:[#allocation2 + $0x3c] sm:$0x1]  ;;  %v452_v37 = vld [vmem:[#allocation2 + $0x4c] sm:$0x1]  ;;  %p2840_p13 = pneg %p2839_p12 }
  0x1d   : > { %419 = vst.msk [vmem:[#allocation2 + $0x8] sm:$0xf] %vm411_vm1, %v341_v9  ;;  %v278_v17 = vld [vmem:[%s3065_s19 + $0x58] sm:$0x1]  ;;  %v346_v24 = vpack.c.bf16 %v274_v15, %v274_v15  ;;  %v417_v31 = vsel %vm3077_vm5, %v340_v18, %v416_v22  ;;  %v460_v41 = vld [vmem:[#allocation2 + $0x5c] sm:$0x1] }
  0x1e   : > { %v282_v19 = vld [vmem:[%s3065_s19 + $0x78] sm:$0x1]  ;;  %412 = vst.msk [vmem:[#allocation2] sm:$0xf] %vm411_vm1, %v339_v13  ;;  %v350_v27 = vpack.c.bf16 %v278_v17, %v278_v17  ;;  %v421_v35 = vsel %vm3077_vm5, %v342_v20, %v420_v25  ;;  %v468_v42 = vld [vmem:[#allocation2 + $0x6c] sm:$0x1]  ;;  %p2845_p3 = pnand %p2844_p2, %p2840_p13 }
  0x1f   : > { %v286_v23 = vld [vmem:[%s3065_s19 + $0x98] sm:$0x1]  ;;  %423 = vst.msk [vmem:[#allocation2 + $0x10] sm:$0xf] %vm411_vm1, %v343_v16  ;;  %v354_v30 = vpack.c.bf16 %v282_v19, %v282_v19  ;;  %v429_v40 = vsel %vm3077_vm5, %v346_v24, %v428_v28  ;;  %v476_v47 = vld [vmem:[#allocation2 + $0x7c] sm:$0x1] }
  0x20   : > { %v290_v26 = vld [vmem:[%s3065_s19 + $0xb8] sm:$0x1]  ;;  %v358_v34 = vpack.c.bf16 %v286_v23, %v286_v23  ;;  %418 = vst [vmem:[#allocation2 + $0x4] sm:$0x1] %v417_v31  ;;  %v437_v46 = vsel %vm3077_vm5, %v350_v27, %v436_v32  ;;  %v484_v61 = vld [vmem:[#allocation2 + $0x8c] sm:$0x1] }
  0x21   : > { %v294_v29 = vld [vmem:[%s3065_s19 + $0xd8] sm:$0x1]  ;;  %v362_v39 = vpack.c.bf16 %v290_v26, %v290_v26  ;;  %422 = vst [vmem:[#allocation2 + $0xc] sm:$0x1] %v421_v35  ;;  %v445_v51 = vsel %vm3077_vm5, %v354_v30, %v444_v36  ;;  %v492_v4 = vld [vmem:[#allocation2 + $0x9c] sm:$0x1] }
  0x22   : > { %v298_v33 = vld [vmem:[%s3065_s19 + $0xf8] sm:$0x1]  ;;  %v366_v45 = vpack.c.bf16 %v294_v29, %v294_v29  ;;  %430 = vst [vmem:[#allocation2 + $0x1c] sm:$0x1] %v429_v40  ;;  %v453_v55 = vsel %vm3077_vm5, %v358_v34, %v452_v37  ;;  %v500_v9 = vld [vmem:[#allocation2 + $0xac] sm:$0x1] }
  0x23   : > { %v302_v38 = vld [vmem:[%s3065_s19 + $0x118] sm:$0x1]  ;;  %v370_v50 = vpack.c.bf16 %v298_v33, %v298_v33  ;;  %438 = vst [vmem:[#allocation2 + $0x2c] sm:$0x1] %v437_v46  ;;  %v461_v60 = vsel %vm3077_vm5, %v362_v39, %v460_v41  ;;  %v508_v10 = vld [vmem:[#allocation2 + $0xbc] sm:$0x1] }
  0x24   : > { %v578_v43 = vld [vmem:[#allocation2 + $0x8] sm:$0xf]  ;;  %v306_v44 = vld [vmem:[%s3065_s19 + $0x138] sm:$0x1]  ;;  %v374_v54 = vpack.c.bf16 %v302_v38, %v302_v38  ;;  %446 = vst [vmem:[#allocation2 + $0x3c] sm:$0x1] %v445_v51  ;;  %v469_v1 = vsel %vm3077_vm5, %v366_v45, %v468_v42 }
  0x25   : > { %2564 = vmatmul.msk.bf16.vlgmr.msra.gmra.mxu0 %vm579_vm4, %v578_v43  ;;  %v310_v48 = vld [vmem:[%s3065_s19 + $0x158] sm:$0x1]  ;;  %v576_v56 = vld [vmem:[#allocation2] sm:$0xf]  ;;  %v378_v59 = vpack.c.bf16 %v306_v44, %v306_v44  ;;  %454 = vst [vmem:[#allocation2 + $0x4c] sm:$0x1] %v453_v55  ;;  %v477_v8 = vsel %vm3077_vm5, %v370_v50, %v476_v47 }
  0x26   : > { %v314_v49 = vld [vmem:[%s3065_s19 + $0x178] sm:$0x1]  ;;  %2565 = vmatmul.msk.bf16.vlgmr.msra.gmra.mxu1 %vm579_vm4, %v576_v56  ;;  %v654_v62 = vld [vmem:[#allocation2 + $0x10] sm:$0xf]  ;;  %v382_v0 = vpack.c.bf16 %v310_v48, %v310_v48  ;;  %v336_v11 = vld [vmem:[%s3065_s19 + $0x228] sm:$0x1]  ;;  %v485_v13 = vsel %vm3077_vm5, %v374_v54, %v484_v61 }
  0x27   : > { %v318_v52 = vld [vmem:[%s3065_s19 + $0x198] sm:$0x1]  ;;  %2571 = vmatmul.msk.bf16.vlgmr.msra.gmra.mxu3 %vm579_vm4, %v654_v62  ;;  %v386_v6 = vpack.c.bf16 %v314_v49, %v314_v49  ;;  %462 = vst [vmem:[#allocation2 + $0x5c] sm:$0x1] %v461_v60  ;;  %v516_v14 = vld [vmem:[#allocation2 + $0xcc] sm:$0x1]  ;;  %v493_v18 = vsel %vm3077_vm5, %v378_v59, %v492_v4  ;;  %v408_v40 = vpack.c.bf16 %v336_v11, %v336_v11 }
  0x28   : > { %v3104_v53 = vld [vmem:[%s3065_s19 + $0x1b8] sm:$0x1]  ;;  %v390_v12 = vpack.c.bf16 %v318_v52, %v318_v52  ;;  %v524_v15 = vld [vmem:[#allocation2 + $0xdc] sm:$0x1]  ;;  %470 = vst [vmem:[#allocation2 + $0x6c] sm:$0x1] %v469_v1  ;;  %v501_v25 = vsel %vm3077_vm5, %v382_v0, %v500_v9 }
  0x29   : > { %v3109_v57 = vld [vmem:[%s3065_s19 + $0x1d8] sm:$0x1]  ;;  %v394_v17 = vpack.c.bf16 %v3104_v53, %v3104_v53  ;;  %v532_v19 = vld [vmem:[#allocation2 + $0xec] sm:$0x1]  ;;  %v2568_v20 = vld [vmem:[#allocation2] sm:$0xf]  ;;  %v509_v31 = vsel %vm3077_vm5, %v386_v6, %v508_v10 }
  0x2a   : > { %v3112_v58 = vld [vmem:[%s3065_s19 + $0x1f8] sm:$0x1]  ;;  %v2744_v22 = vld [vmem:[#allocation2] sm:$0x10]  ;;  %v398_v23 = vpack.c.bf16 %v3109_v57, %v3109_v57  ;;  %478 = vst [vmem:[#allocation2 + $0x7c] sm:$0x1] %v477_v8  ;;  %v517_v36 = vsel %vm3077_vm5, %v390_v12, %v516_v14 }
  0x2b   : > { %v3118_v63 = vld [vmem:[%s3065_s19 + $0x218] sm:$0x1]  ;;  %v402_v24 = vpack.c.bf16 %v3112_v58, %v3112_v58  ;;  %v540_v26 = vld [vmem:[#allocation2 + $0xfc] sm:$0x1]  ;;  %v2569_v27 = vor.u32 %v2744_v22, %v2568_v20  ;;  %v2561_v28 = vld [vmem:[%s3590_s1 + $0xc] sm:$0x3]  ;;  %v525_v41 = vsel %vm3077_vm5, %v394_v17, %v524_v15 }
  0x2c   : > { %v338_v16 = vld [vmem:[%s3065_s19 + $0x238] sm:$0x1]  ;;  %v2559_v29 = vld [vmem:[%s3590_s1 + $0x8] sm:$0x3]  ;;  %v406_v30 = vpack.c.bf16 %v3118_v63, %v3118_v63  ;;  %486 = vst [vmem:[#allocation2 + $0x8c] sm:$0x1] %v485_v13  ;;  %v533_v45 = vsel %vm3077_vm5, %v398_v23, %v532_v19 }
  0x2d   : > { %v548_v32 = vld [vmem:[#allocation2 + $0x10c] sm:$0x1]  ;;  %v3150_v33 = vsel %vm583_vm0, %v2561_v28, 0  ;;  %v3153_v34 = vsel %vm583_vm0, %v2559_v29, 0  ;;  %v2562_v35 = vld [vmem:[%s3590_s1 + $0xe] sm:$0x3]  ;;  %v410_v44 = vpack.c.bf16 %v338_v16, %v338_v16  ;;  %v541_v49 = vsel %vm3077_vm5, %v402_v24, %v540_v26 }
  0x2e   : > { %494 = vst [vmem:[#allocation2 + $0x9c] sm:$0x1] %v493_v18  ;;  %v627_v37 = vshrl.u32 %v2569_v27, 16  ;;  %v629_v38 = vshll.u32 %v2569_v27, 16  ;;  %746 = vmatpush.bf16.msrb.mxu2 %v3150_v33  ;;  %690 = vmatpush.bf16.msrb.mxu0 %v3153_v34  ;;  %v3163_v39 = vsel %vm583_vm0, %v2562_v35, 0  ;;  %v273_v51 = vld [vmem:[%s3065_s19 + $0x30] sm:$0xff]  ;;  %v549_v52 = vsel %vm3077_vm5, %v406_v30, %v548_v32 }
  0x2f   : > { %502 = vst [vmem:[#allocation2 + $0xac] sm:$0x1] %v501_v25  ;;  %768 = vmatpush.bf16.msrb.mxu3 %v3163_v39  ;;  %v2560_v42 = vld [vmem:[%s3590_s1 + $0xa] sm:$0x3]  ;;  %v272_v43 = vld [vmem:[%s3065_s19 + $0x28] sm:$0x1]  ;;  %v345_v62 = vpack.c.bf16 %v273_v51, %v273_v51 }
  0x30   : > { %510 = vst [vmem:[#allocation2 + $0xbc] sm:$0x1] %v509_v31  ;;  %v552_v46 = vld [vmem:[#allocation2 + $0x114] sm:$0x1]  ;;  %v631_v47 = vrot.slane %v629_v38, 1  ;;  %v3175_v48 = vsel %vm583_vm0, %v2560_v42, 0  ;;  %v344_v54 = vpack.c.bf16 %v272_v43, %v272_v43 }
  0x31   : > { %518 = vst [vmem:[#allocation2 + $0xcc] sm:$0x1] %v517_v36  ;;  %v556_v50 = vld [vmem:[#allocation2 + $0x11c] sm:$0x1]  ;;  %724 = vmatpush.bf16.msrb.mxu1 %v3175_v48  ;;  %v2563_v55 = vld [vmem:[%s3590_s1 + $0x10] sm:$0x3]  ;;  %v553_v57 = vsel %vm3077_vm5, %v408_v40, %v552_v46 }
  0x32   : > { %526 = vst [vmem:[#allocation2 + $0xdc] sm:$0x1] %v525_v41  ;;  %v632_v53 = vor.u32 %v631_v47, %v627_v37  ;;  %v276_v56 = vld [vmem:[%s3065_s19 + $0x48] sm:$0x1]  ;;  %v424_v58 = vld [vmem:[#allocation2 + $0x14] sm:$0x1]  ;;  %v557_v61 = vsel %vm3077_vm5, %v410_v44, %v556_v50 }
  0x33   : > { %886 = vmatpush.bf16.msra.mxu3 %v3059_v7  ;;  %534 = vst [vmem:[#allocation2 + $0xec] sm:$0x1] %v533_v45  ;;  %v277_v59 = vld [vmem:[%s3065_s19 + $0x50] sm:$0xff]  ;;  %v3192_v60 = vsel %vm583_vm0, %v2563_v55, 0  ;;  %v275_v63 = vld [vmem:[%s3065_s19 + $0x40] sm:$0xff]  ;;  %v348_v0 = vpack.c.bf16 %v276_v56, %v276_v56  ;;  %v425_v1 = vsel %vm3077_vm5, %v344_v54, %v424_v58 }
  0x34   : > { %542 = vst [vmem:[#allocation2 + $0xfc] sm:$0x1] %v541_v49  ;;  %2570 = vmatmul.msk.bf16.vlgmr.msra.gmra.mxu2 %vm579_vm4, %v632_v53  ;;  %802 = vmatpush.bf16.msra.mxu0 %v3192_v60  ;;  %v349_v4 = vpack.c.bf16 %v277_v59, %v277_v59  ;;  %v432_v6 = vld [vmem:[#allocation2 + $0x24] sm:$0x1]  ;;  %v347_v8 = vpack.c.bf16 %v275_v63, %v275_v63  ;;  %v280_v12 = vld [vmem:[%s3065_s19 + $0x68] sm:$0x1] }
  0x35   : > { %840 = vmatpush.bf16.msra.mxu1 %v3040_v2  ;;  %550 = vst [vmem:[#allocation2 + $0x10c] sm:$0x1] %v549_v52  ;;  %856 = vmatpush.bf16.msra.mxu2 %v3043_v3  ;;  %v433_v9 = vsel %vm3077_vm5, %v348_v0, %v432_v6  ;;  %v279_v10 = vld [vmem:[%s3065_s19 + $0x60] sm:$0xff]  ;;  %v352_v13 = vpack.c.bf16 %v280_v12, %v280_v12  ;;  %v440_v14 = vld [vmem:[#allocation2 + $0x34] sm:$0x1] }
  0x36   : > { %554 = vst [vmem:[#allocation2 + $0x114] sm:$0x1] %v553_v57  ;;  %v351_v11 = vpack.c.bf16 %v279_v10, %v279_v10  ;;  %v2575_v15 = vld [vmem:[#allocation2 + $0x10] sm:$0xf]  ;;  %v283_v17 = vld [vmem:[%s3065_s19 + $0x80] sm:$0xff] }
  0x37   : > { %558 = vst [vmem:[#allocation2 + $0x11c] sm:$0x1] %v557_v61  ;;  %v281_v16 = vld [vmem:[%s3065_s19 + $0x70] sm:$0xff]  ;;  %v441_v18 = vsel %vm3077_vm5, %v352_v13, %v440_v14  ;;  %v355_v23 = vpack.c.bf16 %v283_v17, %v283_v17  ;;  %v284_v38 = vld [vmem:[%s3065_s19 + $0x88] sm:$0x1] }
  0x38   : > { %427 = vst.msk [vmem:[#allocation2 + $0x18] sm:$0xf] %vm411_vm1, %v345_v62  ;;  %v353_v20 = vpack.c.bf16 %v281_v16, %v281_v16  ;;  %v356_v43 = vpack.c.bf16 %v284_v38, %v284_v38  ;;  %v448_v44 = vld [vmem:[#allocation2 + $0x44] sm:$0x1]  ;;  %v285_v47 = vld [vmem:[%s3065_s19 + $0x90] sm:$0xff] }
  0x39   : > { %426 = vst [vmem:[#allocation2 + $0x14] sm:$0x1] %v425_v1  ;;  %v357_v52 = vpack.c.bf16 %v285_v47, %v285_v47  ;;  %v288_v59 = vld [vmem:[%s3065_s19 + $0xa8] sm:$0x1]  ;;  %v287_v62 = vld [vmem:[%s3065_s19 + $0xa0] sm:$0xff]  ;;  %v289_v13 = vld [vmem:[%s3065_s19 + $0xb0] sm:$0xff] }
  0x3a   : > { %435 = vst.msk [vmem:[#allocation2 + $0x28] sm:$0xf] %vm411_vm1, %v349_v4  ;;  %v449_v49 = vsel %vm3077_vm5, %v356_v43, %v448_v44  ;;  %v360_v63 = vpack.c.bf16 %v288_v59, %v288_v59  ;;  %v359_v0 = vpack.c.bf16 %v287_v62, %v287_v62  ;;  %v456_v1 = vld [vmem:[#allocation2 + $0x54] sm:$0x1]  ;;  %v361_v16 = vpack.c.bf16 %v289_v13, %v289_v13 }
  0x3b   : > { %431 = vst.msk [vmem:[#allocation2 + $0x20] sm:$0xf] %vm411_vm1, %v347_v8 }
  0x3c   : > { %434 = vst [vmem:[#allocation2 + $0x24] sm:$0x1] %v433_v9  ;;  %v457_v6 = vsel %vm3077_vm5, %v360_v63, %v456_v1  ;;  %v300_v1 = vld [vmem:[%s3065_s19 + $0x108] sm:$0x1] }
  0x3d   : > { %439 = vst.msk [vmem:[#allocation2 + $0x30] sm:$0xf] %vm411_vm1, %v351_v11 }
  0x3e   : > { %442 = vst [vmem:[#allocation2 + $0x34] sm:$0x1] %v441_v18 }
  0x3f   : > { %v676_v19 = vld [vmem:[#allocation2 + $0x18] sm:$0xf]  ;;  %443 = vst.msk [vmem:[#allocation2 + $0x38] sm:$0xf] %vm411_vm1, %v353_v20 }
  0x40   : > { %2572 = vmatmul.msk.bf16.vlgmr.msrb.gmra.mxu0 %vm579_vm4, %v676_v19  ;;  %v2745_v22 = vld [vmem:[#allocation2 + $0x10] sm:$0x10]  ;;  %447 = vst.msk [vmem:[#allocation2 + $0x40] sm:$0xf] %vm411_vm1, %v355_v23  ;;  %v291_v19 = vld [vmem:[%s3065_s19 + $0xc0] sm:$0xff] }
  0x41   : > { %v2576_v24 = vor.u32 %v2745_v22, %v2575_v15  ;;  %v754_v25 = vld [vmem:[#allocation2 + $0x28] sm:$0xf]  ;;  %905 = vmatpush.bf16.msrb.mxu0 %v3051_v5  ;;  %450 = vst [vmem:[#allocation2 + $0x44] sm:$0x1] %v449_v49  ;;  %v363_v20 = vpack.c.bf16 %v291_v19, %v291_v19  ;;  %v301_v19 = vld [vmem:[%s3065_s19 + $0x110] sm:$0xff] }
  0x42   : > { %2579 = vmatmul.msk.bf16.vlgmr.msrb.gmra.mxu3 %vm579_vm4, %v754_v25  ;;  %v732_v26 = vld [vmem:[#allocation2 + $0x20] sm:$0xf]  ;;  %451 = vst.msk [vmem:[#allocation2 + $0x48] sm:$0xf] %vm411_vm1, %v357_v52  ;;  %v829_v61 = vld [vmem:[#allocation2 + $0x28] sm:$0xf] }
  0x43   : > { %v2582_v27 = vld [vmem:[#allocation2 + $0x20] sm:$0xf]  ;;  %v705_v29 = vshrl.u32 %v2576_v24, 16  ;;  %v707_v30 = vshll.u32 %v2576_v24, 16  ;;  %v2746_v31 = vld [vmem:[#allocation2 + $0x20] sm:$0x10]  ;;  %974 = vmatpush.bf16.msrb.mxu3 %v3150_v33 }
  0x44   : > { %v2589_v28 = vld [vmem:[#allocation2 + $0x20] sm:$0xf]  ;;  %v2747_v32 = vld [vmem:[#allocation2 + $0x20] sm:$0x10]  ;;  %2578 = vmatmul.msk.bf16.vlgmr.msrb.gmra.mxu2 %vm579_vm4, %v732_v26  ;;  %v2583_v35 = vor.u32 %v2746_v31, %v2582_v27  ;;  %v2596_v56 = vld [vmem:[#allocation2 + $0x30] sm:$0xf] }
  0x45   : > { %v2590_v36 = vor.u32 %v2747_v32, %v2589_v28  ;;  %v709_v37 = vrot.slane %v707_v30, 1  ;;  %955 = vmatpush.bf16.msrb.mxu2 %v3175_v48  ;;  %v828_v55 = vld [vmem:[#allocation2 + $0x20] sm:$0xf]  ;;  %v2748_v57 = vld [vmem:[#allocation2 + $0x30] sm:$0x10] }
  0x46   : > { %v785_v40 = vshll.u32 %v2583_v35, 16  ;;  %v783_v45 = vshrl.u32 %v2583_v35, 16  ;;  %v2597_v58 = vor.u32 %v2748_v57, %v2596_v56  ;;  %455 = vst.msk [vmem:[#allocation2 + $0x50] sm:$0xf] %vm411_vm1, %v359_v0  ;;  %v894_v10 = vld [vmem:[#allocation2 + $0x30] sm:$0xf] }
  0x47   : > { %v872_v41 = vshll.u32 %v2590_v36, 16  ;;  %v710_v42 = vor.u32 %v709_v37, %v705_v29  ;;  %v870_v50 = vshrl.u32 %v2590_v36, 16  ;;  %458 = vst [vmem:[#allocation2 + $0x54] sm:$0x1] %v457_v6  ;;  %v963_v11 = vld [vmem:[#allocation2 + $0x40] sm:$0xf] }
  0x48   : > { %v787_v46 = vrot.slane %v785_v40, 1  ;;  %v941_v4 = vshll.u32 %v2597_v58, 16  ;;  %v939_v8 = vshrl.u32 %v2597_v58, 16  ;;  %v2603_v14 = vld [vmem:[#allocation2 + $0x40] sm:$0xf]  ;;  %v293_v30 = vld [vmem:[%s3065_s19 + $0xd0] sm:$0xff] }
  0x49   : > { %2577 = vmatmul.msk.bf16.vlgmr.msrb.gmra.mxu1 %vm579_vm4, %v710_v42  ;;  %v874_v51 = vrot.slane %v872_v41, 1  ;;  %v2749_v15 = vld [vmem:[#allocation2 + $0x40] sm:$0x10]  ;;  %v913_v17 = vld [vmem:[#allocation2 + $0x38] sm:$0xf]  ;;  %v365_v36 = vpack.c.bf16 %v293_v30, %v293_v30 }
  0x4a   : > { %924 = vmatpush.bf16.msrb.mxu1 %v3153_v34  ;;  %v788_v53 = vor.u32 %v787_v46, %v783_v45  ;;  %v943_v9 = vrot.slane %v941_v4, 1  ;;  %459 = vst.msk [vmem:[#allocation2 + $0x58] sm:$0xf] %vm411_vm1, %v361_v16  ;;  %v2604_v18 = vor.u32 %v2749_v15, %v2603_v14  ;;  %v292_v22 = vld [vmem:[%s3065_s19 + $0xc8] sm:$0x1]  ;;  %v303_v30 = vld [vmem:[%s3065_s19 + $0x120] sm:$0xff] }
  0x4b   : > { %v875_v54 = vor.u32 %v874_v51, %v870_v50  ;;  %v982_v23 = vld [vmem:[#allocation2 + $0x48] sm:$0xf]  ;;  %463 = vst.msk [vmem:[#allocation2 + $0x60] sm:$0xf] %vm411_vm1, %v363_v20  ;;  %v364_v25 = vpack.c.bf16 %v292_v22, %v292_v22  ;;  %v2611_v26 = vld [vmem:[#allocation2 + $0x40] sm:$0xf]  ;;  %v373_v20 = vpack.c.bf16 %v301_v19, %v301_v19 }
  0x4c   : > { %v944_v12 = vor.u32 %v943_v9, %v939_v8  ;;  %v1010_v24 = vshll.u32 %v2604_v18, 16  ;;  %v2750_v27 = vld [vmem:[#allocation2 + $0x40] sm:$0x10]  ;;  %v1050_v29 = vld [vmem:[#allocation2 + $0x40] sm:$0xf]  ;;  %v1008_v38 = vshrl.u32 %v2604_v18, 16  ;;  %v372_v9 = vpack.c.bf16 %v300_v1, %v300_v1 }
  0x4d   : > { %v464_v28 = vld [vmem:[#allocation2 + $0x64] sm:$0x1]  ;;  %v2618_v32 = vld [vmem:[#allocation2 + $0x50] sm:$0xf]  ;;  %v2612_v37 = vor.u32 %v2750_v27, %v2611_v26  ;;  %v1051_v41 = vld [vmem:[#allocation2 + $0x48] sm:$0xf] }
  0x4e   : > { %v465_v31 = vsel %vm3077_vm5, %v364_v25, %v464_v28  ;;  %v2751_v35 = vld [vmem:[#allocation2 + $0x50] sm:$0x10]  ;;  %v1012_v40 = vrot.slane %v1010_v24, 1  ;;  %467 = vst.msk [vmem:[#allocation2 + $0x68] sm:$0xf] %vm411_vm1, %v365_v36  ;;  %v299_v8 = vld [vmem:[%s3065_s19 + $0x100] sm:$0xff]  ;;  %v375_v36 = vpack.c.bf16 %v303_v30, %v303_v30 }
  0x4f   : > { %466 = vst [vmem:[#allocation2 + $0x64] sm:$0x1] %v465_v31  ;;  %v2619_v42 = vor.u32 %v2751_v35, %v2618_v32  ;;  %v1094_v43 = vshll.u32 %v2612_v37, 16  ;;  %v1092_v46 = vshrl.u32 %v2612_v37, 16  ;;  %v296_v58 = vld [vmem:[%s3065_s19 + $0xe8] sm:$0x1] }
  0x50   : > { %2584 = vmatmul.msk.bf16.vlgmr.msra.gmra.mxu0 %vm579_vm4, %v788_v53  ;;  %v1013_v44 = vor.u32 %v1012_v40, %v1008_v38  ;;  %v297_v53 = vld [vmem:[%s3065_s19 + $0xf0] sm:$0xff]  ;;  %v368_v62 = vpack.c.bf16 %v296_v58, %v296_v58  ;;  %483 = vst.msk [vmem:[#allocation2 + $0x88] sm:$0xf] %vm411_vm1, %v373_v20 }
  0x51   : > { %993 = vmatpush.bf16.msra.mxu0 %v3163_v39  ;;  %v1163_v45 = vshll.u32 %v2619_v42, 16  ;;  %v1096_v47 = vrot.slane %v1094_v43, 1  ;;  %v1161_v49 = vshrl.u32 %v2619_v42, 16  ;;  %v472_v0 = vld [vmem:[#allocation2 + $0x74] sm:$0x1] }
  0x52   : > { %2591 = vmatmul.msk.bf16.vlgmr.msra.gmra.mxu3 %vm579_vm4, %v875_v54  ;;  %v369_v54 = vpack.c.bf16 %v297_v53, %v297_v53  ;;  %v2625_v56 = vld [vmem:[#allocation2 + $0x60] sm:$0xf]  ;;  %v1116_v4 = vld [vmem:[#allocation2 + $0x50] sm:$0xf]  ;;  %v473_v6 = vsel %vm3077_vm5, %v368_v62, %v472_v0  ;;  %487 = vst.msk [vmem:[#allocation2 + $0x90] sm:$0xf] %vm411_vm1, %v375_v36 }
  0x53   : > { %1078 = vmatpush.bf16.msra.mxu3 %v3043_v3  ;;  %v1165_v50 = vrot.slane %v1163_v45, 1  ;;  %v1097_v51 = vor.u32 %v1096_v47, %v1092_v46  ;;  %474 = vst [vmem:[#allocation2 + $0x74] sm:$0x1] %v473_v6  ;;  %v1185_v16 = vld [vmem:[#allocation2 + $0x60] sm:$0xf]  ;;  %v309_v1 = vld [vmem:[%s3065_s19 + $0x150] sm:$0xff] }
  0x54   : > { %2586 = vmatmul.msk.bf16.vlgmr.msra.gmra.mxu2 %vm579_vm4, %v828_v55  ;;  %v1135_v55 = vld [vmem:[#allocation2 + $0x58] sm:$0xf]  ;;  %475 = vst.msk [vmem:[#allocation2 + $0x78] sm:$0xf] %vm411_vm1, %v369_v54  ;;  %v1272_v26 = vld [vmem:[#allocation2 + $0x60] sm:$0xf] }
  0x55   : > { %1062 = vmatpush.bf16.msra.mxu2 %v3040_v2  ;;  %v1166_v52 = vor.u32 %v1165_v50, %v1161_v49  ;;  %v1204_v22 = vld [vmem:[#allocation2 + $0x68] sm:$0xf] }
  0x56   : > { %v2752_v57 = vld [vmem:[#allocation2 + $0x60] sm:$0x10]  ;;  %v304_v47 = vld [vmem:[%s3065_s19 + $0x128] sm:$0x1] }
  0x57   : > { %v2626_v59 = vor.u32 %v2752_v57, %v2625_v56  ;;  %v2753_v24 = vld [vmem:[#allocation2 + $0x60] sm:$0x10]  ;;  %v376_v50 = vpack.c.bf16 %v304_v47, %v304_v47  ;;  %v1426_v6 = vld [vmem:[#allocation2 + $0x88] sm:$0xf] }
  0x58   : > { %v312_v47 = vld [vmem:[%s3065_s19 + $0x168] sm:$0x1] }
  0x59   : > { %2585 = vmatmul.msk.bf16.vlgmr.msra.gmra.mxu1 %vm579_vm4, %v829_v61  ;;  %v295_v61 = vld [vmem:[%s3065_s19 + $0xe0] sm:$0xff]  ;;  %v1230_v14 = vshrl.u32 %v2626_v59, 16 }
  0x5a   : > { %1024 = vmatpush.bf16.msra.mxu1 %v3192_v60  ;;  %v367_v63 = vpack.c.bf16 %v295_v61, %v295_v61  ;;  %v305_v61 = vld [vmem:[%s3065_s19 + $0x130] sm:$0xff] }
  0x5b   : > { %v1357_v31 = vld [vmem:[#allocation2 + $0x78] sm:$0xf] }
  0x5c   : > { %471 = vst.msk [vmem:[#allocation2 + $0x70] sm:$0xf] %vm411_vm1, %v367_v63  ;;  %v377_v63 = vpack.c.bf16 %v305_v61, %v305_v61 }
  0x5e   : > { %491 = vst.msk [vmem:[#allocation2 + $0x98] sm:$0xf] %vm411_vm1, %v377_v63  ;;  %v313_v63 = vld [vmem:[%s3065_s19 + $0x170] sm:$0xff] }
  0x60   : > { %2592 = vmatmul.msk.bf16.vlgmr.msrb.gmra.mxu0 %vm579_vm4, %v894_v10  ;;  %v371_v10 = vpack.c.bf16 %v299_v8, %v299_v8 }
  0x61   : > { %1108 = vmatpush.bf16.msrb.mxu0 %v3059_v7 }
  0x62   : > { %2599 = vmatmul.msk.bf16.vlgmr.msrb.gmra.mxu3 %vm579_vm4, %v963_v11  ;;  %v480_v11 = vld [vmem:[#allocation2 + $0x84] sm:$0x1]  ;;  %479 = vst.msk [vmem:[#allocation2 + $0x80] sm:$0xf] %vm411_vm1, %v371_v10  ;;  %v308_v10 = vld [vmem:[%s3065_s19 + $0x148] sm:$0x1] }
  0x63   : > { %1177 = vmatpush.bf16.msrb.mxu3 %v3175_v48  ;;  %v481_v13 = vsel %vm3077_vm5, %v372_v9, %v480_v11  ;;  %v2640_v28 = vld [vmem:[#allocation2 + $0x70] sm:$0xf] }
  0x64   : > { %2598 = vmatmul.msk.bf16.vlgmr.msrb.gmra.mxu2 %vm579_vm4, %v944_v12  ;;  %v1232_v12 = vshll.u32 %v2626_v59, 16  ;;  %482 = vst [vmem:[#allocation2 + $0x84] sm:$0x1] %v481_v13  ;;  %v307_v13 = vld [vmem:[%s3065_s19 + $0x140] sm:$0xff] }
  0x65   : > { %1146 = vmatpush.bf16.msrb.mxu2 %v3153_v34 }
  0x66   : > { %v1234_v15 = vrot.slane %v1232_v12, 1 }
  0x68   : > { %v1235_v18 = vor.u32 %v1234_v15, %v1230_v14  ;;  %v380_v14 = vpack.c.bf16 %v308_v10, %v308_v10  ;;  %v379_v15 = vpack.c.bf16 %v307_v13, %v307_v13 }
  0x69   : > { %2593 = vmatmul.msk.bf16.vlgmr.msrb.gmra.mxu1 %vm579_vm4, %v913_v17  ;;  %v1273_v17 = vld [vmem:[#allocation2 + $0x68] sm:$0xf]  ;;  %v2647_v32 = vld [vmem:[#allocation2 + $0x80] sm:$0xf] }
  0x6a   : > { %1127 = vmatpush.bf16.msrb.mxu1 %v3051_v5  ;;  %v2655_v8 = vld [vmem:[#allocation2 + $0x80] sm:$0xf]  ;;  %495 = vst.msk [vmem:[#allocation2 + $0xa0] sm:$0xf] %vm411_vm1, %v379_v15 }
  0x6b   : > { %v2755_v35 = vld [vmem:[#allocation2 + $0x80] sm:$0x10] }
  0x6c   : > { %v2648_v43 = vor.u32 %v2755_v35, %v2647_v32  ;;  %v2756_v9 = vld [vmem:[#allocation2 + $0x80] sm:$0x10] }
  0x6d   : > { %v2656_v12 = vor.u32 %v2756_v9, %v2655_v8  ;;  %v385_v8 = vpack.c.bf16 %v313_v63, %v313_v63 }
  0x6e   : > { %v1454_v49 = vshll.u32 %v2648_v43, 16 }
  0x6f   : > { %v1538_v20 = vshll.u32 %v2656_v12, 16  ;;  %507 = vst.msk [vmem:[#allocation2 + $0xb8] sm:$0xf] %vm411_vm1, %v385_v8 }
  0x70   : > { %2600 = vmatmul.msk.bf16.vlgmr.msra.gmra.mxu0 %vm579_vm4, %v982_v23  ;;  %v2633_v23 = vld [vmem:[#allocation2 + $0x60] sm:$0xf]  ;;  %v1456_v56 = vrot.slane %v1454_v49, 1  ;;  %v1579_v49 = vld [vmem:[#allocation2 + $0x98] sm:$0xf] }
  0x71   : > { %1196 = vmatpush.bf16.msra.mxu0 %v3150_v33  ;;  %v2634_v25 = vor.u32 %v2753_v24, %v2633_v23  ;;  %v1536_v24 = vshrl.u32 %v2656_v12, 16 }
  0x72   : > { %2608 = vmatmul.msk.bf16.vlgmr.msra.gmra.mxu3 %vm579_vm4, %v1050_v29  ;;  %v2754_v29 = vld [vmem:[#allocation2 + $0x70] sm:$0x10] }
  0x73   : > { %1284 = vmatpush.bf16.msra.mxu3 %v3040_v2  ;;  %v1316_v27 = vshll.u32 %v2634_v25, 16  ;;  %v2641_v37 = vor.u32 %v2754_v29, %v2640_v28  ;;  %v1314_v38 = vshrl.u32 %v2634_v25, 16  ;;  %v1540_v25 = vrot.slane %v1538_v20, 1  ;;  %v1560_v29 = vld [vmem:[#allocation2 + $0x90] sm:$0xf] }
  0x74   : > { %2607 = vmatmul.msk.bf16.vlgmr.msra.gmra.mxu2 %vm579_vm4, %v1051_v41  ;;  %v1338_v41 = vld [vmem:[#allocation2 + $0x70] sm:$0xf]  ;;  %v316_v20 = vld [vmem:[%s3065_s19 + $0x188] sm:$0x1] }
  0x75   : > { %1246 = vmatpush.bf16.msra.mxu2 %v3192_v60  ;;  %v1318_v40 = vrot.slane %v1316_v27, 1  ;;  %v1495_v27 = vld [vmem:[#allocation2 + $0x88] sm:$0xf] }
  0x77   : > { %v1319_v45 = vor.u32 %v1318_v40, %v1314_v38 }
  0x79   : > { %2605 = vmatmul.msk.bf16.vlgmr.msra.gmra.mxu1 %vm579_vm4, %v1013_v44  ;;  %v1385_v44 = vshll.u32 %v2641_v37, 16 }
  0x7a   : > { %1215 = vmatpush.bf16.msra.mxu1 %v3163_v39 }
  0x7b   : > { %v1387_v53 = vrot.slane %v1385_v44, 1 }
  0x80   : > { %2613 = vmatmul.msk.bf16.vlgmr.msrb.gmra.mxu0 %vm579_vm4, %v1097_v51  ;;  %v488_v51 = vld [vmem:[#allocation2 + $0x94] sm:$0x1] }
  0x81   : > { %1300 = vmatpush.bf16.msrb.mxu0 %v3043_v3  ;;  %v489_v54 = vsel %vm3077_vm5, %v376_v50, %v488_v51  ;;  %v311_v51 = vld [vmem:[%s3065_s19 + $0x160] sm:$0xff] }
  0x82   : > { %2620 = vmatmul.msk.bf16.vlgmr.msrb.gmra.mxu3 %vm579_vm4, %v1166_v52  ;;  %v1383_v52 = vshrl.u32 %v2641_v37, 16  ;;  %490 = vst [vmem:[#allocation2 + $0x94] sm:$0x1] %v489_v54  ;;  %v2662_v37 = vld [vmem:[#allocation2 + $0x90] sm:$0xf] }
  0x83   : > { %1368 = vmatpush.bf16.msrb.mxu3 %v3153_v34 }
  0x84   : > { %2615 = vmatmul.msk.bf16.vlgmr.msrb.gmra.mxu2 %vm579_vm4, %v1135_v55  ;;  %v1452_v55 = vshrl.u32 %v2648_v43, 16  ;;  %v1388_v58 = vor.u32 %v1387_v53, %v1383_v52  ;;  %v384_v52 = vpack.c.bf16 %v312_v47, %v312_v47 }
  0x85   : > { %1349 = vmatpush.bf16.msrb.mxu2 %v3051_v5 }
  0x86   : > { %v1457_v0 = vor.u32 %v1456_v56, %v1452_v55  ;;  %v2669_v55 = vld [vmem:[#allocation2 + $0xa0] sm:$0xf] }
  0x89   : > { %2614 = vmatmul.msk.bf16.vlgmr.msrb.gmra.mxu1 %vm579_vm4, %v1116_v4  ;;  %v381_v4 = vpack.c.bf16 %v309_v1, %v309_v1  ;;  %v2757_v38 = vld [vmem:[#allocation2 + $0x90] sm:$0x10] }
  0x8a   : > { %1330 = vmatpush.bf16.msrb.mxu1 %v3059_v7  ;;  %v2663_v44 = vor.u32 %v2757_v38, %v2662_v37 }
  0x8b   : > { %499 = vst.msk [vmem:[#allocation2 + $0xa8] sm:$0xf] %vm411_vm1, %v381_v4  ;;  %v2677_v4 = vld [vmem:[#allocation2 + $0xa0] sm:$0xf] }
  0x8c   : > { %v1607_v50 = vshll.u32 %v2663_v44, 16  ;;  %v1605_v12 = vshrl.u32 %v2663_v44, 16 }
  0x8e   : > { %v1609_v13 = vrot.slane %v1607_v50, 1 }
  0x90   : > { %2621 = vmatmul.msk.bf16.vlgmr.msra.gmra.mxu0 %vm579_vm4, %v1185_v16  ;;  %v496_v16 = vld [vmem:[#allocation2 + $0xa4] sm:$0x1] }
  0x91   : > { %1399 = vmatpush.bf16.msra.mxu0 %v3175_v48 }
  0x92   : > { %2629 = vmatmul.msk.bf16.vlgmr.msra.gmra.mxu3 %vm579_vm4, %v1273_v17  ;;  %v1407_v17 = vld [vmem:[#allocation2 + $0x80] sm:$0xf] }
  0x93   : > { %1468 = vmatpush.bf16.msra.mxu3 %v3192_v60 }
  0x94   : > { %2627 = vmatmul.msk.bf16.vlgmr.msra.gmra.mxu2 %vm579_vm4, %v1235_v18  ;;  %v497_v18 = vsel %vm3077_vm5, %v380_v14, %v496_v16  ;;  %v1629_v14 = vld [vmem:[#allocation2 + $0xa0] sm:$0xf] }
  0x95   : > { %1437 = vmatpush.bf16.msra.mxu2 %v3163_v39  ;;  %498 = vst [vmem:[#allocation2 + $0xa4] sm:$0x1] %v497_v18 }
  0x99   : > { %2622 = vmatmul.msk.bf16.vlgmr.msra.gmra.mxu1 %vm579_vm4, %v1204_v22 }
  0x9a   : > { %1418 = vmatpush.bf16.msra.mxu1 %v3150_v33 }
  0x9c   : > { %v2758_v56 = vld [vmem:[#allocation2 + $0xa0] sm:$0x10] }
  0x9d   : > { %v2670_v10 = vor.u32 %v2758_v56, %v2669_v55  ;;  %v1717_v55 = vld [vmem:[#allocation2 + $0xa8] sm:$0xf]  ;;  %v319_v56 = vld [vmem:[%s3065_s19 + $0x1a0] sm:$0xff] }
  0x9f   : > { %v1676_v16 = vshll.u32 %v2670_v10, 16 }
  0xa0   : > { %2630 = vmatmul.msk.bf16.vlgmr.msrb.gmra.mxu0 %vm579_vm4, %v1272_v26 }
  0xa1   : > { %1506 = vmatpush.bf16.msrb.mxu0 %v3040_v2 }
  0xa2   : > { %2637 = vmatmul.msk.bf16.vlgmr.msrb.gmra.mxu3 %vm579_vm4, %v1357_v31  ;;  %v596_v42 = vpop.f32.mrf.mxu0  ;;  %v1541_v31 = vor.u32 %v1540_v25, %v1536_v24  ;;  %v388_v24 = vpack.c.bf16 %v316_v20, %v316_v20 }
  0xa3   : > { %1571 = vmatpush.bf16.msrb.mxu3 %v3051_v5  ;;  %v615_v46 = vpop.f32.mrf.mxu1 }
  0xa4   : > { %2636 = vmatmul.msk.bf16.vlgmr.msrb.gmra.mxu2 %vm579_vm4, %v1338_v41  ;;  %v616_v22 = vadd.f32 %v615_v46, %v596_v42  ;;  %v1494_v41 = vld [vmem:[#allocation2 + $0x80] sm:$0xf] }
  0xa5   : > { %1552 = vmatpush.bf16.msrb.mxu2 %v3059_v7 }
  0xa9   : > { %2635 = vmatmul.msk.bf16.vlgmr.msrb.gmra.mxu1 %vm579_vm4, %v1319_v45 }
  0xaa   : > { %v598_v57 = vpop.f32.mrf.mxu0  ;;  %1522 = vmatpush.bf16.msrb.mxu1 %v3043_v3  ;;  %v670_v59 = vpop.f32.mrf.mxu3 }
  0xab   : > { %v617_v62 = vpop.f32.mrf.mxu1  ;;  %v383_v57 = vpack.c.bf16 %v311_v51, %v311_v51 }
  0xac   : > { %v1648_v62 = vld [vmem:[#allocation2 + $0xa8] sm:$0xf] }
  0xad   : > { %503 = vst.msk [vmem:[#allocation2 + $0xb0] sm:$0xf] %vm411_vm1, %v383_v57 }
  0xb0   : > { %2642 = vmatmul.msk.bf16.vlgmr.msra.gmra.mxu0 %vm579_vm4, %v1388_v58  ;;  %v504_v58 = vld [vmem:[#allocation2 + $0xb4] sm:$0x1] }
  0xb1   : > { %1590 = vmatpush.bf16.msra.mxu0 %v3153_v34 }
  0xb2   : > { %2649 = vmatmul.msk.bf16.vlgmr.msra.gmra.mxu3 %vm579_vm4, %v1457_v0  ;;  %v672_v11 = vpop.f32.mrf.mxu3  ;;  %v315_v0 = vld [vmem:[%s3065_s19 + $0x180] sm:$0xff] }
  0xb3   : > { %1659 = vmatpush.bf16.msra.mxu3 %v3163_v39  ;;  %v387_v9 = vpack.c.bf16 %v315_v0, %v315_v0  ;;  %v505_v11 = vsel %vm3077_vm5, %v384_v52, %v504_v58 }
  0xb4   : > { %2644 = vmatmul.msk.bf16.vlgmr.msra.gmra.mxu2 %vm579_vm4, %v1426_v6  ;;  %v2759_v6 = vld [vmem:[#allocation2 + $0xa0] sm:$0x10]  ;;  %506 = vst [vmem:[#allocation2 + $0xb4] sm:$0x1] %v505_v11 }
  0xb5   : > { %1640 = vmatpush.bf16.msra.mxu2 %v3150_v33  ;;  %v2678_v15 = vor.u32 %v2759_v6, %v2677_v4  ;;  %511 = vst.msk [vmem:[#allocation2 + $0xc0] sm:$0xf] %vm411_vm1, %v387_v9 }
  0xb7   : > { %v648_v19 = vpop.f32.mrf.mxu2 }
  0xb8   : > { %v652_v23 = vadd.f32 %v648_v19, %v616_v22 }
  0xb9   : > { %2643 = vmatmul.msk.bf16.vlgmr.msra.gmra.mxu1 %vm579_vm4, %v1407_v17  ;;  %v1610_v17 = vor.u32 %v1609_v13, %v1605_v12  ;;  %v1782_v13 = vld [vmem:[#allocation2 + $0xb0] sm:$0xf] }
  0xba   : > { %1621 = vmatpush.bf16.msra.mxu1 %v3175_v48  ;;  %v674_v28 = vadd.f32 %v670_v59, %v652_v23  ;;  %v1760_v23 = vshll.u32 %v2678_v15, 16 }
  0xbb   : > { %v2760_v47 = vld [vmem:[#allocation2 + $0xb0] sm:$0x10] }
  0xbd   : > { %v692_v26 = vpop.f32.mrf.mxu0 }
  0xbe   : > { %v696_v32 = vadd.f32 %v692_v26, %v674_v28  ;;  %v512_v26 = vld [vmem:[#allocation2 + $0xc4] sm:$0x1]  ;;  %v1678_v28 = vrot.slane %v1676_v16, 1 }
  0xbf   : > { %v650_v30 = vpop.f32.mrf.mxu2 }
  0xc0   : > { %2651 = vmatmul.msk.bf16.vlgmr.msrb.gmra.mxu0 %vm579_vm4, %v1495_v27  ;;  %v1674_v27 = vshrl.u32 %v2670_v10, 16  ;;  %v1758_v30 = vshrl.u32 %v2678_v15, 16 }
  0xc1   : > { %1690 = vmatpush.bf16.msrb.mxu0 %v3192_v60 }
  0xc2   : > { %2658 = vmatmul.msk.bf16.vlgmr.msrb.gmra.mxu3 %vm579_vm4, %v1560_v29  ;;  %v513_v29 = vsel %vm3077_vm5, %v388_v24, %v512_v26  ;;  %v321_v24 = vld [vmem:[%s3065_s19 + $0x1b0] sm:$0xff] }
  0xc3   : > { %1774 = vmatpush.bf16.msrb.mxu3 %v3059_v7  ;;  %514 = vst [vmem:[#allocation2 + $0xc4] sm:$0x1] %v513_v29  ;;  %v393_v29 = vpack.c.bf16 %v321_v24, %v321_v24 }
  0xc4   : > { %2657 = vmatmul.msk.bf16.vlgmr.msrb.gmra.mxu2 %vm579_vm4, %v1541_v31  ;;  %v1762_v31 = vrot.slane %v1760_v23, 1 }
  0xc5   : > { %v694_v35 = vpop.f32.mrf.mxu0  ;;  %v770_v36 = vpop.f32.mrf.mxu3  ;;  %1744 = vmatpush.bf16.msrb.mxu2 %v3043_v3  ;;  %523 = vst.msk [vmem:[#allocation2 + $0xd8] sm:$0xf] %vm411_vm1, %v393_v29 }
  0xc6   : > { %v726_v40 = vpop.f32.mrf.mxu1  ;;  %v317_v35 = vld [vmem:[%s3065_s19 + $0x190] sm:$0xff] }
  0xc7   : > { %v730_v42 = vadd.f32 %v726_v40, %v696_v32  ;;  %v748_v43 = vpop.f32.mrf.mxu2  ;;  %v1679_v32 = vor.u32 %v1678_v28, %v1674_v27  ;;  %v389_v40 = vpack.c.bf16 %v317_v35, %v317_v35  ;;  %v2691_v27 = vld [vmem:[#allocation2 + $0xc0] sm:$0xf] }
  0xc9   : > { %2652 = vmatmul.msk.bf16.vlgmr.msrb.gmra.mxu1 %vm579_vm4, %v1494_v41  ;;  %v752_v45 = vadd.f32 %v748_v43, %v730_v42  ;;  %v1763_v42 = vor.u32 %v1762_v31, %v1758_v30  ;;  %515 = vst.msk [vmem:[#allocation2 + $0xc8] sm:$0xf] %vm411_vm1, %v389_v40 }
  0xca   : > { %1728 = vmatpush.bf16.msrb.mxu1 %v3040_v2  ;;  %v2761_v28 = vld [vmem:[#allocation2 + $0xc0] sm:$0x10] }
  0xcb   : > { %v774_v46 = vadd.f32 %v770_v36, %v752_v45  ;;  %v1716_v45 = vld [vmem:[#allocation2 + $0xa0] sm:$0xf] }
  0xcd   : > { %v772_v53 = vpop.f32.mrf.mxu3  ;;  %v804_v54 = vpop.f32.mrf.mxu0 }
  0xce   : > { %v728_v59 = vpop.f32.mrf.mxu1  ;;  %v3342_v61 = vadd.f32 %v804_v54, %v774_v46  ;;  %v2684_v46 = vld [vmem:[#allocation2 + $0xb0] sm:$0xf]  ;;  %v320_v53 = vld [vmem:[%s3065_s19 + $0x1a8] sm:$0x1] }
  0xcf   : > { %v750_v1 = vpop.f32.mrf.mxu2  ;;  %v392_v57 = vpack.c.bf16 %v320_v53, %v320_v53  ;;  %v391_v59 = vpack.c.bf16 %v319_v56, %v319_v56  ;;  %v2699_v56 = vld [vmem:[#allocation2 + $0xc0] sm:$0xf] }
  0xd0   : > { %810 = vst.msk [vmem:[%s3347_s16] sm:$0xff] %vm809_vm6, %v3342_v61  ;;  %2659 = vmatmul.msk.bf16.vlgmr.msra.gmra.mxu0 %vm579_vm4, %v1579_v49  ;;  %v2685_v49 = vor.u32 %v2760_v47, %v2684_v46  ;;  %v819_v4 = vmul.f32 %v3342_v61, %v3342_v61  ;;  %v811_v8 = vsel %vm809_vm6, %v3342_v61, 0.0  ;;  %v324_v46 = vld [vmem:[%s3065_s19 + $0x1c8] sm:$0x1] }
  0xd1   : > { %1793 = vmatpush.bf16.msra.mxu0 %v3051_v5  ;;  %519 = vst.msk [vmem:[#allocation2 + $0xd0] sm:$0xf] %vm411_vm1, %v391_v59  ;;  %v812_v15 = vrot.slane %v811_v8, 4  ;;  %v396_v53 = vpack.c.bf16 %v324_v46, %v324_v46  ;;  %v528_v59 = vld [vmem:[#allocation2 + $0xe4] sm:$0x1] }
  0xd2   : > { %2666 = vmatmul.msk.bf16.vlgmr.msra.gmra.mxu3 %vm579_vm4, %v1648_v62  ;;  %v520_v62 = vld [vmem:[#allocation2 + $0xd4] sm:$0x1]  ;;  %v1829_v63 = vshll.u32 %v2685_v49, 16  ;;  %v1827_v9 = vshrl.u32 %v2685_v49, 16  ;;  %v820_v16 = vsel %vm809_vm6, %v819_v4, 0.0 }
  0xd3   : > { %1862 = vmatpush.bf16.msra.mxu3 %v3150_v33  ;;  %v521_v0 = vsel %vm3077_vm5, %v392_v57, %v520_v62  ;;  %v813_v61 = vadd.f32 %v812_v15, %v811_v8  ;;  %v2762_v57 = vld [vmem:[#allocation2 + $0xc0] sm:$0x10]  ;;  %v1938_v4 = vld [vmem:[#allocation2 + $0xc0] sm:$0xf]  ;;  %v529_v8 = vsel %vm3077_vm5, %v396_v53, %v528_v59 }
  0xd4   : > { %2665 = vmatmul.msk.bf16.vlgmr.msra.gmra.mxu2 %vm579_vm4, %v1629_v14  ;;  %522 = vst [vmem:[#allocation2 + $0xd4] sm:$0x1] %v521_v0  ;;  %v1831_v10 = vrot.slane %v1829_v63, 1 }
  0xd5   : > { %v806_v18 = vpop.f32.mrf.mxu0  ;;  %v888_v19 = vpop.f32.mrf.mxu3  ;;  %1843 = vmatpush.bf16.msra.mxu2 %v3175_v48  ;;  %v814_v35 = vrot.slane %v813_v61, 2  ;;  %530 = vst [vmem:[#allocation2 + $0xe4] sm:$0x1] %v529_v8 }
  0xd6   : > { %v842_v22 = vpop.f32.mrf.mxu1  ;;  %v1851_v18 = vld [vmem:[#allocation2 + $0xc0] sm:$0xf]  ;;  %v1832_v20 = vor.u32 %v1831_v10, %v1827_v9 }
  0xd7   : > { %v858_v25 = vpop.f32.mrf.mxu2 }
  0xd8   : > { %v859_v36 = vadd.f32 %v858_v25, %v842_v22  ;;  %v821_v22 = vrot.slane %v820_v16, 4  ;;  %v2706_v10 = vld [vmem:[#allocation2 + $0xd0] sm:$0xf] }
  0xd9   : > { %2664 = vmatmul.msk.bf16.vlgmr.msra.gmra.mxu1 %vm579_vm4, %v1610_v17 }
  0xda   : > { %1812 = vmatpush.bf16.msra.mxu1 %v3153_v34  ;;  %v892_v44 = vadd.f32 %v888_v19, %v859_v36  ;;  %v822_v30 = vadd.f32 %v821_v22, %v820_v16  ;;  %v2700_v16 = vor.u32 %v2762_v57, %v2699_v56 }
  0xdd   : > { %v890_v37 = vpop.f32.mrf.mxu3  ;;  %v907_v38 = vpop.f32.mrf.mxu0 }
  0xde   : > { %v844_v41 = vpop.f32.mrf.mxu1  ;;  %v911_v50 = vadd.f32 %v907_v38, %v892_v44  ;;  %v2692_v38 = vor.u32 %v2761_v28, %v2691_v27  ;;  %v815_v44 = vadd.f32 %v814_v35, %v813_v61 }
  0xdf   : > { %v860_v43 = vpop.f32.mrf.mxu2 }
  0xe0   : > { %2671 = vmatmul.msk.bf16.vlgmr.msrb.gmra.mxu0 %vm579_vm4, %v1679_v32  ;;  %v1801_v32 = vld [vmem:[#allocation2 + $0xb8] sm:$0xf] }
  0xe1   : > { %1881 = vmatpush.bf16.msrb.mxu0 %v3163_v39 }
  0xe2   : > { %2679 = vmatmul.msk.bf16.vlgmr.msrb.gmra.mxu3 %vm579_vm4, %v1763_v42  ;;  %v823_v42 = vrot.slane %v822_v30, 2 }
  0xe3   : > { %1966 = vmatpush.bf16.msrb.mxu3 %v3043_v3 }
  0xe4   : > { %2674 = vmatmul.msk.bf16.vlgmr.msrb.gmra.mxu2 %vm579_vm4, %v1716_v45  ;;  %v824_v62 = vadd.f32 %v823_v42, %v822_v30  ;;  %v1980_v42 = vshrl.u32 %v2700_v16, 16 }
  0xe5   : > { %v909_v51 = vpop.f32.mrf.mxu0  ;;  %v976_v52 = vpop.f32.mrf.mxu3  ;;  %1950 = vmatpush.bf16.msrb.mxu2 %v3040_v2 }
  0xe6   : > { %v926_v54 = vpop.f32.mrf.mxu1  ;;  %v1898_v51 = vshll.u32 %v2692_v38, 16  ;;  %v825_v22 = vrot.slane %v824_v62, 1 }
  0xe7   : > { %v957_v58 = vpop.f32.mrf.mxu2  ;;  %v930_v1 = vadd.f32 %v926_v54, %v911_v50  ;;  %v1870_v50 = vld [vmem:[#allocation2 + $0xc8] sm:$0xf] }
  0xe8   : > { %v826_v35 = vadd.f32 %v825_v22, %v824_v62  ;;  %v2764_v62 = vld [vmem:[#allocation2 + $0xe0] sm:$0x10] }
  0xe9   : > { %2673 = vmatmul.msk.bf16.vlgmr.msrb.gmra.mxu1 %vm579_vm4, %v1717_v55  ;;  %v961_v6 = vadd.f32 %v957_v58, %v930_v1 }
  0xea   : > { %1912 = vmatpush.bf16.msrb.mxu1 %v3192_v60 }
  0xeb   : > { %v980_v17 = vadd.f32 %v976_v52, %v961_v6  ;;  %v323_v52 = vld [vmem:[%s3065_s19 + $0x1c0] sm:$0xff]  ;;  %v325_v6 = vld [vmem:[%s3065_s19 + $0x1d0] sm:$0xff] }
  0xec   : > { %v395_v58 = vpack.c.bf16 %v323_v52, %v323_v52 }
  0xed   : > { %v978_v11 = vpop.f32.mrf.mxu3  ;;  %v995_v12 = vpop.f32.mrf.mxu0 }
  0xee   : > { %v928_v14 = vpop.f32.mrf.mxu1  ;;  %v999_v23 = vadd.f32 %v995_v12, %v980_v17  ;;  %v2763_v11 = vld [vmem:[#allocation2 + $0xd0] sm:$0x10]  ;;  %527 = vst.msk [vmem:[#allocation2 + $0xe0] sm:$0xf] %vm411_vm1, %v395_v58  ;;  %v397_v12 = vpack.c.bf16 %v325_v6, %v325_v6  ;;  %v2023_v58 = vld [vmem:[#allocation2 + $0xd8] sm:$0xf] }
  0xef   : > { %v959_v19 = vpop.f32.mrf.mxu2  ;;  %v2707_v24 = vor.u32 %v2763_v11, %v2706_v10  ;;  %v332_v10 = vld [vmem:[%s3065_s19 + $0x208] sm:$0x1]  ;;  %v2004_v11 = vld [vmem:[#allocation2 + $0xd0] sm:$0xf] }
  0xf0   : > { %2680 = vmatmul.msk.bf16.vlgmr.msra.gmra.mxu0 %vm579_vm4, %v1782_v13  ;;  %v816_v13 = vrot.slane %v815_v44, 1  ;;  %v1900_v19 = vrot.slane %v1898_v51, 1  ;;  %531 = vst.msk [vmem:[#allocation2 + $0xe8] sm:$0xf] %vm411_vm1, %v397_v12 }
  0xf1   : > { %1996 = vmatpush.bf16.msra.mxu0 %v3059_v7 }
  0xf2   : > { %2687 = vmatmul.msk.bf16.vlgmr.msra.gmra.mxu3 %vm579_vm4, %v1851_v18  ;;  %v1896_v18 = vshrl.u32 %v2692_v38, 16 }
  0xf3   : > { %2065 = vmatpush.bf16.msra.mxu3 %v3175_v48 }
  0xf4   : > { %2686 = vmatmul.msk.bf16.vlgmr.msra.gmra.mxu2 %vm579_vm4, %v1832_v20  ;;  %v1939_v20 = vld [vmem:[#allocation2 + $0xc8] sm:$0xf]  ;;  %v1901_v30 = vor.u32 %v1900_v19, %v1896_v18  ;;  %v544_v18 = vld [vmem:[#allocation2 + $0x104] sm:$0x1] }
  0xf5   : > { %v997_v25 = vpop.f32.mrf.mxu0  ;;  %v1080_v26 = vpop.f32.mrf.mxu3  ;;  %2034 = vmatpush.bf16.msra.mxu2 %v3153_v34  ;;  %v2713_v59 = vld [vmem:[#allocation2 + $0xe0] sm:$0xf] }
  0xf6   : > { %v1026_v31 = vpop.f32.mrf.mxu1  ;;  %v817_v25 = vadd.f32 %v816_v13, %v815_v44  ;;  %v331_v13 = vld [vmem:[%s3065_s19 + $0x200] sm:$0xff] }
  0xf7   : > { %v1030_v36 = vadd.f32 %v1026_v31, %v999_v23  ;;  %v1064_v37 = vpop.f32.mrf.mxu2 }
  0xf8   : > { %v1081_v17 = vadd.f32 %v1080_v26, %v1064_v37  ;;  %v1982_v26 = vshll.u32 %v2700_v16, 16 }
  0xf9   : > { %2606 = vst.msk [vmem:[%s3347_s16 + $0x8] sm:$0xff] %vm809_vm6, %v1030_v36  ;;  %v1033_v40 = vsel %vm809_vm6, %v1030_v36, 0.0  ;;  %v1041_v41 = vmul.f32 %v1030_v36, %v1030_v36  ;;  %2681 = vmatmul.msk.bf16.vlgmr.msra.gmra.mxu1 %vm579_vm4, %v1801_v32 }
  0xfa   : > { %v1034_v43 = vrot.slane %v1033_v40, 4  ;;  %2015 = vmatpush.bf16.msra.mxu1 %v3051_v5 }
  0xfb   : > { %v1042_v45 = vsel %vm809_vm6, %v1041_v41, 0.0 }
  0xfc   : > { %v1035_v47 = vadd.f32 %v1034_v43, %v1033_v40  ;;  %v1043_v49 = vrot.slane %v1042_v45, 4  ;;  %v2051_v40 = vshll.u32 %v2707_v24, 16  ;;  %v1984_v43 = vrot.slane %v1982_v26, 1 }
  0xfd   : > { %v1082_v54 = vpop.f32.mrf.mxu3  ;;  %v1110_v55 = vpop.f32.mrf.mxu0 }
  0xfe   : > { %v1036_v63 = vrot.slane %v1035_v47, 2  ;;  %v1044_v0 = vadd.f32 %v1043_v49, %v1042_v45  ;;  %v1028_v1 = vpop.f32.mrf.mxu1  ;;  %v1114_v29 = vadd.f32 %v1110_v55, %v1081_v17  ;;  %v2049_v45 = vshrl.u32 %v2707_v24, 16  ;;  %v329_v54 = vld [vmem:[%s3065_s19 + $0x1f0] sm:$0xff] }
  0xff   : > { %v1066_v9 = vpop.f32.mrf.mxu2  ;;  %v2053_v46 = vrot.slane %v2051_v40, 1  ;;  %v1985_v49 = vor.u32 %v1984_v43, %v1980_v42  ;;  %v401_v57 = vpack.c.bf16 %v329_v54, %v329_v54  ;;  %v327_v1 = vld [vmem:[%s3065_s19 + $0x1e0] sm:$0xff]  ;;  %v403_v17 = vpack.c.bf16 %v331_v13, %v331_v13 }
 0x100   : > { %v1037_v14 = vadd.f32 %v1036_v63, %v1035_v47  ;;  %v1045_v15 = vrot.slane %v1044_v0, 2  ;;  %2688 = vmatmul.msk.bf16.vlgmr.msrb.gmra.mxu0 %vm579_vm4, %v1870_v50  ;;  %v399_v8 = vpack.c.bf16 %v327_v1, %v327_v1  ;;  %v328_v9 = vld [vmem:[%s3065_s19 + $0x1e8] sm:$0x1] }
 0x101   : > { %2084 = vmatpush.bf16.msrb.mxu0 %v3150_v33  ;;  %v2054_v53 = vor.u32 %v2053_v46, %v2049_v45  ;;  %539 = vst.msk [vmem:[#allocation2 + $0xf8] sm:$0xf] %vm411_vm1, %v401_v57  ;;  %v400_v12 = vpack.c.bf16 %v328_v9, %v328_v9  ;;  %v333_v45 = vld [vmem:[%s3065_s19 + $0x210] sm:$0xff] }
 0x102   : > { %v1038_v61 = vrot.slane %v1037_v14, 1  ;;  %v1046_v23 = vadd.f32 %v1045_v15, %v1044_v0  ;;  %2696 = vmatmul.msk.bf16.vlgmr.msrb.gmra.mxu3 %vm579_vm4, %v1938_v4  ;;  %v2714_v0 = vor.u32 %v2764_v62, %v2713_v59  ;;  %535 = vst.msk [vmem:[#allocation2 + $0xf0] sm:$0xf] %vm411_vm1, %v399_v8 }
 0x103   : > { %2172 = vmatpush.bf16.msrb.mxu3 %v3040_v2  ;;  %543 = vst.msk [vmem:[#allocation2 + $0x100] sm:$0xf] %vm411_vm1, %v403_v17 }
 0x104   : > { %v1039_v27 = vadd.f32 %v1038_v61, %v1037_v14  ;;  %v1047_v28 = vrot.slane %v1046_v23, 1  ;;  %2695 = vmatmul.msk.bf16.vlgmr.msrb.gmra.mxu2 %vm579_vm4, %v1939_v20  ;;  %v404_v14 = vpack.c.bf16 %v332_v10, %v332_v10  ;;  %v2120_v19 = vshll.u32 %v2714_v0, 16 }
 0x105   : > { %v1112_v31 = vpop.f32.mrf.mxu0  ;;  %v1179_v32 = vpop.f32.mrf.mxu3  ;;  %2134 = vmatpush.bf16.msrb.mxu2 %v3192_v60 }
 0x106   : > { %v3414_v36 = vadd.f32 %v1039_v27, %v817_v25  ;;  %v1048_v37 = vadd.f32 %v1047_v28, %v1046_v23  ;;  %v1129_v38 = vpop.f32.mrf.mxu1  ;;  %v545_v22 = vsel %vm3077_vm5, %v404_v14, %v544_v18  ;;  %v2118_v25 = vshrl.u32 %v2714_v0, 16 }
 0x107   : > { %v1148_v2 = vpop.f32.mrf.mxu2  ;;  %v1133_v44 = vadd.f32 %v1129_v38, %v1114_v29  ;;  %v2122_v27 = vrot.slane %v2120_v19, 1  ;;  %546 = vst [vmem:[#allocation2 + $0x104] sm:$0x1] %v545_v22 }
 0x108   : > { %v3416_v41 = vadd.f32 %v1048_v37, %v826_v35  ;;  %v2245_v10 = vld [vmem:[#allocation2 + $0xf8] sm:$0xf] }
 0x109   : > { %2693 = vmatmul.msk.bf16.vlgmr.msrb.gmra.mxu1 %vm579_vm4, %v1901_v30  ;;  %v1152_v47 = vadd.f32 %v1148_v2, %v1133_v44  ;;  %v2073_v30 = vld [vmem:[#allocation2 + $0xe0] sm:$0xf]  ;;  %v2123_v40 = vor.u32 %v2122_v27, %v2118_v25 }
 0x10a   : > { %2103 = vmatpush.bf16.msrb.mxu1 %v3163_v39 }
 0x10b   : > { %v1183_v55 = vadd.f32 %v1179_v32, %v1152_v47  ;;  %v2161_v32 = vld [vmem:[#allocation2 + $0xe8] sm:$0xf] }
 0x10d   : > { %v1181_v50 = vpop.f32.mrf.mxu3  ;;  %v1198_v51 = vpop.f32.mrf.mxu0 }
 0x10e   : > { %v1131_v52 = vpop.f32.mrf.mxu1  ;;  %v1202_v63 = vadd.f32 %v1198_v51, %v1183_v55  ;;  %v2721_v50 = vld [vmem:[#allocation2 + $0xe0] sm:$0xf]  ;;  %v2765_v51 = vld [vmem:[#allocation2 + $0xe0] sm:$0x10]  ;;  %v2092_v55 = vld [vmem:[#allocation2 + $0xe8] sm:$0xf] }
 0x10f   : > { %v1150_v56 = vpop.f32.mrf.mxu2  ;;  %v405_v52 = vpack.c.bf16 %v333_v45, %v333_v45 }
 0x110   : > { %2701 = vmatmul.msk.bf16.vlgmr.msra.gmra.mxu0 %vm579_vm4, %v1985_v49 }
 0x111   : > { %2188 = vmatpush.bf16.msra.mxu0 %v3043_v3  ;;  %547 = vst.msk [vmem:[#allocation2 + $0x108] sm:$0xf] %vm411_vm1, %v405_v52 }
 0x112   : > { %2708 = vmatmul.msk.bf16.vlgmr.msra.gmra.mxu3 %vm579_vm4, %v2054_v53 }
 0x113   : > { %2256 = vmatpush.bf16.msra.mxu3 %v3153_v34  ;;  %v536_v34 = vld [vmem:[#allocation2 + $0xf4] sm:$0x1] }
 0x114   : > { %2703 = vmatmul.msk.bf16.vlgmr.msra.gmra.mxu2 %vm579_vm4, %v2023_v58  ;;  %v2722_v58 = vor.u32 %v2765_v51, %v2721_v50 }
 0x115   : > { %v1200_v4 = vpop.f32.mrf.mxu0  ;;  %v1286_v6 = vpop.f32.mrf.mxu3  ;;  %2237 = vmatpush.bf16.msra.mxu2 %v3051_v5  ;;  %v537_v5 = vsel %vm3077_vm5, %v400_v12, %v536_v34  ;;  %v2767_v12 = vld [vmem:[#allocation2 + $0x100] sm:$0x10] }
 0x116   : > { %v1217_v3 = vpop.f32.mrf.mxu1  ;;  %538 = vst [vmem:[#allocation2 + $0xf4] sm:$0x1] %v537_v5  ;;  %v2160_v4 = vld [vmem:[#allocation2 + $0xe0] sm:$0xf] }
 0x117   : > { %v1221_v15 = vadd.f32 %v1217_v3, %v1202_v63  ;;  %v1248_v16 = vpop.f32.mrf.mxu2  ;;  %v2204_v63 = vshll.u32 %v2722_v58, 16 }
 0x119   : > { %2702 = vmatmul.msk.bf16.vlgmr.msra.gmra.mxu1 %vm579_vm4, %v2004_v11  ;;  %v1252_v20 = vadd.f32 %v1248_v16, %v1221_v15  ;;  %v2735_v11 = vld [vmem:[#allocation2 + $0x100] sm:$0xf]  ;;  %v2206_v14 = vrot.slane %v2204_v63, 1  ;;  %v2226_v15 = vld [vmem:[#allocation2 + $0xf0] sm:$0xf] }
 0x11a   : > { %2218 = vmatpush.bf16.msra.mxu1 %v3059_v7 }
 0x11b   : > { %2628 = vst.msk [vmem:[%s3347_s16 + $0x10] sm:$0xff] %vm809_vm6, %v1252_v20  ;;  %v1255_v61 = vsel %vm809_vm6, %v1252_v20, 0.0  ;;  %v1263_v23 = vmul.f32 %v1252_v20, %v1252_v20 }
 0x11c   : > { %v1256_v24 = vrot.slane %v1255_v61, 4 }
 0x11d   : > { %v1264_v28 = vsel %vm809_vm6, %v1263_v23, 0.0  ;;  %v1288_v26 = vpop.f32.mrf.mxu3  ;;  %v1302_v29 = vpop.f32.mrf.mxu0  ;;  %v2766_v8 = vld [vmem:[#allocation2 + $0xf0] sm:$0x10] }
 0x11e   : > { %v1219_v21 = vpop.f32.mrf.mxu1  ;;  %v1257_v31 = vadd.f32 %v1256_v24, %v1255_v61  ;;  %v1265_v7 = vrot.slane %v1264_v28, 4  ;;  %v1303_v46 = vadd.f32 %v1302_v29, %v1286_v6  ;;  %v2728_v6 = vld [vmem:[#allocation2 + $0xf0] sm:$0xf] }
 0x11f   : > { %v1250_v35 = vpop.f32.mrf.mxu2  ;;  %v2729_v13 = vor.u32 %v2766_v8, %v2728_v6 }
 0x120   : > { %v1258_v37 = vrot.slane %v1257_v31, 2  ;;  %v1266_v38 = vadd.f32 %v1265_v7, %v1264_v28  ;;  %2709 = vmatmul.msk.bf16.vlgmr.msrb.gmra.mxu0 %vm579_vm4, %v2073_v30 }
 0x121   : > { %2287 = vmatpush.bf16.msrb.mxu0 %v3175_v48  ;;  %v2273_v34 = vshll.u32 %v2729_v13, 16  ;;  %v2271_v23 = vshrl.u32 %v2729_v13, 16 }
 0x122   : > { %v1259_v2 = vadd.f32 %v1258_v37, %v1257_v31  ;;  %v1267_v42 = vrot.slane %v1266_v38, 2  ;;  %2717 = vmatmul.msk.bf16.vlgmr.msrb.gmra.mxu3 %vm579_vm4, %v2161_v32 }
 0x123   : > { %2356 = vmatpush.bf16.msrb.mxu3 %v3192_v60  ;;  %v2275_v24 = vrot.slane %v2273_v34, 1 }
 0x124   : > { %v1260_v43 = vrot.slane %v1259_v2, 1  ;;  %v1268_v44 = vadd.f32 %v1267_v42, %v1266_v38  ;;  %2715 = vmatmul.msk.bf16.vlgmr.msrb.gmra.mxu2 %vm579_vm4, %v2123_v40 }
 0x125   : > { %v1304_v47 = vpop.f32.mrf.mxu0  ;;  %v1370_v49 = vpop.f32.mrf.mxu3  ;;  %2325 = vmatpush.bf16.msrb.mxu2 %v3163_v39  ;;  %v2276_v29 = vor.u32 %v2275_v24, %v2271_v23 }
 0x126   : > { %v1261_v48 = vadd.f32 %v1260_v43, %v1259_v2  ;;  %v1269_v53 = vrot.slane %v1268_v44, 1  ;;  %v1332_v54 = vpop.f32.mrf.mxu1  ;;  %v2314_v43 = vld [vmem:[#allocation2 + $0x108] sm:$0xf] }
 0x127   : > { %v1351_v56 = vpop.f32.mrf.mxu2  ;;  %v1336_v59 = vadd.f32 %v1332_v54, %v1303_v46 }
 0x128   : > { %v3453_v60 = vadd.f32 %v1261_v48, %v3414_v36  ;;  %v1270_v57 = vadd.f32 %v1269_v53, %v1268_v44  ;;  %v2295_v53 = vld [vmem:[#allocation2 + $0x100] sm:$0xf] }
 0x129   : > { %2710 = vmatmul.msk.bf16.vlgmr.msrb.gmra.mxu1 %vm579_vm4, %v2092_v55  ;;  %v1355_v39 = vadd.f32 %v1351_v56, %v1336_v59 }
 0x12a   : > { %v3457_v62 = vadd.f32 %v1270_v57, %v3416_v41  ;;  %2306 = vmatpush.bf16.msrb.mxu1 %v3150_v33  ;;  %v2202_v41 = vshrl.u32 %v2722_v58, 16  ;;  %v2736_v33 = vor.u32 %v2767_v12, %v2735_v11 }
 0x12b   : > { %v1374_v36 = vadd.f32 %v1370_v49, %v1355_v39 }
 0x12c   : > { %v2207_v17 = vor.u32 %v2206_v14, %v2202_v41  ;;  %v2342_v20 = vshll.u32 %v2736_v33, 16  ;;  %v2340_v27 = vshrl.u32 %v2736_v33, 16 }
 0x12d   : > { %v1372_v0 = vpop.f32.mrf.mxu3  ;;  %v1401_v1 = vpop.f32.mrf.mxu0 }
 0x12e   : > { %v1334_v9 = vpop.f32.mrf.mxu1  ;;  %v1405_v16 = vadd.f32 %v1401_v1, %v1374_v36  ;;  %v2344_v28 = vrot.slane %v2342_v20, 1 }
 0x12f   : > { %v1353_v3 = vpop.f32.mrf.mxu2 }
 0x130   : > { %2718 = vmatmul.msk.bf16.vlgmr.msra.gmra.mxu0 %vm579_vm4, %v2160_v4  ;;  %v2345_v37 = vor.u32 %v2344_v28, %v2340_v27 }
 0x132   : > { %2725 = vmatmul.msk.bf16.vlgmr.msra.gmra.mxu3 %vm579_vm4, %v2245_v10 }
 0x134   : > { %2724 = vmatmul.msk.bf16.vlgmr.msra.gmra.mxu2 %vm579_vm4, %v2226_v15 }
 0x135   : > { %v1403_v18 = vpop.f32.mrf.mxu0  ;;  %v1470_v19 = vpop.f32.mrf.mxu3 }
 0x136   : > { %v1420_v5 = vpop.f32.mrf.mxu1 }
 0x137   : > { %v1424_v22 = vadd.f32 %v1420_v5, %v1405_v16  ;;  %v1439_v61 = vpop.f32.mrf.mxu2 }
 0x139   : > { %2723 = vmatmul.msk.bf16.vlgmr.msra.gmra.mxu1 %vm579_vm4, %v2207_v17  ;;  %v1443_v25 = vadd.f32 %v1439_v61, %v1424_v22 }
 0x13b   : > { %v1474_v26 = vadd.f32 %v1470_v19, %v1443_v25 }
 0x13d   : > { %2650 = vst.msk [vmem:[%s3347_s16 + $0x18] sm:$0xff] %vm809_vm6, %v1474_v26  ;;  %v1477_v30 = vsel %vm809_vm6, %v1474_v26, 0.0  ;;  %v1485_v21 = vmul.f32 %v1474_v26, %v1474_v26  ;;  %v1472_v31 = vpop.f32.mrf.mxu3  ;;  %v1508_v7 = vpop.f32.mrf.mxu0 }
 0x13e   : > { %v1422_v32 = vpop.f32.mrf.mxu1  ;;  %v1478_v35 = vrot.slane %v1477_v30, 4 }
 0x13f   : > { %v1486_v38 = vsel %vm809_vm6, %v1485_v21, 0.0  ;;  %v1441_v40 = vpop.f32.mrf.mxu2 }
 0x140   : > { %v1479_v2 = vadd.f32 %v1478_v35, %v1477_v30  ;;  %v1487_v42 = vrot.slane %v1486_v38, 4  ;;  %2730 = vmatmul.msk.bf16.vlgmr.msrb.gmra.mxu0 %vm579_vm4, %v2276_v29 }
 0x142   : > { %v1480_v44 = vrot.slane %v1479_v2, 2  ;;  %v1488_v45 = vadd.f32 %v1487_v42, %v1486_v38  ;;  %2737 = vmatmul.msk.bf16.vlgmr.msrb.gmra.mxu3 %vm579_vm4, %v2345_v37 }
 0x144   : > { %v1481_v46 = vadd.f32 %v1480_v44, %v1479_v2  ;;  %v1489_v47 = vrot.slane %v1488_v45, 2  ;;  %2732 = vmatmul.msk.bf16.vlgmr.msrb.gmra.mxu2 %vm579_vm4, %v2314_v43 }
 0x145   : > { %v1510_v49 = vpop.f32.mrf.mxu0  ;;  %v1573_v50 = vpop.f32.mrf.mxu3 }
 0x146   : > { %v1482_v51 = vrot.slane %v1481_v46, 1  ;;  %v1490_v52 = vadd.f32 %v1489_v47, %v1488_v45  ;;  %v1524_v48 = vpop.f32.mrf.mxu1 }
 0x147   : > { %v1554_v54 = vpop.f32.mrf.mxu2  ;;  %v1525_v57 = vadd.f32 %v1524_v48, %v1508_v7 }
 0x148   : > { %v1483_v55 = vadd.f32 %v1482_v51, %v1481_v46  ;;  %v1491_v56 = vrot.slane %v1490_v52, 1 }
 0x149   : > { %2731 = vmatmul.msk.bf16.vlgmr.msrb.gmra.mxu1 %vm579_vm4, %v2295_v53  ;;  %v1558_v39 = vadd.f32 %v1554_v54, %v1525_v57 }
 0x14a   : > { %v1492_v58 = vadd.f32 %v1491_v56, %v1490_v52  ;;  %v1484_v59 = vadd.f32 %v1483_v55, %v3453_v60 }
 0x14b   : > { %v1577_v6 = vadd.f32 %v1573_v50, %v1558_v39 }
 0x14c   : > { %v1493_v63 = vadd.f32 %v1492_v58, %v3457_v62 }
 0x14d   : > { %v1575_v0 = vpop.f32.mrf.mxu3  ;;  %v1592_v1 = vpop.f32.mrf.mxu0 }
 0x14e   : > { %v1526_v4 = vpop.f32.mrf.mxu1  ;;  %v1596_v9 = vadd.f32 %v1592_v1, %v1577_v6 }
 0x14f   : > { %v1556_v8 = vpop.f32.mrf.mxu2 }
 0x155   : > { %v1594_v36 = vpop.f32.mrf.mxu0  ;;  %v1661_v10 = vpop.f32.mrf.mxu3 }
 0x156   : > { %v1623_v3 = vpop.f32.mrf.mxu1 }
 0x157   : > { %v1627_v11 = vadd.f32 %v1623_v3, %v1596_v9  ;;  %v1642_v12 = vpop.f32.mrf.mxu2 }
 0x159   : > { %v1646_v13 = vadd.f32 %v1642_v12, %v1627_v11 }
 0x15b   : > { %v1665_v41 = vadd.f32 %v1661_v10, %v1646_v13 }
 0x15d   : > { %v1663_v14 = vpop.f32.mrf.mxu3  ;;  %v1692_v15 = vpop.f32.mrf.mxu0 }
 0x15e   : > { %v1625_v60 = vpop.f32.mrf.mxu1  ;;  %v1696_v33 = vadd.f32 %v1692_v15, %v1665_v41 }
 0x15f   : > { %v1644_v16 = vpop.f32.mrf.mxu2 }
 0x160   : > { %2672 = vst.msk [vmem:[%s3347_s16 + $0x20] sm:$0xff] %vm809_vm6, %v1696_v33  ;;  %v1699_v62 = vsel %vm809_vm6, %v1696_v33, 0.0  ;;  %v1707_v34 = vmul.f32 %v1696_v33, %v1696_v33 }
 0x161   : > { %v1700_v17 = vrot.slane %v1699_v62, 4 }
 0x162   : > { %v1708_v18 = vsel %vm809_vm6, %v1707_v34, 0.0 }
 0x163   : > { %v1701_v19 = vadd.f32 %v1700_v17, %v1699_v62  ;;  %v1709_v5 = vrot.slane %v1708_v18, 4 }
 0x165   : > { %v1702_v20 = vrot.slane %v1701_v19, 2  ;;  %v1710_v22 = vadd.f32 %v1709_v5, %v1708_v18  ;;  %v1694_v61 = vpop.f32.mrf.mxu0  ;;  %v1776_v23 = vpop.f32.mrf.mxu3 }
 0x166   : > { %v1730_v24 = vpop.f32.mrf.mxu1 }
 0x167   : > { %v1703_v25 = vadd.f32 %v1702_v20, %v1701_v19  ;;  %v1711_v27 = vrot.slane %v1710_v22, 2  ;;  %v1746_v28 = vpop.f32.mrf.mxu2 }
 0x168   : > { %v1747_v32 = vadd.f32 %v1746_v28, %v1730_v24 }
 0x169   : > { %v1704_v26 = vrot.slane %v1703_v25, 1  ;;  %v1712_v29 = vadd.f32 %v1711_v27, %v1710_v22 }
 0x16a   : > { %v1780_v42 = vadd.f32 %v1776_v23, %v1747_v32 }
 0x16b   : > { %v1705_v30 = vadd.f32 %v1704_v26, %v1703_v25  ;;  %v1713_v21 = vrot.slane %v1712_v29, 1 }
 0x16d   : > { %v1706_v31 = vadd.f32 %v1705_v30, %v1484_v59  ;;  %v1714_v7 = vadd.f32 %v1713_v21, %v1712_v29  ;;  %v1778_v35 = vpop.f32.mrf.mxu3  ;;  %v1795_v37 = vpop.f32.mrf.mxu0 }
 0x16e   : > { %v1732_v38 = vpop.f32.mrf.mxu1  ;;  %v1799_v43 = vadd.f32 %v1795_v37, %v1780_v42 }
 0x16f   : > { %v1715_v40 = vadd.f32 %v1714_v7, %v1493_v63  ;;  %v1748_v2 = vpop.f32.mrf.mxu2 }
 0x175   : > { %v1797_v44 = vpop.f32.mrf.mxu0  ;;  %v1864_v45 = vpop.f32.mrf.mxu3 }
 0x176   : > { %v1814_v46 = vpop.f32.mrf.mxu1 }
 0x177   : > { %v1845_v47 = vpop.f32.mrf.mxu2  ;;  %v1818_v49 = vadd.f32 %v1814_v46, %v1799_v43 }
 0x179   : > { %v1849_v50 = vadd.f32 %v1845_v47, %v1818_v49 }
 0x17b   : > { %v1868_v53 = vadd.f32 %v1864_v45, %v1849_v50 }
 0x17d   : > { %v1866_v51 = vpop.f32.mrf.mxu3  ;;  %v1883_v52 = vpop.f32.mrf.mxu0 }
 0x17e   : > { %v1816_v48 = vpop.f32.mrf.mxu1  ;;  %v1887_v55 = vadd.f32 %v1883_v52, %v1868_v53 }
 0x17f   : > { %v1847_v54 = vpop.f32.mrf.mxu2 }
 0x185   : > { %v1885_v56 = vpop.f32.mrf.mxu0  ;;  %v1968_v57 = vpop.f32.mrf.mxu3 }
 0x186   : > { %v1914_v58 = vpop.f32.mrf.mxu1 }
 0x187   : > { %v1918_v59 = vadd.f32 %v1914_v58, %v1887_v55  ;;  %v1952_v39 = vpop.f32.mrf.mxu2 }
 0x188   : > { %v1969_v14 = vadd.f32 %v1968_v57, %v1952_v39 }
 0x189   : > { %2694 = vst.msk [vmem:[%s3347_s16 + $0x28] sm:$0xff] %vm809_vm6, %v1918_v59  ;;  %v1921_v63 = vsel %vm809_vm6, %v1918_v59, 0.0  ;;  %v1929_v0 = vmul.f32 %v1918_v59, %v1918_v59 }
 0x18a   : > { %v1922_v1 = vrot.slane %v1921_v63, 4 }
 0x18b   : > { %v1930_v4 = vsel %vm809_vm6, %v1929_v0, 0.0 }
 0x18c   : > { %v1923_v6 = vadd.f32 %v1922_v1, %v1921_v63  ;;  %v1931_v8 = vrot.slane %v1930_v4, 4 }
 0x18d   : > { %v1970_v9 = vpop.f32.mrf.mxu3  ;;  %v1998_v36 = vpop.f32.mrf.mxu0 }
 0x18e   : > { %v1924_v10 = vrot.slane %v1923_v6, 2  ;;  %v1932_v3 = vadd.f32 %v1931_v8, %v1930_v4  ;;  %v1916_v11 = vpop.f32.mrf.mxu1  ;;  %v2002_v62 = vadd.f32 %v1998_v36, %v1969_v14 }
 0x18f   : > { %v1954_v12 = vpop.f32.mrf.mxu2 }
 0x190   : > { %v1925_v13 = vadd.f32 %v1924_v10, %v1923_v6  ;;  %v1933_v41 = vrot.slane %v1932_v3, 2 }
 0x192   : > { %v1926_v15 = vrot.slane %v1925_v13, 1  ;;  %v1934_v60 = vadd.f32 %v1933_v41, %v1932_v3 }
 0x194   : > { %v1927_v33 = vadd.f32 %v1926_v15, %v1925_v13  ;;  %v1935_v16 = vrot.slane %v1934_v60, 1 }
 0x195   : > { %v2000_v34 = vpop.f32.mrf.mxu0  ;;  %v2067_v17 = vpop.f32.mrf.mxu3 }
 0x196   : > { %v1936_v18 = vadd.f32 %v1935_v16, %v1934_v60  ;;  %v2017_v19 = vpop.f32.mrf.mxu1  ;;  %v3482_v5 = vadd.f32 %v1927_v33, %v1706_v31 }
 0x197   : > { %v2036_v20 = vpop.f32.mrf.mxu2  ;;  %v2021_v61 = vadd.f32 %v2017_v19, %v2002_v62 }
 0x198   : > { %v3484_v22 = vadd.f32 %v1936_v18, %v1715_v40 }
 0x199   : > { %v2040_v23 = vadd.f32 %v2036_v20, %v2021_v61 }
 0x19b   : > { %v2071_v28 = vadd.f32 %v2067_v17, %v2040_v23 }
 0x19d   : > { %v2069_v24 = vpop.f32.mrf.mxu3  ;;  %v2086_v25 = vpop.f32.mrf.mxu0 }
 0x19e   : > { %v2019_v27 = vpop.f32.mrf.mxu1  ;;  %v2090_v29 = vadd.f32 %v2086_v25, %v2071_v28 }
 0x19f   : > { %v2038_v26 = vpop.f32.mrf.mxu2 }
 0x1a5   : > { %v2088_v30 = vpop.f32.mrf.mxu0  ;;  %v2174_v21 = vpop.f32.mrf.mxu3 }
 0x1a6   : > { %v2105_v7 = vpop.f32.mrf.mxu1 }
 0x1a7   : > { %v2109_v32 = vadd.f32 %v2105_v7, %v2090_v29  ;;  %v2136_v35 = vpop.f32.mrf.mxu2 }
 0x1a9   : > { %v2140_v37 = vadd.f32 %v2136_v35, %v2109_v32 }
 0x1ab   : > { %2716 = vst.msk [vmem:[%s3347_s16 + $0x30] sm:$0xff] %vm809_vm6, %v2140_v37  ;;  %v2151_v49 = vmul.f32 %v2140_v37, %v2140_v37  ;;  %v2143_v51 = vsel %vm809_vm6, %v2140_v37, 0.0 }
 0x1ac   : > { %v2144_v57 = vrot.slane %v2143_v51, 4 }
 0x1ad   : > { %v2176_v31 = vpop.f32.mrf.mxu3  ;;  %v2190_v38 = vpop.f32.mrf.mxu0  ;;  %v2152_v54 = vsel %vm809_vm6, %v2151_v49, 0.0 }
 0x1ae   : > { %v2107_v40 = vpop.f32.mrf.mxu1  ;;  %v2191_v42 = vadd.f32 %v2190_v38, %v2174_v21  ;;  %v2153_v58 = vrot.slane %v2152_v54, 4  ;;  %v2145_v39 = vadd.f32 %v2144_v57, %v2143_v51 }
 0x1af   : > { %v2138_v2 = vpop.f32.mrf.mxu2 }
 0x1b0   : > { %v2154_v1 = vadd.f32 %v2153_v58, %v2152_v54  ;;  %v2146_v9 = vrot.slane %v2145_v39, 2 }
 0x1b2   : > { %v2155_v10 = vrot.slane %v2154_v1, 2  ;;  %v2147_v11 = vadd.f32 %v2146_v9, %v2145_v39 }
 0x1b4   : > { %v2156_v14 = vadd.f32 %v2155_v10, %v2154_v1 }
 0x1b5   : > { %v2258_v43 = vpop.f32.mrf.mxu3  ;;  %v2192_v44 = vpop.f32.mrf.mxu0 }
 0x1b6   : > { %v2220_v45 = vpop.f32.mrf.mxu1 }
 0x1b7   : > { %v2239_v46 = vpop.f32.mrf.mxu2  ;;  %v2224_v47 = vadd.f32 %v2220_v45, %v2191_v42 }
 0x1b9   : > { %v2243_v50 = vadd.f32 %v2239_v46, %v2224_v47 }
 0x1bb   : > { %v2262_v55 = vadd.f32 %v2258_v43, %v2243_v50 }
 0x1bd   : > { %v2260_v52 = vpop.f32.mrf.mxu3  ;;  %v2289_v48 = vpop.f32.mrf.mxu0 }
 0x1be   : > { %v2222_v53 = vpop.f32.mrf.mxu1  ;;  %v2293_v59 = vadd.f32 %v2289_v48, %v2262_v55 }
 0x1bf   : > { %v2241_v56 = vpop.f32.mrf.mxu2 }
 0x1c5   : > { %v2358_v63 = vpop.f32.mrf.mxu3  ;;  %v2291_v0 = vpop.f32.mrf.mxu0 }
 0x1c6   : > { %v2308_v4 = vpop.f32.mrf.mxu1 }
 0x1c7   : > { %v2312_v6 = vadd.f32 %v2308_v4, %v2293_v59  ;;  %v2327_v8 = vpop.f32.mrf.mxu2 }
 0x1c9   : > { %v2331_v36 = vadd.f32 %v2327_v8, %v2312_v6 }
 0x1cb   : > { %v2362_v3 = vadd.f32 %v2358_v63, %v2331_v36 }
 0x1cd   : > { %2738 = vst.msk [vmem:[%s3347_s16 + $0x38] sm:$0xff] %vm809_vm6, %v2362_v3  ;;  %v2365_v12 = vsel %vm809_vm6, %v2362_v3, 0.0  ;;  %v2373_v13 = vmul.f32 %v2362_v3, %v2362_v3  ;;  %v2360_v41 = vpop.f32.mrf.mxu3 }
 0x1ce   : > { %v2310_v15 = vpop.f32.mrf.mxu1  ;;  %v2366_v60 = vrot.slane %v2365_v12, 4 }
 0x1cf   : > { %2848 = shalt.err (!%p2845_p3)
}
 0x1d0   : > { %s2945_s16 = smov 128   ;;  %s2946_s17 = smov 8   ;;  %v2374_v33 = vsel %vm809_vm6, %v2373_v13, 0.0  ;;  %v2329_v16 = vpop.f32.mrf.mxu2  ;;  %v2148_v62 = vrot.slane %v2147_v11, 1  ;;  %v2367_v34 = vadd.f32 %v2366_v60, %v2365_v12  ;;  %v2157_v18 = vrot.slane %v2156_v14, 1 }
 0x1d1   : > { %2770 = dma.vmem_to_hbm [thread:$0]  (%p3022_p5), %s3495_s26, 1024, %s3497_s27, %s2386_s7, %s2945_s16, %s2945_s16, %s2946_s17   ;;  %v2375_v17 = vrot.slane %v2374_v33, 4  ;;  %vm2382_vm7 = vcmask 57344  }
 0x1d2   : > { %v2368_v19 = vrot.slane %v2367_v34, 2  ;;  %v2149_v61 = vadd.f32 %v2148_v62, %v2147_v11  ;;  %s2420_s20 = scalar_lea.hbm %s3594_s5, %s3003_s23  ;;  %s2390_s26 = sand.u32 1, %s3003_s23   ;;  %v2158_v25 = vadd.f32 %v2157_v18, %v2156_v14 }
 0x1d3   : > { %v2376_v20 = vadd.f32 %v2375_v17, %v2374_v33  ;;  %s2433_s8 = scalar_lea.hbm %s3595_s6, %s3003_s23  ;;  %s254_s9 = scalar_lea.vmem [#allocation5], %s3335_s14 }
 0x1d4   : > { %v2369_v23 = vadd.f32 %v2368_v19, %v2367_v34  ;;  %s3527_s10 = sshll.u32 %s254_s9, 4  ;;  %s3529_s11 = sshll.u32 %s2420_s20, 4  ;;  %v2150_v29 = vadd.f32 %v2149_v61, %v3482_v5  ;;  %v2159_v7 = vadd.f32 %v2158_v25, %v3484_v22  ;;  %s2423_s10 = int_to_ptr.vmem [resolvable:$true] %s3527_s10  ;;  %s2425_s11 = int_to_ptr.hbm [resolvable:$true] %s3529_s11 }
 0x1d5   : > { %v2377_v24 = vrot.slane %v2376_v20, 2  ;;  %s260_s12 = scalar_lea.vmem [#allocation7], %s3335_s14  ;;  %s3535_s15 = sshll.u32 %s2433_s8, 4  ;;  %s2438_s15 = int_to_ptr.hbm [resolvable:$true] %s3535_s15 }
 0x1d6   : > { %v2370_v28 = vrot.slane %v2369_v23, 1  ;;  %s3533_s13 = sshll.u32 %s260_s12, 4  ;;  %s2391_s23 = scalar_lea.sflag [#allocation6], %s2390_s26  ;;  %s2436_s13 = int_to_ptr.vmem [resolvable:$true] %s3533_s13 }
 0x1d7   : > { %v2378_v27 = vadd.f32 %v2377_v24, %v2376_v20  ;;  %s2863_s14 = sshra.s32 %s2425_s11, 4  ;;  %s2869_s19 = scalar_lea.hbm %s3594_s5, 2  ;;  %s2864_s14 = int_to_ptr.hbm [resolvable:$true] %s2863_s14 }
 0x1d8   : > { %v2371_v30 = vadd.f32 %v2370_v28, %v2369_v23  ;;  %s2865_s16 = scalar_lea.hbm %s2864_s14, 1  ;;  %p2870_p9 = scmp.lt.s32.totalorder %s2864_s14, %s3594_s5 }
 0x1d9   : > { %v2379_v26 = vrot.slane %v2378_v27, 1  ;;  %p2866_p4 = scmp.ne.s32.totalorder %s2864_s14, %s2865_s16  ;;  %p2871_p10 = scmp.lt.s32.totalorder %s2869_s19, %s2865_s16 }
 0x1da   : > { %v2372_v21 = vadd.f32 %v2371_v30, %v2150_v29 }
 0x1db   : > { %v2380_v32 = vadd.f32 %v2379_v26, %v2378_v27  ;;  %p2867_p7 = pnand %p2866_p4, %p3022_p5  ;;  %p2872_p11 = por %p2871_p10, %p2870_p9 }
 0x1dc   : > { %2383 = vst.msk [vmem:[%s254_s9] sm:$0x1] %vm2382_vm7, %v2372_v21 }
 0x1dd   : > { %v2381_v35 = vadd.f32 %v2380_v32, %v2159_v7  ;;  %p2868_p8 = pneg %p2867_p7 }
 0x1df   : > { %p2873_p12 = pnand %p2872_p11, %p2868_p8 }
 0x1e1   : > { %2876 = shalt.err (!%p2873_p12)
}
 0x1e2   : > { %2771 = dma.vmem_to_hbm [thread:$0]  (%p3022_p5), %s2423_s10, 16, %s2425_s11, %s2391_s23   ;;  %2384 = vst.msk [vmem:[%s260_s12] sm:$0x1] %vm2382_vm7, %v2381_v35 }
 0x1e3   : > { %s2891_s26 = sshra.s32 %s2438_s15, 4  ;;  %s2897_s14 = scalar_lea.hbm %s3595_s6, 2  ;;  %s2892_s26 = int_to_ptr.hbm [resolvable:$true] %s2891_s26 }
 0x1e4   : > { %s2893_s7 = scalar_lea.hbm %s2892_s26, 1  ;;  %p2898_p2 = scmp.lt.s32.totalorder %s2892_s26, %s3595_s6 }
 0x1e5   : > { %p2894_p13 = scmp.ne.s32.totalorder %s2892_s26, %s2893_s7  ;;  %p2899_p3 = scmp.lt.s32.totalorder %s2897_s14, %s2893_s7 }
 0x1e7   : > { %p2895_p0 = pnand %p2894_p13, %p3022_p5  ;;  %p2900_p4 = por %p2899_p3, %p2898_p2 }
 0x1e9   : > { %p2896_p1 = pneg %p2895_p0 }
 0x1eb   : > { %p2901_p7 = pnand %p2900_p4, %p2896_p1 }
 0x1ed   : > { %2904 = shalt.err (!%p2901_p7)
}
 0x1ee   : > { %2772 = dma.vmem_to_hbm [thread:$0]  (%p3022_p5), %s2436_s13, 16, %s2438_s15, %s2391_s23  }
 0x1ef PF: > { %p2786_p8 = scmp.ge.s32.totalorder %s2943_s3, 2  ;;  %s2449_s10 = sand.u32 1, %s2931_s21  }
 0x1f0   : > { %s2450_s11 = scalar_lea.sflag [#allocation4], %s2449_s10 }
 0x1f1   : > { %p2777_p9 = pnand %p2786_p8, %p3026_p6 }
 0x1f3   : > { %p2778_p10 = pneg %p2777_p9 }
 0x1f5   : > { %2922 = dma.done.wait (%p2778_p10), %s2450_s11, 1024  }
 0x1f6   : > { %2924 = vsyncadd (%p2778_p10), %s2450_s11, 4294966272  ;;  %s2459_s29 = sand.u32 1, %s2550_s24  }
 0x1f7   : > { %s2460_s12 = scalar_lea.sflag [#allocation6], %s2459_s29 }
 0x1f8   : > { %2926 = dma.done.wait (%p2778_p10), %s2460_s12, 32  }
 0x1f9   : > { %2928 = vsyncadd (%p2778_p10), %s2460_s12, 4294967264  ;;  %p20_p5 = scmp.ge.s32.totalorder %s3007_s25, 4   ;;  %s3600_s21 = smov %s2935_s22 }
 0x1fa   : > { %s3601_s22 = smov %s2939_s2  ;;  %s3602_s2 = smov %s3020_s28 }
 0x1fb   : > { %s3603_s3 = smov %s3007_s25  ;;  %22 = sbr.rel (!%p20_p5) target bundleno = 5 (0x5), region = 151 }
 0x200   :  { %2474 = vsyncpa [#allocation4], 1 }
 0x201   :  { %2476 = vsyncpa [#allocation4 + $0x1], 1 }
 0x202   :  { %2477 = vsyncpa [#allocation6], 1 }
 0x203   :  { %2479 = vsyncpa [#allocation6 + $0x1], 1 }

</bundles_post_ra>
